<compile_context>
chip_gen: v6e
topology: v6e:2x2x1
jax: 0.10.0
libtpu: 0.0.40
codegen_flags: <defaults>
</compile_context>

<pallas_src>
import functools
import math

import numpy as np
import jax
import jax.numpy as jnp
from jax.experimental import pallas as pl
from jax.experimental.pallas import tpu as pltpu

# ----------------------------- config (synthetic, small) --------------------
VOCAB_SIZE = 8          # stands in for 26
NUM_ION = 4             # stands in for 8
NUM_UNITS = 16          # stands in for 64
DIST_SCALE = 0.05       # distance_scale_factor
BN_EPS = 1e-5
_MASK_SENTINEL = 1.0e6  # |sentinel| >> 104 so exp(-|diff|) underflows to exactly 0


# ----------------------------- parameter init -------------------------------
def _bn_params(key, n):
    k1, k2, k3, k4 = jax.random.split(key, 4)
    gamma = 1.0 + 0.1 * jax.random.normal(k1, (n,), jnp.float32)
    beta = 0.1 * jax.random.normal(k2, (n,), jnp.float32)
    mean = 0.1 * jax.random.normal(k3, (n,), jnp.float32)
    var = 1.0 + 0.1 * jax.random.uniform(k4, (n,), jnp.float32)
    return gamma, beta, mean, var


def init_params(key, vocab, num_ion, units):
    C = vocab * num_ion + 1
    U = units
    ks = jax.random.split(key, 18)
    w = lambda k, s: 0.1 * jax.random.normal(k, s, jnp.float32)
    b = lambda k, s: 0.05 * jax.random.normal(k, s, jnp.float32)
    return dict(
        conv1_w=w(ks[0], (U, C)),         conv1_b=b(ks[1], (U,)),
        conv2_w=w(ks[2], (2 * U, U)),     conv2_b=b(ks[3], (2 * U,)),
        conv3_w=w(ks[4], (4 * U, 2 * U)), conv3_b=b(ks[5], (4 * U,)),
        fc1_w=w(ks[6], (2 * U, 4 * U)),   fc1_b=b(ks[7], (2 * U,)),
        fc2_w=w(ks[8], (U, 2 * U)),       fc2_b=b(ks[9], (U,)),
        out_w=w(ks[10], (vocab, U)),      out_b=b(ks[11], (vocab,)),
        bn_in=_bn_params(ks[12], C),
        bn1=_bn_params(ks[13], U),
        bn2=_bn_params(ks[14], 2 * U),
        bn3=_bn_params(ks[15], 4 * U),
        bn4=_bn_params(ks[16], 2 * U),
        bn5=_bn_params(ks[17], U),
    )


def _fold_bn(gamma, beta, mean, var):
    s = gamma / jnp.sqrt(var + BN_EPS)
    t = beta - mean * s
    return s, t


def fold_params(p):
    """Fold eval-mode BatchNorm into conv/linear weights; transpose to [in,out]."""
    s_in, t_in = _fold_bn(*p['bn_in'])
    s1, t1 = _fold_bn(*p['bn1'])
    W1 = (s1[:, None] * p['conv1_w']) * s_in[None, :]
    b1 = s1 * (p['conv1_w'] @ t_in + p['conv1_b']) + t1
    s2, t2 = _fold_bn(*p['bn2'])
    W2 = s2[:, None] * p['conv2_w']; b2 = s2 * p['conv2_b'] + t2
    s3, t3 = _fold_bn(*p['bn3'])
    W3 = s3[:, None] * p['conv3_w']; b3 = s3 * p['conv3_b'] + t3
    s4, t4 = _fold_bn(*p['bn4'])
    W4 = s4[:, None] * p['fc1_w']; b4 = s4 * p['fc1_b'] + t4
    s5, t5 = _fold_bn(*p['bn5'])
    W5 = s5[:, None] * p['fc2_w']; b5 = s5 * p['fc2_b'] + t5
    return dict(
        w1=W1.T, b1=b1[None, :], w2=W2.T, b2=b2[None, :], w3=W3.T, b3=b3[None, :],
        w4=W4.T, b4=b4[None, :], w5=W5.T, b5=b5[None, :],
        wout=p['out_w'].T, bout=p['out_b'][None, :],
    )


# ----------------------------- host-side padding / packing ------------------
def _rup(x, m):
    return ((x + m - 1) // m) * m


def pad_and_pack(folded, vocab, num_ion, units, compute_dtype=jnp.bfloat16):
    """Zero-pad every weight to 128-aligned shapes; split off the intensity row.

    compute_dtype controls the matmul operand dtype.  bf16 is the MXU fast
    path on ALL generations (v5e's 4x128 MXU is bf16-native; f32 operands are
    emulated) and halves weight DMA/VMEM.  Biases, the intensity row and all
    accumulation stay f32.
    NOTE: at real model sizes (VI=208) prefer padding K to 256 to fill the
    256-deep v6e/v7x MXU.
    """
    VI = vocab * num_ion
    U1, U2, U3 = units, 2 * units, 4 * units
    VIp, U1p, U2p, U3p, Vp = (_rup(VI, 128), _rup(U1, 128), _rup(U2, 128),
                              _rup(U3, 128), _rup(vocab, 128))

    def padm(w, r, c):
        return jnp.pad(w, ((0, r - w.shape[0]), (0, c - w.shape[1])))

    w1 = folded['w1']  # [VI+1, U1]
    return dict(
        w1f=padm(w1[:VI], VIp, U1p).astype(compute_dtype),   # distance part of conv1
        w1i=padm(w1[VI:VI + 1], 1, U1p),                      # intensity row (rank-1 add)
        b1=padm(folded['b1'], 1, U1p),
        w2=padm(folded['w2'], U1p, U2p).astype(compute_dtype),
        b2=padm(folded['b2'], 1, U2p),
        w3=padm(folded['w3'], U2p, U3p).astype(compute_dtype),
        b3=padm(folded['b3'], 1, U3p),
        w4=padm(folded['w4'], U3p, U2p).astype(compute_dtype),
        b4=padm(folded['b4'], 1, U2p),
        w5=padm(folded['w5'], U2p, U1p).astype(compute_dtype),
        b5=padm(folded['b5'], 1, U1p),
        wout=padm(folded['wout'], U1p, Vp).astype(compute_dtype),
        bout=padm(folded['bout'], 1, Vp),
    )


# ----------------------------- Pallas kernel --------------------------------
def _tnet_kernel(feat_dtype,
                 li_ref, ploc_ref, pint_ref,
                 w1f_ref, w1i_ref, b1_ref, w2_ref, b2_ref, w3_ref, b3_ref,
                 w4_ref, b4_ref, w5_ref, b5_ref, wo_ref, bo_ref,
                 out_ref):
    Bblk, T, VIp = li_ref.shape          # li:   [Bblk, T, VIp]   (VIp % 128 == 0)
    N = ploc_ref.shape[1]                # ploc: [Bblk, N, 1]
    rows = Bblk * T * N
    cd = w2_ref.dtype                    # matmul operand dtype (bf16 or f32)

    li = li_ref[...]                     # f32, scale-folded, sentinel -1e6 in masked/padded lanes
    ploc = ploc_ref[...]                 # f32, scale-folded, sentinel +1e6 where masked
    pint = pint_ref[...]                 # f32

    # ---- feature stage (the VALU/EUP-bound part) ----------------------------
    # diff in f32 (raw bins may exceed bf16's exact-int range), then a single
    # cast; sentinel encoding makes masked pairs' exp underflow to exactly 0,
    # replacing the two full-size mask multiplies of the reference.
    diff = ploc[:, None, :, :] - li[:, :, None, :]            # [Bblk, T, N, VIp] f32
    feat = jnp.exp(-jnp.abs(diff.astype(feat_dtype)))         # bf16 on v6e/v7x, f32 on v5e

    # ---- conv1: distance matmul + fused (intensity * w1_row + bias) ---------
    x = feat.reshape(rows, VIp).astype(cd)                    # no-op cast when feat_dtype == cd
    z = jnp.dot(x, w1f_ref[...], preferred_element_type=jnp.float32)
    U1p = z.shape[1]
    inten_b = pint * w1i_ref[...] + b1_ref[...]               # [Bblk, N, U1p] f32 (small)
    z = z.reshape(Bblk, T, N, U1p) + inten_b[:, None, :, :]
    h = jnp.maximum(z, 0.0).reshape(rows, U1p)

    # ---- conv2 / conv3 (1x1 convs == per-position matmuls), f32 accumulation
    h = jnp.maximum(
        jnp.dot(h.astype(cd), w2_ref[...], preferred_element_type=jnp.float32)
        + b2_ref[...], 0.0)
    h = jnp.maximum(
        jnp.dot(h.astype(cd), w3_ref[...], preferred_element_type=jnp.float32)
        + b3_ref[...], 0.0)
    U3p = h.shape[1]

    # ---- max-pool over the N peaks (sublane reduction) -----------------------
    g = jnp.max(h.reshape(Bblk * T, N, U3p), axis=1)          # [Bblk*T, U3p]

    # ---- fully connected head ------------------------------------------------
    f = jnp.maximum(
        jnp.dot(g.astype(cd), w4_ref[...], preferred_element_type=jnp.float32)
        + b4_ref[...], 0.0)
    f = jnp.maximum(
        jnp.dot(f.astype(cd), w5_ref[...], preferred_element_type=jnp.float32)
        + b5_ref[...], 0.0)
    logits = jnp.dot(f.astype(cd), wo_ref[...],
                     preferred_element_type=jnp.float32) + bo_ref[...]

    out_ref[...] = logits                 # [Bblk*T, Vp] sublane/lane-dense unmasked store


# ----------------------------- wrapper helpers --------------------------------
def _vmem_capacity_bytes():
    try:
        return int(pltpu.get_tpu_info().vmem_capacity_bytes)
    except Exception:
        return 128 << 20


def _choose_block_b(B, T, N, VIp, U1p, U2p, U3p, feat_itemsize, vmem_limit):
    # conservative per-batch-element live-set estimate: feature tensor + f32
    # conv outputs + double-buffered input tile
    per_b = T * N * (VIp * feat_itemsize + (U1p + U2p + U3p) * 4) + 2 * T * VIp * 4
    budget = max(vmem_limit // 2, 4 << 20)      # leave half for weights / pipelining slack
    bb = max(1, budget // max(per_b, 1))
    # keep >= 2 grid steps so the second TensorCore on v7x gets work
    bb = min(bb, max(1, (B + 1) // 2))
    return int(bb)


# ----------------------------- wrapper ----------------------------------------
def deepnovo_pointnet(location_index, peaks_location, peaks_intensity, packed,
                      scale=DIST_SCALE, block_b=None, feature_dtype=None):
    """location_index: [B,T,V,I] int; peaks_location: [B,N] int; peaks_intensity: [B,N] f32.

    block_b: batch elements per grid step (None -> derived from the VMEM budget).
    feature_dtype: dtype of the exp/abs feature chain; defaults to the weight
    dtype.  On v5e pass jnp.float32 (no bf16 VPU/EUP) while keeping bf16 weights.
    """
    B, T, V, I = location_index.shape
    N = peaks_location.shape[1]
    VI = V * I
    VIp, U1p = packed['w1f'].shape
    U2p = packed['b2'].shape[1]
    U3p = packed['b3'].shape[1]
    Vp = packed['bout'].shape[1]
    cd = packed['w1f'].dtype
    feat_dtype = feature_dtype if feature_dtype is not None else cd
    feat_itemsize = np.dtype(feat_dtype).itemsize

    # channels-last, 128-padded, scale-folded, sentinel-masked inputs
    li = location_index.reshape(B, T, VI).astype(jnp.float32)
    li = jnp.pad(li, ((0, 0), (0, 0), (0, VIp - VI)))
    li = jnp.where(li > 1e-5, li * scale, -_MASK_SENTINEL)          # masked/padded lanes -> -LARGE
    ploc = peaks_location.astype(jnp.float32).reshape(B, N, 1)
    ploc = jnp.where(ploc > 1e-5, ploc * scale, _MASK_SENTINEL)     # masked peaks -> +LARGE
    pint = peaks_intensity.astype(jnp.float32).reshape(B, N, 1)

    vmem_cap = _vmem_capacity_bytes()
    vmem_limit = max(min((vmem_cap * 3) // 4, 100 << 20), 32 << 20)  # ~96 MiB v5e/v6e, ~48 MiB v7x

    if block_b is None:
        block_b = _choose_block_b(B, T, N, VIp, U1p, U2p, U3p, feat_itemsize, vmem_limit)
    # the (Bblk*T, Vp) output block must be sublane-dense -> Bblk*T % 8 == 0
    m = 8 // math.gcd(T, 8)
    Bblk = max(1, min(int(block_b), B))
    Bblk = ((Bblk + m - 1) // m) * m
    Bp = pl.cdiv(B, Bblk) * Bblk

    if Bp != B:
        pad3 = ((0, Bp - B), (0, 0), (0, 0))
        li, ploc, pint = jnp.pad(li, pad3), jnp.pad(ploc, pad3), jnp.pad(pint, pad3)

    wnames = ['w1f', 'w1i', 'b1', 'w2', 'b2', 'w3', 'b3',
              'w4', 'b4', 'w5', 'b5', 'wout', 'bout']
    weight_args = [packed[k] for k in wnames]

    # Advisory cost estimate: the kernel is exp/EUP + VALU heavy, not matmul-heavy.
    rows = Bp * T * N
    flops = (2 * rows * (VIp * U1p + U1p * U2p + U2p * U3p)
             + 2 * Bp * T * (U3p * U2p + U2p * U1p + U1p * Vp))
    bytes_accessed = (4 * (li.size + ploc.size + pint.size) + 4 * Bp * T * Vp
                      + sum(int(a.size * a.dtype.itemsize) for a in weight_args))
    cost = pl.CostEstimate(flops=int(flops), transcendentals=int(rows * VIp),
                           bytes_accessed=int(bytes_accessed))

    def _call(single_buffer_weights):
        def const_spec(arr):
            nd = arr.ndim
            idx = lambda i, _nd=nd: (0,) * _nd
            if single_buffer_weights:
                # resident weights never change block index: one buffer is enough
                return pl.BlockSpec(arr.shape, idx, pipeline_mode=pl.Buffered(1))
            return pl.BlockSpec(arr.shape, idx)

        weight_specs = [const_spec(a) for a in weight_args]
        return pl.pallas_call(
            functools.partial(_tnet_kernel, feat_dtype),
            out_shape=jax.ShapeDtypeStruct((Bp * T, Vp), jnp.float32),
            grid=(Bp // Bblk,),
            in_specs=[
                pl.BlockSpec((Bblk, T, VIp), lambda i: (i, 0, 0)),
                pl.BlockSpec((Bblk, N, 1), lambda i: (i, 0, 0)),
                pl.BlockSpec((Bblk, N, 1), lambda i: (i, 0, 0)),
            ] + weight_specs,
            out_specs=pl.BlockSpec((Bblk * T, Vp), lambda i: (i, 0)),
            compiler_params=pltpu.CompilerParams(
                dimension_semantics=("parallel",),
                vmem_limit_bytes=int(vmem_limit)),
            cost_estimate=cost,
        )(li, ploc, pint, *weight_args)

    try:
        out = _call(True)
    except Exception:
        # pipeline_mode=pl.Buffered not supported by this JAX build -> default buffering
        out = _call(False)

    return out.reshape(Bp, T, Vp)[:B, :, :V]


# ----------------------------- pure-JAX reference ---------------------------
def reference_forward(location_index, peaks_location, peaks_intensity, folded,
                      scale=DIST_SCALE):
    B, T, V, I = location_index.shape
    N = peaks_location.shape[1]
    li = location_index.astype(jnp.float32).reshape(B, T, 1, V * I)
    pl_ = peaks_location.astype(jnp.float32).reshape(B, 1, N, 1)
    pi_ = peaks_intensity.reshape(B, 1, N, 1)
    pl_b = jnp.broadcast_to(pl_, (B, T, N, 1))
    pi_b = jnp.broadcast_to(pi_, (B, T, N, 1))
    feat = jnp.exp(-jnp.abs((pl_b - li) * scale))
    feat = feat * (pl_b > 1e-5).astype(jnp.float32) * (li > 1e-5).astype(jnp.float32)
    x = jnp.concatenate([feat, pi_b], axis=3).reshape(B * T, N, V * I + 1)
    h = jnp.maximum(x @ folded['w1'] + folded['b1'], 0.0)
    h = jnp.maximum(h @ folded['w2'] + folded['b2'], 0.0)
    h = jnp.maximum(h @ folded['w3'] + folded['b3'], 0.0)
    g = h.max(axis=1)
    f = jnp.maximum(g @ folded['w4'] + folded['b4'], 0.0)
    f = jnp.maximum(f @ folded['w5'] + folded['b5'], 0.0)
    return (f @ folded['wout'] + folded['bout']).reshape(B, T, V)


# ----------------------------- main ------------------------------------------
if __name__ == "__main__":
    B, T, N = 4, 4, 16
    key = jax.random.PRNGKey(0)
    k_par, k_li, k_pl, k_pi = jax.random.split(key, 4)

    params = init_params(k_par, VOCAB_SIZE, NUM_ION, NUM_UNITS)
    folded = fold_params(params)

    # "long" inputs in PyTorch -> int32 here (some zeros to exercise the masks)
    location_index = jax.random.randint(k_li, (B, T, VOCAB_SIZE, NUM_ION), 0, 60,
                                        dtype=jnp.int32)
    peaks_location = jax.random.randint(k_pl, (B, N), 0, 60, dtype=jnp.int32)
    peaks_intensity = jax.random.uniform(k_pi, (B, N), jnp.float32)

    ref = reference_forward(location_index, peaks_location, peaks_intensity, folded)

    # f32 matmul operands + f32 feature chain: tight check against the reference.
    packed_f32 = pad_and_pack(folded, VOCAB_SIZE, NUM_ION, NUM_UNITS, jnp.float32)
    out_f32 = jax.block_until_ready(
        deepnovo_pointnet(location_index, peaks_location, peaks_intensity,
                          packed_f32, block_b=2))
    assert out_f32.shape == (B, T, VOCAB_SIZE), out_f32.shape
    err = float(jnp.max(jnp.abs(out_f32 - ref)))
    assert err < 3e-4, f"f32 max abs err {err}"

    # bf16 matmul operands + bf16 feature chain (v6e/v7x fast path; on v5e keep
    # feature_dtype=jnp.float32 with bf16 weights), auto block_b path: sanity check.
    packed_bf16 = pad_and_pack(folded, VOCAB_SIZE, NUM_ION, NUM_UNITS, jnp.bfloat16)
    out_bf16 = jax.block_until_ready(
        deepnovo_pointnet(location_index, peaks_location, peaks_intensity,
                          packed_bf16))
    assert bool(jnp.all(jnp.isfinite(out_bf16)))
    rel = float(jnp.max(jnp.abs(out_bf16 - ref)) / (jnp.max(jnp.abs(ref)) + 1e-6))
    assert rel < 0.1, f"bf16 relative error too large: {rel}"

    print("KERNEL_OK")
</pallas_src>

<mosaic_0001>
module attributes {stable_mosaic.version = 11 : i64} {
  func.func @_tnet_kernel(%arg0: i32, %arg1: memref<2x4x128xf32, #tpu.memory_space<vmem>>, %arg2: memref<2x16x1xf32, #tpu.memory_space<vmem>>, %arg3: memref<2x16x1xf32, #tpu.memory_space<vmem>>, %arg4: memref<128x128xf32, #tpu.memory_space<vmem>>, %arg5: memref<1x128xf32, #tpu.memory_space<vmem>>, %arg6: memref<1x128xf32, #tpu.memory_space<vmem>>, %arg7: memref<128x128xf32, #tpu.memory_space<vmem>>, %arg8: memref<1x128xf32, #tpu.memory_space<vmem>>, %arg9: memref<128x128xf32, #tpu.memory_space<vmem>>, %arg10: memref<1x128xf32, #tpu.memory_space<vmem>>, %arg11: memref<128x128xf32, #tpu.memory_space<vmem>>, %arg12: memref<1x128xf32, #tpu.memory_space<vmem>>, %arg13: memref<128x128xf32, #tpu.memory_space<vmem>>, %arg14: memref<1x128xf32, #tpu.memory_space<vmem>>, %arg15: memref<128x128xf32, #tpu.memory_space<vmem>>, %arg16: memref<1x128xf32, #tpu.memory_space<vmem>>, %arg17: memref<8x128xf32, #tpu.memory_space<vmem>>) attributes {dimension_semantics = [#tpu.dimension_semantics<parallel>], iteration_bounds = array<i64: 2>, scalar_prefetch = 0 : i64, scratch_operands = 0 : i64, tpu.core_type = #tpu.core_type<tc>, window_params = [{transform_indices = @transform_0, window_bounds = array<i64: 2, 4, 128>}, {transform_indices = @transform_1, window_bounds = array<i64: 2, 16, 1>}, {transform_indices = @transform_2, window_bounds = array<i64: 2, 16, 1>}, {pipeline_mode = #tpu.pipeline_mode<synchronous>, transform_indices = @transform_3, window_bounds = array<i64: 128, 128>}, {pipeline_mode = #tpu.pipeline_mode<synchronous>, transform_indices = @transform_4, window_bounds = array<i64: 1, 128>}, {pipeline_mode = #tpu.pipeline_mode<synchronous>, transform_indices = @transform_5, window_bounds = array<i64: 1, 128>}, {pipeline_mode = #tpu.pipeline_mode<synchronous>, transform_indices = @transform_6, window_bounds = array<i64: 128, 128>}, {pipeline_mode = #tpu.pipeline_mode<synchronous>, transform_indices = @transform_7, window_bounds = array<i64: 1, 128>}, {pipeline_mode = #tpu.pipeline_mode<synchronous>, transform_indices = @transform_8, window_bounds = array<i64: 128, 128>}, {pipeline_mode = #tpu.pipeline_mode<synchronous>, transform_indices = @transform_9, window_bounds = array<i64: 1, 128>}, {pipeline_mode = #tpu.pipeline_mode<synchronous>, transform_indices = @transform_10, window_bounds = array<i64: 128, 128>}, {pipeline_mode = #tpu.pipeline_mode<synchronous>, transform_indices = @transform_11, window_bounds = array<i64: 1, 128>}, {pipeline_mode = #tpu.pipeline_mode<synchronous>, transform_indices = @transform_12, window_bounds = array<i64: 128, 128>}, {pipeline_mode = #tpu.pipeline_mode<synchronous>, transform_indices = @transform_13, window_bounds = array<i64: 1, 128>}, {pipeline_mode = #tpu.pipeline_mode<synchronous>, transform_indices = @transform_14, window_bounds = array<i64: 128, 128>}, {pipeline_mode = #tpu.pipeline_mode<synchronous>, transform_indices = @transform_15, window_bounds = array<i64: 1, 128>}, {transform_indices = @transform_16, window_bounds = array<i64: 8, 128>}]} {
    %c0 = arith.constant 0 : index
    %c0_0 = arith.constant 0 : index
    %c0_1 = arith.constant 0 : index
    %0 = vector.load %arg1[%c0, %c0_0, %c0_1] : memref<2x4x128xf32, #tpu.memory_space<vmem>>, vector<2x4x128xf32>
    %c0_2 = arith.constant 0 : index
    %c0_3 = arith.constant 0 : index
    %c0_4 = arith.constant 0 : index
    %1 = vector.load %arg2[%c0_2, %c0_3, %c0_4] : memref<2x16x1xf32, #tpu.memory_space<vmem>>, vector<2x16x1xf32>
    %c0_5 = arith.constant 0 : index
    %c0_6 = arith.constant 0 : index
    %c0_7 = arith.constant 0 : index
    %2 = vector.load %arg3[%c0_5, %c0_6, %c0_7] : memref<2x16x1xf32, #tpu.memory_space<vmem>>, vector<2x16x1xf32>
    %3 = vector.shape_cast %1 : vector<2x16x1xf32> to vector<2x1x16x1xf32>
    %4 = vector.shape_cast %0 : vector<2x4x128xf32> to vector<2x4x1x128xf32>
    %5 = vector.broadcast %3 : vector<2x1x16x1xf32> to vector<2x4x16x128xf32>
    %6 = vector.broadcast %4 : vector<2x4x1x128xf32> to vector<2x4x16x128xf32>
    %7 = arith.subf %5, %6 : vector<2x4x16x128xf32>
    %8 = math.absf %7 : vector<2x4x16x128xf32>
    %cst = arith.constant 0.000000e+00 : f32
    %9 = vector.broadcast %cst : f32 to vector<2x4x16x128xf32>
    %10 = arith.subf %9, %8 : vector<2x4x16x128xf32>
    %11 = math.exp %10 : vector<2x4x16x128xf32>
    %12 = vector.shape_cast %11 : vector<2x4x16x128xf32> to vector<128x128xf32>
    %c0_8 = arith.constant 0 : index
    %c0_9 = arith.constant 0 : index
    %13 = vector.load %arg4[%c0_8, %c0_9] : memref<128x128xf32, #tpu.memory_space<vmem>>, vector<128x128xf32>
    %cst_10 = arith.constant dense<0.000000e+00> : vector<128x128xf32>
    %14 = tpu.matmul %12, %13, %cst_10 {dimension_numbers = #tpu.dot_dimension_numbers<[1], [0], [0], [1], [0, 0, 1, 1], [], []>} : vector<128x128xf32>, vector<128x128xf32>, vector<128x128xf32> -> vector<128x128xf32>
    %c0_11 = arith.constant 0 : index
    %c0_12 = arith.constant 0 : index
    %15 = vector.load %arg5[%c0_11, %c0_12] : memref<1x128xf32, #tpu.memory_space<vmem>>, vector<1x128xf32>
    %16 = vector.shape_cast %15 : vector<1x128xf32> to vector<1x1x128xf32>
    %17 = vector.broadcast %2 : vector<2x16x1xf32> to vector<2x16x128xf32>
    %18 = vector.broadcast %16 : vector<1x1x128xf32> to vector<2x16x128xf32>
    %19 = arith.mulf %17, %18 : vector<2x16x128xf32>
    %c0_13 = arith.constant 0 : index
    %c0_14 = arith.constant 0 : index
    %20 = vector.load %arg6[%c0_13, %c0_14] : memref<1x128xf32, #tpu.memory_space<vmem>>, vector<1x128xf32>
    %21 = vector.shape_cast %20 : vector<1x128xf32> to vector<1x1x128xf32>
    %22 = vector.broadcast %21 : vector<1x1x128xf32> to vector<2x16x128xf32>
    %23 = arith.addf %19, %22 : vector<2x16x128xf32>
    %24 = vector.shape_cast %14 : vector<128x128xf32> to vector<2x4x16x128xf32>
    %25 = vector.shape_cast %23 : vector<2x16x128xf32> to vector<2x1x16x128xf32>
    %26 = vector.broadcast %25 : vector<2x1x16x128xf32> to vector<2x4x16x128xf32>
    %27 = arith.addf %24, %26 : vector<2x4x16x128xf32>
    %cst_15 = arith.constant 0.000000e+00 : f32
    %28 = vector.broadcast %cst_15 : f32 to vector<2x4x16x128xf32>
    %29 = arith.maximumf %27, %28 : vector<2x4x16x128xf32>
    %30 = vector.shape_cast %29 : vector<2x4x16x128xf32> to vector<128x128xf32>
    %c0_16 = arith.constant 0 : index
    %c0_17 = arith.constant 0 : index
    %31 = vector.load %arg7[%c0_16, %c0_17] : memref<128x128xf32, #tpu.memory_space<vmem>>, vector<128x128xf32>
    %cst_18 = arith.constant dense<0.000000e+00> : vector<128x128xf32>
    %32 = tpu.matmul %30, %31, %cst_18 {dimension_numbers = #tpu.dot_dimension_numbers<[1], [0], [0], [1], [0, 0, 1, 1], [], []>} : vector<128x128xf32>, vector<128x128xf32>, vector<128x128xf32> -> vector<128x128xf32>
    %c0_19 = arith.constant 0 : index
    %c0_20 = arith.constant 0 : index
    %33 = vector.load %arg8[%c0_19, %c0_20] : memref<1x128xf32, #tpu.memory_space<vmem>>, vector<1x128xf32>
    %34 = vector.broadcast %33 : vector<1x128xf32> to vector<128x128xf32>
    %35 = arith.addf %32, %34 : vector<128x128xf32>
    %cst_21 = arith.constant 0.000000e+00 : f32
    %36 = vector.broadcast %cst_21 : f32 to vector<128x128xf32>
    %37 = arith.maximumf %35, %36 : vector<128x128xf32>
    %c0_22 = arith.constant 0 : index
    %c0_23 = arith.constant 0 : index
    %38 = vector.load %arg9[%c0_22, %c0_23] : memref<128x128xf32, #tpu.memory_space<vmem>>, vector<128x128xf32>
    %cst_24 = arith.constant dense<0.000000e+00> : vector<128x128xf32>
    %39 = tpu.matmul %37, %38, %cst_24 {dimension_numbers = #tpu.dot_dimension_numbers<[1], [0], [0], [1], [0, 0, 1, 1], [], []>} : vector<128x128xf32>, vector<128x128xf32>, vector<128x128xf32> -> vector<128x128xf32>
    %c0_25 = arith.constant 0 : index
    %c0_26 = arith.constant 0 : index
    %40 = vector.load %arg10[%c0_25, %c0_26] : memref<1x128xf32, #tpu.memory_space<vmem>>, vector<1x128xf32>
    %41 = vector.broadcast %40 : vector<1x128xf32> to vector<128x128xf32>
    %42 = arith.addf %39, %41 : vector<128x128xf32>
    %cst_27 = arith.constant 0.000000e+00 : f32
    %43 = vector.broadcast %cst_27 : f32 to vector<128x128xf32>
    %44 = arith.maximumf %42, %43 : vector<128x128xf32>
    %45 = vector.shape_cast %44 : vector<128x128xf32> to vector<8x16x128xf32>
    %cst_28 = arith.constant dense<0xFF800000> : vector<8x128xf32>
    %46 = vector.multi_reduction <maximumf>, %45, %cst_28 [1] : vector<8x16x128xf32> to vector<8x128xf32>
    %c0_29 = arith.constant 0 : index
    %c0_30 = arith.constant 0 : index
    %47 = vector.load %arg11[%c0_29, %c0_30] : memref<128x128xf32, #tpu.memory_space<vmem>>, vector<128x128xf32>
    %cst_31 = arith.constant dense<0.000000e+00> : vector<8x128xf32>
    %48 = tpu.matmul %46, %47, %cst_31 {dimension_numbers = #tpu.dot_dimension_numbers<[1], [0], [0], [1], [0, 0, 1, 1], [], []>} : vector<8x128xf32>, vector<128x128xf32>, vector<8x128xf32> -> vector<8x128xf32>
    %c0_32 = arith.constant 0 : index
    %c0_33 = arith.constant 0 : index
    %49 = vector.load %arg12[%c0_32, %c0_33] : memref<1x128xf32, #tpu.memory_space<vmem>>, vector<1x128xf32>
    %50 = vector.broadcast %49 : vector<1x128xf32> to vector<8x128xf32>
    %51 = arith.addf %48, %50 : vector<8x128xf32>
    %cst_34 = arith.constant 0.000000e+00 : f32
    %52 = vector.broadcast %cst_34 : f32 to vector<8x128xf32>
    %53 = arith.maximumf %51, %52 : vector<8x128xf32>
    %c0_35 = arith.constant 0 : index
    %c0_36 = arith.constant 0 : index
    %54 = vector.load %arg13[%c0_35, %c0_36] : memref<128x128xf32, #tpu.memory_space<vmem>>, vector<128x128xf32>
    %cst_37 = arith.constant dense<0.000000e+00> : vector<8x128xf32>
    %55 = tpu.matmul %53, %54, %cst_37 {dimension_numbers = #tpu.dot_dimension_numbers<[1], [0], [0], [1], [0, 0, 1, 1], [], []>} : vector<8x128xf32>, vector<128x128xf32>, vector<8x128xf32> -> vector<8x128xf32>
    %c0_38 = arith.constant 0 : index
    %c0_39 = arith.constant 0 : index
    %56 = vector.load %arg14[%c0_38, %c0_39] : memref<1x128xf32, #tpu.memory_space<vmem>>, vector<1x128xf32>
    %57 = vector.broadcast %56 : vector<1x128xf32> to vector<8x128xf32>
    %58 = arith.addf %55, %57 : vector<8x128xf32>
    %cst_40 = arith.constant 0.000000e+00 : f32
    %59 = vector.broadcast %cst_40 : f32 to vector<8x128xf32>
    %60 = arith.maximumf %58, %59 : vector<8x128xf32>
    %c0_41 = arith.constant 0 : index
    %c0_42 = arith.constant 0 : index
    %61 = vector.load %arg15[%c0_41, %c0_42] : memref<128x128xf32, #tpu.memory_space<vmem>>, vector<128x128xf32>
    %cst_43 = arith.constant dense<0.000000e+00> : vector<8x128xf32>
    %62 = tpu.matmul %60, %61, %cst_43 {dimension_numbers = #tpu.dot_dimension_numbers<[1], [0], [0], [1], [0, 0, 1, 1], [], []>} : vector<8x128xf32>, vector<128x128xf32>, vector<8x128xf32> -> vector<8x128xf32>
    %c0_44 = arith.constant 0 : index
    %c0_45 = arith.constant 0 : index
    %63 = vector.load %arg16[%c0_44, %c0_45] : memref<1x128xf32, #tpu.memory_space<vmem>>, vector<1x128xf32>
    %64 = vector.broadcast %63 : vector<1x128xf32> to vector<8x128xf32>
    %65 = arith.addf %62, %64 : vector<8x128xf32>
    %c0_46 = arith.constant 0 : index
    %c0_47 = arith.constant 0 : index
    %66 = vector.load %arg17[%c0_46, %c0_47] : memref<8x128xf32, #tpu.memory_space<vmem>>, vector<8x128xf32>
    tpu.vector_store %arg17[%c0_46, %c0_47], %65 {strides = array<i32>} : memref<8x128xf32, #tpu.memory_space<vmem>>, vector<8x128xf32>,
    return
  }
  func.func @transform_0(%arg0: i32) -> (i32, i32, i32) {
    %c0_i32 = arith.constant 0 : i32
    %c0_i32_0 = arith.constant 0 : i32
    %c0_i32_1 = arith.constant 0 : i32
    return %arg0, %c0_i32, %c0_i32_0 : i32, i32, i32
  }
  func.func @transform_1(%arg0: i32) -> (i32, i32, i32) {
    %c0_i32 = arith.constant 0 : i32
    %c0_i32_0 = arith.constant 0 : i32
    %c0_i32_1 = arith.constant 0 : i32
    return %arg0, %c0_i32, %c0_i32_0 : i32, i32, i32
  }
  func.func @transform_2(%arg0: i32) -> (i32, i32, i32) {
    %c0_i32 = arith.constant 0 : i32
    %c0_i32_0 = arith.constant 0 : i32
    %c0_i32_1 = arith.constant 0 : i32
    return %arg0, %c0_i32, %c0_i32_0 : i32, i32, i32
  }
  func.func @transform_3(%arg0: i32) -> (i32, i32) {
    %c0_i32 = arith.constant 0 : i32
    %c0_i32_0 = arith.constant 0 : i32
    %c0_i32_1 = arith.constant 0 : i32
    return %c0_i32, %c0_i32_0 : i32, i32
  }
  func.func @transform_4(%arg0: i32) -> (i32, i32) {
    %c0_i32 = arith.constant 0 : i32
    %c0_i32_0 = arith.constant 0 : i32
    %c0_i32_1 = arith.constant 0 : i32
    return %c0_i32, %c0_i32_0 : i32, i32
  }
  func.func @transform_5(%arg0: i32) -> (i32, i32) {
    %c0_i32 = arith.constant 0 : i32
    %c0_i32_0 = arith.constant 0 : i32
    %c0_i32_1 = arith.constant 0 : i32
    return %c0_i32, %c0_i32_0 : i32, i32
  }
  func.func @transform_6(%arg0: i32) -> (i32, i32) {
    %c0_i32 = arith.constant 0 : i32
    %c0_i32_0 = arith.constant 0 : i32
    %c0_i32_1 = arith.constant 0 : i32
    return %c0_i32, %c0_i32_0 : i32, i32
  }
  func.func @transform_7(%arg0: i32) -> (i32, i32) {
    %c0_i32 = arith.constant 0 : i32
    %c0_i32_0 = arith.constant 0 : i32
    %c0_i32_1 = arith.constant 0 : i32
    return %c0_i32, %c0_i32_0 : i32, i32
  }
  func.func @transform_8(%arg0: i32) -> (i32, i32) {
    %c0_i32 = arith.constant 0 : i32
    %c0_i32_0 = arith.constant 0 : i32
    %c0_i32_1 = arith.constant 0 : i32
    return %c0_i32, %c0_i32_0 : i32, i32
  }
  func.func @transform_9(%arg0: i32) -> (i32, i32) {
    %c0_i32 = arith.constant 0 : i32
    %c0_i32_0 = arith.constant 0 : i32
    %c0_i32_1 = arith.constant 0 : i32
    return %c0_i32, %c0_i32_0 : i32, i32
  }
  func.func @transform_10(%arg0: i32) -> (i32, i32) {
    %c0_i32 = arith.constant 0 : i32
    %c0_i32_0 = arith.constant 0 : i32
    %c0_i32_1 = arith.constant 0 : i32
    return %c0_i32, %c0_i32_0 : i32, i32
  }
  func.func @transform_11(%arg0: i32) -> (i32, i32) {
    %c0_i32 = arith.constant 0 : i32
    %c0_i32_0 = arith.constant 0 : i32
    %c0_i32_1 = arith.constant 0 : i32
    return %c0_i32, %c0_i32_0 : i32, i32
  }
  func.func @transform_12(%arg0: i32) -> (i32, i32) {
    %c0_i32 = arith.constant 0 : i32
    %c0_i32_0 = arith.constant 0 : i32
    %c0_i32_1 = arith.constant 0 : i32
    return %c0_i32, %c0_i32_0 : i32, i32
  }
  func.func @transform_13(%arg0: i32) -> (i32, i32) {
    %c0_i32 = arith.constant 0 : i32
    %c0_i32_0 = arith.constant 0 : i32
    %c0_i32_1 = arith.constant 0 : i32
    return %c0_i32, %c0_i32_0 : i32, i32
  }
  func.func @transform_14(%arg0: i32) -> (i32, i32) {
    %c0_i32 = arith.constant 0 : i32
    %c0_i32_0 = arith.constant 0 : i32
    %c0_i32_1 = arith.constant 0 : i32
    return %c0_i32, %c0_i32_0 : i32, i32
  }
  func.func @transform_15(%arg0: i32) -> (i32, i32) {
    %c0_i32 = arith.constant 0 : i32
    %c0_i32_0 = arith.constant 0 : i32
    %c0_i32_1 = arith.constant 0 : i32
    return %c0_i32, %c0_i32_0 : i32, i32
  }
  func.func @transform_16(%arg0: i32) -> (i32, i32) {
    %c0_i32 = arith.constant 0 : i32
    %c0_i32_0 = arith.constant 0 : i32
    return %arg0, %c0_i32 : i32, i32
  }
}

module attributes {stable_mosaic.version = 11 : i64} {
  func.func @_tnet_kernel(%arg0: i32, %arg1: memref<2x4x128xf32, #tpu.memory_space<vmem>>, %arg2: memref<2x16x1xf32, #tpu.memory_space<vmem>>, %arg3: memref<2x16x1xf32, #tpu.memory_space<vmem>>, %arg4: memref<128x128xf32, #tpu.memory_space<vmem>>, %arg5: memref<1x128xf32, #tpu.memory_space<vmem>>, %arg6: memref<1x128xf32, #tpu.memory_space<vmem>>, %arg7: memref<128x128xf32, #tpu.memory_space<vmem>>, %arg8: memref<1x128xf32, #tpu.memory_space<vmem>>, %arg9: memref<128x128xf32, #tpu.memory_space<vmem>>, %arg10: memref<1x128xf32, #tpu.memory_space<vmem>>, %arg11: memref<128x128xf32, #tpu.memory_space<vmem>>, %arg12: memref<1x128xf32, #tpu.memory_space<vmem>>, %arg13: memref<128x128xf32, #tpu.memory_space<vmem>>, %arg14: memref<1x128xf32, #tpu.memory_space<vmem>>, %arg15: memref<128x128xf32, #tpu.memory_space<vmem>>, %arg16: memref<1x128xf32, #tpu.memory_space<vmem>>, %arg17: memref<8x128xf32, #tpu.memory_space<vmem>>) attributes {dimension_semantics = [#tpu.dimension_semantics<parallel>], iteration_bounds = array<i64: 2>, scalar_prefetch = 0 : i64, scratch_operands = 0 : i64, tpu.core_type = #tpu.core_type<tc>, window_params = [{transform_indices = @transform_0, window_bounds = array<i64: 2, 4, 128>}, {transform_indices = @transform_1, window_bounds = array<i64: 2, 16, 1>}, {transform_indices = @transform_2, window_bounds = array<i64: 2, 16, 1>}, {pipeline_mode = #tpu.pipeline_mode<synchronous>, transform_indices = @transform_3, window_bounds = array<i64: 128, 128>}, {pipeline_mode = #tpu.pipeline_mode<synchronous>, transform_indices = @transform_4, window_bounds = array<i64: 1, 128>}, {pipeline_mode = #tpu.pipeline_mode<synchronous>, transform_indices = @transform_5, window_bounds = array<i64: 1, 128>}, {pipeline_mode = #tpu.pipeline_mode<synchronous>, transform_indices = @transform_6, window_bounds = array<i64: 128, 128>}, {pipeline_mode = #tpu.pipeline_mode<synchronous>, transform_indices = @transform_7, window_bounds = array<i64: 1, 128>}, {pipeline_mode = #tpu.pipeline_mode<synchronous>, transform_indices = @transform_8, window_bounds = array<i64: 128, 128>}, {pipeline_mode = #tpu.pipeline_mode<synchronous>, transform_indices = @transform_9, window_bounds = array<i64: 1, 128>}, {pipeline_mode = #tpu.pipeline_mode<synchronous>, transform_indices = @transform_10, window_bounds = array<i64: 128, 128>}, {pipeline_mode = #tpu.pipeline_mode<synchronous>, transform_indices = @transform_11, window_bounds = array<i64: 1, 128>}, {pipeline_mode = #tpu.pipeline_mode<synchronous>, transform_indices = @transform_12, window_bounds = array<i64: 128, 128>}, {pipeline_mode = #tpu.pipeline_mode<synchronous>, transform_indices = @transform_13, window_bounds = array<i64: 1, 128>}, {pipeline_mode = #tpu.pipeline_mode<synchronous>, transform_indices = @transform_14, window_bounds = array<i64: 128, 128>}, {pipeline_mode = #tpu.pipeline_mode<synchronous>, transform_indices = @transform_15, window_bounds = array<i64: 1, 128>}, {transform_indices = @transform_16, window_bounds = array<i64: 8, 128>}]} {
    %c0 = arith.constant 0 : index
    %c0_0 = arith.constant 0 : index
    %c0_1 = arith.constant 0 : index
    %0 = vector.load %arg1[%c0, %c0_0, %c0_1] : memref<2x4x128xf32, #tpu.memory_space<vmem>>, vector<2x4x128xf32>
    %c0_2 = arith.constant 0 : index
    %c0_3 = arith.constant 0 : index
    %c0_4 = arith.constant 0 : index
    %1 = vector.load %arg2[%c0_2, %c0_3, %c0_4] : memref<2x16x1xf32, #tpu.memory_space<vmem>>, vector<2x16x1xf32>
    %c0_5 = arith.constant 0 : index
    %c0_6 = arith.constant 0 : index
    %c0_7 = arith.constant 0 : index
    %2 = vector.load %arg3[%c0_5, %c0_6, %c0_7] : memref<2x16x1xf32, #tpu.memory_space<vmem>>, vector<2x16x1xf32>
    %3 = vector.shape_cast %1 : vector<2x16x1xf32> to vector<2x1x16x1xf32>
    %4 = vector.shape_cast %0 : vector<2x4x128xf32> to vector<2x4x1x128xf32>
    %5 = vector.broadcast %3 : vector<2x1x16x1xf32> to vector<2x4x16x128xf32>
    %6 = vector.broadcast %4 : vector<2x4x1x128xf32> to vector<2x4x16x128xf32>
    %7 = arith.subf %5, %6 : vector<2x4x16x128xf32>
    %8 = math.absf %7 : vector<2x4x16x128xf32>
    %cst = arith.constant 0.000000e+00 : f32
    %9 = vector.broadcast %cst : f32 to vector<2x4x16x128xf32>
    %10 = arith.subf %9, %8 : vector<2x4x16x128xf32>
    %11 = math.exp %10 : vector<2x4x16x128xf32>
    %12 = vector.shape_cast %11 : vector<2x4x16x128xf32> to vector<128x128xf32>
    %c0_8 = arith.constant 0 : index
    %c0_9 = arith.constant 0 : index
    %13 = vector.load %arg4[%c0_8, %c0_9] : memref<128x128xf32, #tpu.memory_space<vmem>>, vector<128x128xf32>
    %cst_10 = arith.constant dense<0.000000e+00> : vector<128x128xf32>
    %14 = tpu.matmul %12, %13, %cst_10 {dimension_numbers = #tpu.dot_dimension_numbers<[1], [0], [0], [1], [0, 0, 1, 1], [], []>} : vector<128x128xf32>, vector<128x128xf32>, vector<128x128xf32> -> vector<128x128xf32>
    %c0_11 = arith.constant 0 : index
    %c0_12 = arith.constant 0 : index
    %15 = vector.load %arg5[%c0_11, %c0_12] : memref<1x128xf32, #tpu.memory_space<vmem>>, vector<1x128xf32>
    %16 = vector.shape_cast %15 : vector<1x128xf32> to vector<1x1x128xf32>
    %17 = vector.broadcast %2 : vector<2x16x1xf32> to vector<2x16x128xf32>
    %18 = vector.broadcast %16 : vector<1x1x128xf32> to vector<2x16x128xf32>
    %19 = arith.mulf %17, %18 : vector<2x16x128xf32>
    %c0_13 = arith.constant 0 : index
    %c0_14 = arith.constant 0 : index
    %20 = vector.load %arg6[%c0_13, %c0_14] : memref<1x128xf32, #tpu.memory_space<vmem>>, vector<1x128xf32>
    %21 = vector.shape_cast %20 : vector<1x128xf32> to vector<1x1x128xf32>
    %22 = vector.broadcast %21 : vector<1x1x128xf32> to vector<2x16x128xf32>
    %23 = arith.addf %19, %22 : vector<2x16x128xf32>
    %24 = vector.shape_cast %14 : vector<128x128xf32> to vector<2x4x16x128xf32>
    %25 = vector.shape_cast %23 : vector<2x16x128xf32> to vector<2x1x16x128xf32>
    %26 = vector.broadcast %25 : vector<2x1x16x128xf32> to vector<2x4x16x128xf32>
    %27 = arith.addf %24, %26 : vector<2x4x16x128xf32>
    %cst_15 = arith.constant 0.000000e+00 : f32
    %28 = vector.broadcast %cst_15 : f32 to vector<2x4x16x128xf32>
    %29 = arith.maximumf %27, %28 : vector<2x4x16x128xf32>
    %30 = vector.shape_cast %29 : vector<2x4x16x128xf32> to vector<128x128xf32>
    %c0_16 = arith.constant 0 : index
    %c0_17 = arith.constant 0 : index
    %31 = vector.load %arg7[%c0_16, %c0_17] : memref<128x128xf32, #tpu.memory_space<vmem>>, vector<128x128xf32>
    %cst_18 = arith.constant dense<0.000000e+00> : vector<128x128xf32>
    %32 = tpu.matmul %30, %31, %cst_18 {dimension_numbers = #tpu.dot_dimension_numbers<[1], [0], [0], [1], [0, 0, 1, 1], [], []>} : vector<128x128xf32>, vector<128x128xf32>, vector<128x128xf32> -> vector<128x128xf32>
    %c0_19 = arith.constant 0 : index
    %c0_20 = arith.constant 0 : index
    %33 = vector.load %arg8[%c0_19, %c0_20] : memref<1x128xf32, #tpu.memory_space<vmem>>, vector<1x128xf32>
    %34 = vector.broadcast %33 : vector<1x128xf32> to vector<128x128xf32>
    %35 = arith.addf %32, %34 : vector<128x128xf32>
    %cst_21 = arith.constant 0.000000e+00 : f32
    %36 = vector.broadcast %cst_21 : f32 to vector<128x128xf32>
    %37 = arith.maximumf %35, %36 : vector<128x128xf32>
    %c0_22 = arith.constant 0 : index
    %c0_23 = arith.constant 0 : index
    %38 = vector.load %arg9[%c0_22, %c0_23] : memref<128x128xf32, #tpu.memory_space<vmem>>, vector<128x128xf32>
    %cst_24 = arith.constant dense<0.000000e+00> : vector<128x128xf32>
    %39 = tpu.matmul %37, %38, %cst_24 {dimension_numbers = #tpu.dot_dimension_numbers<[1], [0], [0], [1], [0, 0, 1, 1], [], []>} : vector<128x128xf32>, vector<128x128xf32>, vector<128x128xf32> -> vector<128x128xf32>
    %c0_25 = arith.constant 0 : index
    %c0_26 = arith.constant 0 : index
    %40 = vector.load %arg10[%c0_25, %c0_26] : memref<1x128xf32, #tpu.memory_space<vmem>>, vector<1x128xf32>
    %41 = vector.broadcast %40 : vector<1x128xf32> to vector<128x128xf32>
    %42 = arith.addf %39, %41 : vector<128x128xf32>
    %cst_27 = arith.constant 0.000000e+00 : f32
    %43 = vector.broadcast %cst_27 : f32 to vector<128x128xf32>
    %44 = arith.maximumf %42, %43 : vector<128x128xf32>
    %45 = vector.shape_cast %44 : vector<128x128xf32> to vector<8x16x128xf32>
    %cst_28 = arith.constant dense<0xFF800000> : vector<8x128xf32>
    %46 = vector.multi_reduction <maximumf>, %45, %cst_28 [1] : vector<8x16x128xf32> to vector<8x128xf32>
    %c0_29 = arith.constant 0 : index
    %c0_30 = arith.constant 0 : index
    %47 = vector.load %arg11[%c0_29, %c0_30] : memref<128x128xf32, #tpu.memory_space<vmem>>, vector<128x128xf32>
    %cst_31 = arith.constant dense<0.000000e+00> : vector<8x128xf32>
    %48 = tpu.matmul %46, %47, %cst_31 {dimension_numbers = #tpu.dot_dimension_numbers<[1], [0], [0], [1], [0, 0, 1, 1], [], []>} : vector<8x128xf32>, vector<128x128xf32>, vector<8x128xf32> -> vector<8x128xf32>
    %c0_32 = arith.constant 0 : index
    %c0_33 = arith.constant 0 : index
    %49 = vector.load %arg12[%c0_32, %c0_33] : memref<1x128xf32, #tpu.memory_space<vmem>>, vector<1x128xf32>
    %50 = vector.broadcast %49 : vector<1x128xf32> to vector<8x128xf32>
    %51 = arith.addf %48, %50 : vector<8x128xf32>
    %cst_34 = arith.constant 0.000000e+00 : f32
    %52 = vector.broadcast %cst_34 : f32 to vector<8x128xf32>
    %53 = arith.maximumf %51, %52 : vector<8x128xf32>
    %c0_35 = arith.constant 0 : index
    %c0_36 = arith.constant 0 : index
    %54 = vector.load %arg13[%c0_35, %c0_36] : memref<128x128xf32, #tpu.memory_space<vmem>>, vector<128x128xf32>
    %cst_37 = arith.constant dense<0.000000e+00> : vector<8x128xf32>
    %55 = tpu.matmul %53, %54, %cst_37 {dimension_numbers = #tpu.dot_dimension_numbers<[1], [0], [0], [1], [0, 0, 1, 1], [], []>} : vector<8x128xf32>, vector<128x128xf32>, vector<8x128xf32> -> vector<8x128xf32>
    %c0_38 = arith.constant 0 : index
    %c0_39 = arith.constant 0 : index
    %56 = vector.load %arg14[%c0_38, %c0_39] : memref<1x128xf32, #tpu.memory_space<vmem>>, vector<1x128xf32>
    %57 = vector.broadcast %56 : vector<1x128xf32> to vector<8x128xf32>
    %58 = arith.addf %55, %57 : vector<8x128xf32>
    %cst_40 = arith.constant 0.000000e+00 : f32
    %59 = vector.broadcast %cst_40 : f32 to vector<8x128xf32>
    %60 = arith.maximumf %58, %59 : vector<8x128xf32>
    %c0_41 = arith.constant 0 : index
    %c0_42 = arith.constant 0 : index
    %61 = vector.load %arg15[%c0_41, %c0_42] : memref<128x128xf32, #tpu.memory_space<vmem>>, vector<128x128xf32>
    %cst_43 = arith.constant dense<0.000000e+00> : vector<8x128xf32>
    %62 = tpu.matmul %60, %61, %cst_43 {dimension_numbers = #tpu.dot_dimension_numbers<[1], [0], [0], [1], [0, 0, 1, 1], [], []>} : vector<8x128xf32>, vector<128x128xf32>, vector<8x128xf32> -> vector<8x128xf32>
    %c0_44 = arith.constant 0 : index
    %c0_45 = arith.constant 0 : index
    %63 = vector.load %arg16[%c0_44, %c0_45] : memref<1x128xf32, #tpu.memory_space<vmem>>, vector<1x128xf32>
    %64 = vector.broadcast %63 : vector<1x128xf32> to vector<8x128xf32>
    %65 = arith.addf %62, %64 : vector<8x128xf32>
    %c0_46 = arith.constant 0 : index
    %c0_47 = arith.constant 0 : index
    %66 = vector.load %arg17[%c0_46, %c0_47] : memref<8x128xf32, #tpu.memory_space<vmem>>, vector<8x128xf32>
    tpu.vector_store %arg17[%c0_46, %c0_47], %65 {strides = array<i32>} : memref<8x128xf32, #tpu.memory_space<vmem>>, vector<8x128xf32>,
    return
  }
  func.func @transform_0(%arg0: i32) -> (i32, i32, i32) {
    %c0_i32 = arith.constant 0 : i32
    %c0_i32_0 = arith.constant 0 : i32
    %c0_i32_1 = arith.constant 0 : i32
    return %arg0, %c0_i32, %c0_i32_0 : i32, i32, i32
  }
  func.func @transform_1(%arg0: i32) -> (i32, i32, i32) {
    %c0_i32 = arith.constant 0 : i32
    %c0_i32_0 = arith.constant 0 : i32
    %c0_i32_1 = arith.constant 0 : i32
    return %arg0, %c0_i32, %c0_i32_0 : i32, i32, i32
  }
  func.func @transform_2(%arg0: i32) -> (i32, i32, i32) {
    %c0_i32 = arith.constant 0 : i32
    %c0_i32_0 = arith.constant 0 : i32
    %c0_i32_1 = arith.constant 0 : i32
    return %arg0, %c0_i32, %c0_i32_0 : i32, i32, i32
  }
  func.func @transform_3(%arg0: i32) -> (i32, i32) {
    %c0_i32 = arith.constant 0 : i32
    %c0_i32_0 = arith.constant 0 : i32
    %c0_i32_1 = arith.constant 0 : i32
    return %c0_i32, %c0_i32_0 : i32, i32
  }
  func.func @transform_4(%arg0: i32) -> (i32, i32) {
    %c0_i32 = arith.constant 0 : i32
    %c0_i32_0 = arith.constant 0 : i32
    %c0_i32_1 = arith.constant 0 : i32
    return %c0_i32, %c0_i32_0 : i32, i32
  }
  func.func @transform_5(%arg0: i32) -> (i32, i32) {
    %c0_i32 = arith.constant 0 : i32
    %c0_i32_0 = arith.constant 0 : i32
    %c0_i32_1 = arith.constant 0 : i32
    return %c0_i32, %c0_i32_0 : i32, i32
  }
  func.func @transform_6(%arg0: i32) -> (i32, i32) {
    %c0_i32 = arith.constant 0 : i32
    %c0_i32_0 = arith.constant 0 : i32
    %c0_i32_1 = arith.constant 0 : i32
    return %c0_i32, %c0_i32_0 : i32, i32
  }
  func.func @transform_7(%arg0: i32) -> (i32, i32) {
    %c0_i32 = arith.constant 0 : i32
    %c0_i32_0 = arith.constant 0 : i32
    %c0_i32_1 = arith.constant 0 : i32
    return %c0_i32, %c0_i32_0 : i32, i32
  }
  func.func @transform_8(%arg0: i32) -> (i32, i32) {
    %c0_i32 = arith.constant 0 : i32
    %c0_i32_0 = arith.constant 0 : i32
    %c0_i32_1 = arith.constant 0 : i32
    return %c0_i32, %c0_i32_0 : i32, i32
  }
  func.func @transform_9(%arg0: i32) -> (i32, i32) {
    %c0_i32 = arith.constant 0 : i32
    %c0_i32_0 = arith.constant 0 : i32
    %c0_i32_1 = arith.constant 0 : i32
    return %c0_i32, %c0_i32_0 : i32, i32
  }
  func.func @transform_10(%arg0: i32) -> (i32, i32) {
    %c0_i32 = arith.constant 0 : i32
    %c0_i32_0 = arith.constant 0 : i32
    %c0_i32_1 = arith.constant 0 : i32
    return %c0_i32, %c0_i32_0 : i32, i32
  }
  func.func @transform_11(%arg0: i32) -> (i32, i32) {
    %c0_i32 = arith.constant 0 : i32
    %c0_i32_0 = arith.constant 0 : i32
    %c0_i32_1 = arith.constant 0 : i32
    return %c0_i32, %c0_i32_0 : i32, i32
  }
  func.func @transform_12(%arg0: i32) -> (i32, i32) {
    %c0_i32 = arith.constant 0 : i32
    %c0_i32_0 = arith.constant 0 : i32
    %c0_i32_1 = arith.constant 0 : i32
    return %c0_i32, %c0_i32_0 : i32, i32
  }
  func.func @transform_13(%arg0: i32) -> (i32, i32) {
    %c0_i32 = arith.constant 0 : i32
    %c0_i32_0 = arith.constant 0 : i32
    %c0_i32_1 = arith.constant 0 : i32
    return %c0_i32, %c0_i32_0 : i32, i32
  }
  func.func @transform_14(%arg0: i32) -> (i32, i32) {
    %c0_i32 = arith.constant 0 : i32
    %c0_i32_0 = arith.constant 0 : i32
    %c0_i32_1 = arith.constant 0 : i32
    return %c0_i32, %c0_i32_0 : i32, i32
  }
  func.func @transform_15(%arg0: i32) -> (i32, i32) {
    %c0_i32 = arith.constant 0 : i32
    %c0_i32_0 = arith.constant 0 : i32
    %c0_i32_1 = arith.constant 0 : i32
    return %c0_i32, %c0_i32_0 : i32, i32
  }
  func.func @transform_16(%arg0: i32) -> (i32, i32) {
    %c0_i32 = arith.constant 0 : i32
    %c0_i32_0 = arith.constant 0 : i32
    return %arg0, %c0_i32 : i32, i32
  }
}

</mosaic_0001>

<bundles_post_ra>
// kernel: tpu_custom_call.1
= control target key start
LH: loop header
LB: loop body
LE: loop exit
PB: predicated region body
PF: predicated region fallthrough
CT: control target
= control target key end

     0   :  { %s3314_s0 = inlined_call_operand.hbm [shape: f32[4,4,128], index: 0, kind: input, shape index: {}]   ;;  %s3315_s1 = inlined_call_operand.vmem [shape: f32[4,16,1], index: 1, kind: input, shape index: {}]   ;;  %s3316_s2 = inlined_call_operand.vmem [shape: f32[4,16,1], index: 2, kind: input, shape index: {}]   ;;  %s3317_s3 = inlined_call_operand.vmem [shape: f32[128,128], index: 3, kind: input, shape index: {}]   ;;  %s3318_s4 = inlined_call_operand.vmem [shape: f32[1,128], index: 4, kind: input, shape index: {}]   ;;  %s3319_s5 = inlined_call_operand.vmem [shape: f32[1,128], index: 5, kind: input, shape index: {}]   ;;  %s3320_s6 = inlined_call_operand.hbm [shape: f32[128,128], index: 6, kind: input, shape index: {}]   ;;  %s3321_s7 = inlined_call_operand.vmem [shape: f32[1,128], index: 7, kind: input, shape index: {}]   ;;  %s3322_s8 = inlined_call_operand.hbm [shape: f32[128,128], index: 8, kind: input, shape index: {}]   ;;  %s3323_s9 = inlined_call_operand.vmem [shape: f32[1,128], index: 9, kind: input, shape index: {}]   ;;  %s3324_s10 = inlined_call_operand.hbm [shape: f32[128,128], index: 10, kind: input, shape index: {}]   ;;  %s3325_s11 = inlined_call_operand.vmem [shape: f32[1,128], index: 11, kind: input, shape index: {}]   ;;  %s3326_s12 = inlined_call_operand.hbm [shape: f32[128,128], index: 12, kind: input, shape index: {}]   ;;  %s3327_s13 = inlined_call_operand.vmem [shape: f32[1,128], index: 13, kind: input, shape index: {}]   ;;  %s3328_s14 = inlined_call_operand.hbm [shape: f32[128,128], index: 14, kind: input, shape index: {}]   ;;  %s3329_s15 = inlined_call_operand.vmem [shape: f32[1,128], index: 15, kind: input, shape index: {}]   ;;  %s3330_s16 = inlined_call_operand.hbm [shape: f32[16,128], index: 16, kind: output, shape index: {}]  }
   0x1   :  { %3340 = sst [smem:[#allocation22_spill]] %s3314_s0 }
   0x2   :  { %3341 = sst [smem:[#allocation23_spill]] %s3320_s6 }
   0x3   :  { %3342 = sst [smem:[#allocation24_spill]] %s3322_s8 }
   0x4   :  { %3343 = sst [smem:[#allocation25_spill]] %s3324_s10 }
   0x5   :  { %3344 = sst [smem:[#allocation26_spill]] %s3326_s12 }
   0x6   :  { %3345 = sst [smem:[#allocation27_spill]] %s3328_s14 }
   0x7   :  { %3346 = sst [smem:[#allocation28_spill]] %s3329_s15 }
   0x8   :  { %3347 = sst [smem:[#allocation29_spill]] %s3330_s16 }
   0x9   :  { %21 = vsyncpa [#allocation3], 0 }
   0xa   :  { %23 = vsyncpa [#allocation3 + $0x1], 0 }
   0xb   :  { %24 = vsyncpa [#allocation6], 0 }
   0xc   :  { %25 = vsyncpa [#allocation9], 0 }
   0xd   :  { %26 = vsyncpa [#allocation12], 0 }
   0xe   :  { %27 = vsyncpa [#allocation4], 0 }
   0xf   :  { %29 = vsyncpa [#allocation4 + $0x1], 0  ;;  %s2920_s21 = smov 0   ;;  %s2922_s22 = smov 0  }
  0x10   :  { %s2924_s23 = smov 0   ;;  %s2926_s24 = smov 0  }
  0x11 LB: > { %3348 = sst [smem:[#allocation19_spill]] %s2814_s23  ;;  %s2820_s25 = smov [#allocation5]   ;;  %s2818_s24 = sphi %s2926_s24, %s3377_s24   ;;  %s2814_s23 = sphi %s2924_s23, %s3379_s23   ;;  %s2810_s22 = sphi %s2922_s22, %s3381_s22   ;;  %s2806_s21 = sphi %s2920_s21, %s3380_s21  }
  0x12   : > { %s438_s26 = sshll.u32 %s2820_s25, 4  ;;  %s2941_s27 = sadd.s32 4294967295, %s2818_s24   ;;  %s439_s26 = int_to_ptr.vmem [resolvable:$true] %s438_s26 }
  0x13   : > { %p1985_p0 = scmp.ge.s32.totalorder %s2818_s24, 1  ;;  %p3333_p1 = scmp.eq.s32.totalorder %s2941_s27, 0 }
  0x14   : > { %p417_p2 = scmp.lt.s32.totalorder %s2818_s24, 3  ;;  %s2821_s29 = smov [#allocation8]  }
  0x15   : > { %s470_s30 = sshll.u32 %s2821_s29, 4  ;;  %s2822_s17 = smov [#allocation7]   ;;  %s2959_s30 = int_to_ptr.vmem [resolvable:$true] %s470_s30 }
  0x16   : > { %p2946_p3 = pnand %p1985_p0, %p417_p2  ;;  %s454_s18 = sshll.u32 %s2822_s17, 4  ;;  %s2961_s18 = int_to_ptr.vmem [resolvable:$true] %s454_s18 }
  0x17   : > { %s2595_s20 = scalar_lea.vmem %s439_s26, 2048  ;;  %p2603_p11 = scmp.lt.s32.totalorder %s439_s26, %s439_s26 }
  0x18   : > { %s3349_s28 = scalar_select %p2946_p3, 1, 0 }
  0x19   : > { %p2469_p5 = pneg %p2946_p3  ;;  %p2596_p8 = scmp.ne.s32.totalorder %s439_s26, %s2595_s20 }
  0x1a   : > { %p2604_p12 = scmp.lt.s32.totalorder %s2595_s20, %s2595_s20 }
  0x1b   : > { %p2955_p6 = pnand %p2469_p5, %p3333_p1 }
  0x1c   : > { %p2605_p13 = por %p2604_p12, %p2603_p11 }
  0x1d   : > { %p2965_p7 = pneg %p2955_p6 }
  0x1f   : > { %p2598_p9 = pnand %p2596_p8, %p2965_p7 }
  0x21   : > { %p2599_p10 = pneg %p2598_p9 }
  0x23   : > { %p2606_p0 = pnand %p2605_p13, %p2599_p10 }
  0x25   : > { %2609 = shalt.err (!%p2606_p0)
}
  0x26   : > { %s2823_s25 = smov 128   ;;  %s2824_s29 = smov 8  }
  0x27   : > { %s3352_s6 = sld [smem:[#allocation23_spill]]  ;;  %s2621_s15 = scalar_lea.vmem %s2959_s30, 2048 }
  0x28   : > { %p2622_p2 = scmp.ne.s32.totalorder %s2959_s30, %s2621_s15  ;;  %p2629_p9 = scmp.lt.s32.totalorder %s2959_s30, %s2959_s30 }
  0x29   : > { %p2630_p10 = scmp.lt.s32.totalorder %s2621_s15, %s2621_s15 }
  0x2a   : > { %p2624_p5 = pnand %p2622_p2, %p2965_p7 }
  0x2b   : > { %p2631_p11 = por %p2630_p10, %p2629_p9 }
  0x2c   : > { %p2625_p8 = pneg %p2624_p5 }
  0x2d   : > { %2472 = dma.hbm_to_vmem [thread:$0]  (!%p2955_p6), %s3352_s6, 2048, %s439_s26, [#allocation6], %s2823_s25, %s2823_s25, %s2824_s29  }
  0x2e   : > { %p2632_p12 = pnand %p2631_p11, %p2625_p8 }
  0x30   : > { %2635 = shalt.err (!%p2632_p12)
}
  0x31   : > { %s3353_s10 = sld [smem:[#allocation25_spill]]  ;;  %s2647_s26 = scalar_lea.vmem %s2961_s18, 2048 }
  0x32   : > { %p2648_p13 = scmp.ne.s32.totalorder %s2961_s18, %s2647_s26  ;;  %p2655_p5 = scmp.lt.s32.totalorder %s2961_s18, %s2961_s18 }
  0x33   : > { %p2656_p8 = scmp.lt.s32.totalorder %s2647_s26, %s2647_s26 }
  0x34   : > { %p2650_p0 = pnand %p2648_p13, %p2965_p7 }
  0x35   : > { %p2657_p9 = por %p2656_p8, %p2655_p5 }
  0x36   : > { %p2651_p2 = pneg %p2650_p0 }
  0x37   : > { %2478 = dma.hbm_to_vmem [thread:$0]  (!%p2955_p6), %s3353_s10, 2048, %s2959_s30, [#allocation9], %s2823_s25, %s2823_s25, %s2824_s29  }
  0x38   : > { %p2658_p10 = pnand %p2657_p9, %p2651_p2 }
  0x3a   : > { %2661 = shalt.err (!%p2658_p10)
}
  0x3b   : > { %s3354_s8 = sld [smem:[#allocation24_spill]]  ;;  %s2825_s30 = smov [#allocation10]  }
  0x3c   : > { %s486_s20 = sshll.u32 %s2825_s30, 4  ;;  %s2826_s16 = smov [#allocation11]   ;;  %s487_s20 = int_to_ptr.vmem [resolvable:$true] %s486_s20 }
  0x3d   : > { %s502_s6 = sshll.u32 %s2826_s16, 4  ;;  %s2673_s26 = scalar_lea.vmem %s487_s20, 2048  ;;  %s503_s6 = int_to_ptr.vmem [resolvable:$true] %s502_s6 }
  0x3e   : > { %p2674_p11 = scmp.ne.s32.totalorder %s487_s20, %s2673_s26  ;;  %p2681_p0 = scmp.lt.s32.totalorder %s487_s20, %s487_s20 }
  0x3f   : > { %p2682_p2 = scmp.lt.s32.totalorder %s2673_s26, %s2673_s26 }
  0x40   : > { %p2676_p12 = pnand %p2674_p11, %p2965_p7 }
  0x41   : > { %2475 = dma.hbm_to_vmem [thread:$0]  (!%p2955_p6), %s3354_s8, 2048, %s2961_s18, [#allocation6], %s2823_s25, %s2823_s25, %s2824_s29  }
  0x42   : > { %p2677_p13 = pneg %p2676_p12  ;;  %p2683_p5 = por %p2682_p2, %p2681_p0 }
  0x44   : > { %p2684_p8 = pnand %p2683_p5, %p2677_p13 }
  0x46   : > { %2687 = shalt.err (!%p2684_p8)
}
  0x47   : > { %s3355_s12 = sld [smem:[#allocation26_spill]]  ;;  %s2699_s17 = scalar_lea.vmem %s503_s6, 2048 }
  0x48   : > { %p2700_p9 = scmp.ne.s32.totalorder %s503_s6, %s2699_s17  ;;  %p2707_p12 = scmp.lt.s32.totalorder %s503_s6, %s503_s6 }
  0x49   : > { %p2708_p0 = scmp.lt.s32.totalorder %s2699_s17, %s2699_s17 }
  0x4a   : > { %p2702_p10 = pnand %p2700_p9, %p2965_p7 }
  0x4b   : > { %p2709_p13 = por %p2708_p0, %p2707_p12 }
  0x4c   : > { %p2703_p11 = pneg %p2702_p10 }
  0x4d   : > { %2481 = dma.hbm_to_vmem [thread:$0]  (!%p2955_p6), %s3355_s12, 2048, %s487_s20, [#allocation9], %s2823_s25, %s2823_s25, %s2824_s29  }
  0x4e   : > { %p2710_p2 = pnand %p2709_p13, %p2703_p11 }
  0x50   : > { %2713 = shalt.err (!%p2710_p2)
}
  0x51   : > { %s3356_s14 = sld [smem:[#allocation27_spill]]  ;;  %s1984_s0 = sadd.s32 4294967294, %s2818_s24  }
  0x52   : > { %s3031_s19 = sadd.s32 1, %s2818_s24   ;;  %s42_s20 = sadd.s32 1, %s2814_s23 }
  0x53   : > { %3357 = sst [smem:[#allocation20_spill]] %s3031_s19  ;;  %s39_s26 = ssub.s32 %s2818_s24, %s3031_s19 }
  0x54   : > { %p49_p7 = scmp.ne.s32.totalorder %s2814_s23, %s2810_s22  ;;  %p40_p5 = scmp.eq.s32.totalorder %s39_s26, 0 }
  0x55   : > { %p50_p8 = scmp.eq.s32.totalorder %s2818_s24, 0  ;;  %p55_p9 = scmp.ne.s32.totalorder %s2810_s22, %s2806_s21 }
  0x56   : > { %p404_p10 = scmp.eq.s32.totalorder %s2941_s27, 1  ;;  %p410_p0 = scmp.eq.s32.totalorder %s1984_s0, 1 }
  0x57   : > { %2484 = dma.hbm_to_vmem [thread:$0]  (!%p2955_p6), %s3356_s14, 2048, %s503_s6, [#allocation12], %s2823_s25, %s2823_s25, %s2824_s29  }
  0x58   : > { %s3043_s18 = scalar_select %p40_p5, %s2814_s23, %s42_s20  }
  0x59   : > { %p51_p11 = por %p50_p8, %p49_p7  ;;  %p3047_p12 = por %p3333_p1, %p55_p9 }
  0x5a   : > { %3358 = sst [smem:[#allocation21_spill]] %s3043_s18  ;;  %p3051_p6 = por %p404_p10, %p49_p7 }
  0x5b   : > { %s3359_s15 = scalar_select %p3047_p12, 1, 0 }
  0x5c   : > { %s3360_s6 = scalar_select %p3051_p6, 1, 0 }
  0x5d   : > { %p2498_p13 = scmp.lt.s32.totalorder %s2818_s24, 2  ;;  %s519_s25 = sand.u32 1, %s2814_s23  }
  0x5e   : > { %p3057_p2 = por %p410_p0, %p55_p9  ;;  %s1992_s17 = sshll.u32 %s519_s25, 3 }
  0x5f   : > { %s2022_s30 = sshll.u32 %s2818_s24, 7  ;;  %s3362_s26 = sld [smem:[#allocation22_spill]] }
  0x60   : > { %s3361_s29 = scalar_select %p3057_p2, 1, 0 }
  0x61   : > { %s523_s10 = scalar_lea.vmem [#allocation2], %s1992_s17  ;;  %p3067_p7 = pnand %p2498_p13, %p51_p11 }
  0x62   : > { %s530_s12 = sshll.u32 %s523_s10, 4  ;;  %s3073_s14 = scalar_lea.sflag [#allocation3], %s519_s25  ;;  %s3071_s12 = int_to_ptr.vmem [resolvable:$true] %s530_s12 }
  0x63   : > { %p2716_p8 = pneg %p3067_p7 }
  0x65   : > { %s3065_s8 = scalar_lea.hbm %s3362_s26, %s2022_s30  ;;  %s2719_s17 = scalar_lea.hbm %s3362_s26, 256 }
  0x66   : > { %s2714_s18 = scalar_lea.hbm %s3065_s8, 128  ;;  %p2720_p11 = scmp.lt.s32.totalorder %s3065_s8, %s3362_s26 }
  0x67   : > { %p2715_p5 = scmp.ne.s32.totalorder %s3065_s8, %s2714_s18  ;;  %p2721_p0 = scmp.lt.s32.totalorder %s2719_s17, %s2714_s18 }
  0x69   : > { %p2717_p9 = pnand %p2716_p8, %p2715_p5  ;;  %p2722_p13 = por %p2721_p0, %p2720_p11 }
  0x6b   : > { %p2718_p10 = pneg %p2717_p9 }
  0x6d   : > { %p2723_p4 = pnand %p2722_p13, %p2718_p10 }
  0x6f   : > { %2726 = shalt.err (!%p2723_p4)
}
  0x70   : > { %s2727_s25 = scalar_lea.vmem %s3071_s12, 128  ;;  %s2827_s23 = smov [#allocation2]  }
  0x71   : > { %p2728_p1 = scmp.ne.s32.totalorder %s3071_s12, %s2727_s25  ;;  %s2732_s19 = sshll.u32 %s2827_s23, 4  ;;  %s2733_s19 = int_to_ptr.vmem [resolvable:$false] %s2732_s19 }
  0x72   : > { %s2734_s30 = scalar_lea.vmem %s2733_s19, 256  ;;  %p2735_p9 = scmp.lt.s32.totalorder %s3071_s12, %s2733_s19 }
  0x73   : > { %p2730_p2 = pnand %p2728_p1, %p2716_p8  ;;  %p2736_p6 = scmp.lt.s32.totalorder %s2734_s30, %s2727_s25 }
  0x75   : > { %p2731_p5 = pneg %p2730_p2  ;;  %p2737_p12 = por %p2736_p6, %p2735_p9 }
  0x77   : > { %p2738_p3 = pnand %p2737_p12, %p2731_p5 }
  0x79   : > { %2741 = shalt.err (!%p2738_p3)
}
  0x7a   : > { %s2828_s18 = smov 64   ;;  %s2829_s16 = smov 4  }
  0x7b   : > { %2488 = dma.hbm_to_vmem [thread:$0]  (!%p3067_p7), %s3065_s8, 128, %s3071_s12, %s3073_s14, %s2828_s18, %s2828_s18, %s2829_s16  }
  0x7c   : > { %p3364_p1 = scmp.ne.s32.totalorder %s3349_s28, 0 }
  0x7d   : > { %s3097_s23 = sand.u32 (!%p3364_p1), 1, %s2810_s22   ;;  %p3365_p3 = scmp.ne.s32.totalorder (!%p3364_p1), %s3359_s15, 0 }
  0x7e   : > { %562 = sbr.rel (%p3364_p1) target bundleno = 1545 (0x609), region = 84  ;;  %s1996_s19 = sshll.u32 (!%p3364_p1), %s3097_s23, 3 }
  0x7f   : > { %s565_s17 = scalar_lea.sflag (!%p3364_p1), [#allocation3], %s3097_s23  ;;  %s3103_s10 = scalar_lea.vmem (!%p3364_p1), [#allocation2], %s1996_s19 }
  0x83   : > { %2785 = dma.done.wait (%p3365_p3), %s565_s17, 128  }
  0x84   : > { %2787 = vsyncadd (%p3365_p3), %s565_s17, 4294967168  ;;  %p3366_p4 = scmp.eq.s32.totalorder %s2941_s27, 0 }
  0x86   : > { %2789 = dma.done.wait (%p3366_p4), [#allocation6], 4096   ;;  %p3367_p12 = pmov %p3366_p4 }
  0x87   : > { %p3368_p6 = pmov %p3366_p4 }
  0x88   : > { %2791 = vsyncadd (%p3367_p12), [#allocation6], 4294963200 }
  0x89   : > { %2793 = dma.done.wait (%p3368_p6), [#allocation9], 4096   ;;  %p3369_p2 = pmov %p3366_p4 }
  0x8b   : > { %2795 = vsyncadd (%p3369_p2), [#allocation9], 4294963200  ;;  %p3370_p7 = pmov %p3369_p2 }
  0x8c   : > { %p3371_p8 = pmov %p3369_p2 }
  0x8d   : > { %2797 = dma.done.wait (%p3370_p7), [#allocation12], 2048  }
  0x8e   : > { %2799 = vsyncadd (%p3371_p8), [#allocation12], 4294965248  ;;  %s2003_s8 = sshll.u32 %s2941_s27, 1  ;;  %v2830_v0 = vmov 0   ;;  %v879_v5 = vld [vmem:[%s3317_s3 + $0x78] sm:$0xff]  ;;  %v878_v6 = vld [vmem:[%s3317_s3 + $0x70] sm:$0xff]  ;;  %v687_v39 = vlaneseq }
  0x8f   : > { %2550 = vset.pattern.permute.xlu0 %v2830_v0  ;;  %p651_p10 = scmp.lt.s32.totalorder %s2003_s8, 3  ;;  %2551 = vset.pattern.permute.xlu1 %v2830_v0  ;;  %v877_v7 = vld [vmem:[%s3317_s3 + $0x68] sm:$0xff]  ;;  %v876_v10 = vld [vmem:[%s3317_s3 + $0x60] sm:$0xff]  ;;  %v875_v13 = vld [vmem:[%s3317_s3 + $0x58] sm:$0xff]  ;;  %v2831_v37 = vmov 1966171168  }
  0x90   : > { %2172 = vmatprep.subr.mxu0 %v879_v5  ;;  %v874_v14 = vld [vmem:[%s3317_s3 + $0x50] sm:$0xff]  ;;  %v873_v15 = vld [vmem:[%s3317_s3 + $0x48] sm:$0xff]  ;;  %v872_v16 = vld [vmem:[%s3317_s3 + $0x40] sm:$0xff]  ;;  %v685_v38 = vunpack.c.l.s4 %v2831_v37  ;;  %v688_v41 = vshrl.u32 %v687_v39, 7  ;;  %vm2833_vm0 = vmmov 0   ;;  %vm1554_vm1 = vcmask 1041409  }
  0x91   : > { %s3383_s8 = smov (!%p651_p10, %s2003_s8), 3  ;;  %2173 = vmatpush3.msra.mxu0 %v879_v5  ;;  %v871_v17 = vld [vmem:[%s3317_s3 + $0x38] sm:$0xff]  ;;  %v870_v18 = vld [vmem:[%s3317_s3 + $0x30] sm:$0xff]  ;;  %v869_v19 = vld [vmem:[%s3317_s3 + $0x28] sm:$0xff]  ;;  %vm1556_vm2 = vcmask 1042434   ;;  %vm1558_vm3 = vcmask 1043459  }
  0x92   : > { %s2023_s12 = sshll.u32 %s3383_s8, 4  ;;  %2174 = vmatprep.subr.mxu0 %v878_v6  ;;  %v868_v20 = vld [vmem:[%s3317_s3 + $0x20] sm:$0xff]  ;;  %v867_v21 = vld [vmem:[%s3317_s3 + $0x18] sm:$0xff]  ;;  %v866_v22 = vld [vmem:[%s3317_s3 + $0x10] sm:$0xff]  ;;  %v686_v40 = vunpack.c.0.s8 %v685_v38  ;;  %v746_v46 = vsub.s32 0, %v688_v41  ;;  %vm1560_vm4 = vcmask 1044484  }
  0x93   : > { %s655_s15 = scalar_lea.vmem %s3315_s1, %s2023_s12  ;;  %s662_s18 = scalar_lea.vmem %s3316_s2, %s2023_s12  ;;  %2175 = vmatpush3.msra.mxu0 %v878_v6  ;;  %v865_v23 = vld [vmem:[%s3317_s3 + $0x8] sm:$0xff]  ;;  %v864_v24 = vld [vmem:[%s3317_s3] sm:$0xff]  ;;  %v1112_v27 = vld [vmem:[#allocation5 + $0x68] sm:$0xff]  ;;  %vm1562_vm5 = vcmask 1045509   ;;  %vm1564_vm6 = vcmask 1046534   ;;  %vm1566_vm7 = vcmask 1047559  }
  0x94   : > { %v666_v1 = vld [vmem:[%s655_s15] sm:$0xff]  ;;  %v668_v2 = vld [vmem:[%s655_s15 + $0x10] sm:$0xff]  ;;  %v667_v3 = vld [vmem:[%s655_s15 + $0x8] sm:$0xff]  ;;  %2176 = vmatprep.subr.mxu0 %v877_v7  ;;  %v689_v43 = vsub.s32 %v686_v40, %v688_v41  ;;  %s3372_s12 = sld [smem:[#allocation28_spill]]  ;;  %s2019_s0 = sshll.u32 %s2941_s27, 7 }
  0x95   : > { %726 = vperm.xlu0 %2550, %v666_v1   ;;  %736 = vperm.xlu1 %2551, %v668_v2   ;;  %v669_v4 = vld [vmem:[%s655_s15 + $0x18] sm:$0xff]  ;;  %v670_v8 = vld [vmem:[%s662_s18] sm:$0xff]  ;;  %v671_v9 = vld [vmem:[%s662_s18 + $0x8] sm:$0xff]  ;;  %s648_s20 = scalar_lea.vmem [#allocation13], %s1996_s19  ;;  %s1829_s8 = scalar_lea.sflag [#allocation4], %s3097_s23 }
  0x96   : > { %v672_v11 = vld [vmem:[%s662_s18 + $0x10] sm:$0xff]  ;;  %v673_v12 = vld [vmem:[%s662_s18 + $0x18] sm:$0xff]  ;;  %2177 = vmatpush3.msra.mxu0 %v877_v7  ;;  %v1114_v25 = vld [vmem:[#allocation5 + $0x78] sm:$0xff]  ;;  %s1842_s25 = sshll.u32 %s648_s20, 4  ;;  %s3373_s18 = sld [smem:[#allocation29_spill]]  ;;  %s1843_s25 = int_to_ptr.vmem [resolvable:$true] %s1842_s25 }
  0x97   : > { %2178 = vmatprep.subr.mxu0 %v876_v10  ;;  %v1113_v26 = vld [vmem:[#allocation5 + $0x70] sm:$0xff]  ;;  %2228 = vmatprep.subr.mxu1 %v1114_v25  ;;  %v1111_v28 = vld [vmem:[#allocation5 + $0x60] sm:$0xff]  ;;  %v1110_v29 = vld [vmem:[#allocation5 + $0x58] sm:$0xff]  ;;  %s2742_s14 = scalar_lea.vmem %s1843_s25, 128  ;;  %p3374_p0 = scmp.ne.s32.totalorder %s3360_s6, 0 }
  0x98   : > { %2179 = vmatpush3.msra.mxu0 %v876_v10  ;;  %2229 = vmatpush3.msra.mxu1 %v1114_v25  ;;  %v1109_v30 = vld [vmem:[#allocation5 + $0x50] sm:$0xff]  ;;  %v1108_v31 = vld [vmem:[#allocation5 + $0x48] sm:$0xff]  ;;  %v1107_v32 = vld [vmem:[#allocation5 + $0x40] sm:$0xff]  ;;  %p2743_p11 = scmp.ne.s32.totalorder %s1843_s25, %s2742_s14  ;;  %s2834_s27 = smov [#allocation13]  }
  0x99   : > { %731 = vperm.xlu0 %2550, %v667_v3   ;;  %741 = vperm.xlu1 %2551, %v669_v4   ;;  %v1106_v33 = vld [vmem:[#allocation5 + $0x38] sm:$0xff]  ;;  %v1105_v34 = vld [vmem:[#allocation5 + $0x30] sm:$0xff]  ;;  %v1104_v35 = vld [vmem:[#allocation5 + $0x28] sm:$0xff]  ;;  %s2746_s28 = sshll.u32 %s2834_s27, 4  ;;  %s2747_s28 = int_to_ptr.vmem [resolvable:$false] %s2746_s28 }
  0x9a   : > { %2180 = vmatprep.subr.mxu0 %v875_v13  ;;  %2230 = vmatprep.subr.mxu1 %v1113_v26  ;;  %v1103_v36 = vld [vmem:[#allocation5 + $0x20] sm:$0xff]  ;;  %v2009_v42 = vld.sshfl [vmem:[%s3103_s10] sm:$0x33 pattern:$0x75316420]  ;;  %p2744_p13 = pnand %p2743_p11, %p3374_p0  ;;  %s2748_s19 = scalar_lea.vmem %s2747_s28, 256 }
  0x9b   : > { %2181 = vmatpush3.msra.mxu0 %v875_v13  ;;  %2231 = vmatpush3.msra.mxu1 %v1113_v26  ;;  %v683_v45 = vcombine.high %v2009_v42, %v2009_v42  ;;  %v690_v47 = vrot.slane %v2009_v42, %v689_v43  ;;  %v2010_v59 = vld.sshfl [vmem:[%s3103_s10 + $0x4] sm:$0x33 pattern:$0x75316420]  ;;  %p2749_p9 = scmp.lt.s32.totalorder %s1843_s25, %s2747_s28  ;;  %p2750_p1 = scmp.lt.s32.totalorder %s2748_s19, %s2742_s14 }
  0x9c   : > { %2182 = vmatprep.subr.mxu0 %v874_v14  ;;  %2232 = vmatprep.subr.mxu1 %v1112_v27  ;;  %v714_v63 = vrot.slane %v2010_v59, %v689_v43  ;;  %v707_v2 = vcombine.high %v2010_v59, %v2010_v59  ;;  %s3277_s17 = scalar_lea.hbm %s3373_s18, %s2019_s0  ;;  %p2745_p5 = pneg %p2744_p13 }
  0x9d   : > { %1028 = vperm.xlu0 %2550, %v670_v8   ;;  %1033 = vperm.xlu1 %2551, %v671_v9   ;;  %v697_v48 = vrot.slane %v683_v45, %v689_v43  ;;  %v747_v50 = vrot.slane %v690_v47, %v746_v46  ;;  %v698_v51 = vcombine.high %v690_v47, %v690_v47  ;;  %p2751_p3 = por %p2750_p1, %p2749_p9 }
  0x9e   : > { %2183 = vmatpush3.msra.mxu0 %v874_v14  ;;  %2233 = vmatpush3.msra.mxu1 %v1112_v27  ;;  %v763_v3 = vrot.slane %v714_v63, %v746_v46  ;;  %v722_v13 = vcombine.high %v714_v63, %v714_v63 }
  0x9f   : > { %2184 = vmatprep.subr.mxu0 %v873_v15  ;;  %2234 = vmatprep.subr.mxu1 %v1111_v28  ;;  %v751_v52 = vrot.slane %v697_v48, %v746_v46  ;;  %v699_v54 = vcombine.high %v697_v48, %v697_v48  ;;  %v755_v55 = vrot.slane %v698_v51, %v746_v46  ;;  %p2752_p4 = pnand %p2751_p3, %p2745_p5 }
  0xa0   : > { %2185 = vmatpush3.msra.mxu0 %v873_v15  ;;  %2235 = vmatpush3.msra.mxu1 %v1111_v28  ;;  %v771_v25 = vrot.slane %v722_v13, %v746_v46 }
  0xa1   : > { %1038 = vperm.xlu0 %2550, %v672_v11   ;;  %1043 = vperm.xlu1 %2551, %v673_v12   ;;  %v759_v58 = vrot.slane %v699_v54, %v746_v46  ;;  %v721_v12 = vrot.slane %v707_v2, %v689_v43 }
  0xa2   : > { %2186 = vmatprep.subr.mxu0 %v872_v16  ;;  %2236 = vmatprep.subr.mxu1 %v1110_v29 }
  0xa3   : > { %2187 = vmatpush3.msra.mxu0 %v872_v16  ;;  %2237 = vmatpush3.msra.mxu1 %v1110_v29 }
  0xa4   : > { %2188 = vmatprep.subr.mxu0 %v871_v17  ;;  %2238 = vmatprep.subr.mxu1 %v1109_v30 }
  0xa5   : > { %2189 = vmatpush3.msra.mxu0 %v871_v17  ;;  %2239 = vmatpush3.msra.mxu1 %v1109_v30 }
  0xa6   : > { %2190 = vmatprep.subr.mxu0 %v870_v18  ;;  %2240 = vmatprep.subr.mxu1 %v1108_v31 }
  0xa7   : > { %2191 = vmatpush3.msra.mxu0 %v870_v18  ;;  %2241 = vmatpush3.msra.mxu1 %v1108_v31 }
  0xa8   : > { %2192 = vmatprep.subr.mxu0 %v869_v19  ;;  %2242 = vmatprep.subr.mxu1 %v1107_v32 }
  0xa9   : > { %2193 = vmatpush3.msra.mxu0 %v869_v19  ;;  %2243 = vmatpush3.msra.mxu1 %v1107_v32 }
  0xaa   : > { %2194 = vmatprep.subr.mxu0 %v868_v20  ;;  %2244 = vmatprep.subr.mxu1 %v1106_v33 }
  0xab   : > { %2195 = vmatpush3.msra.mxu0 %v868_v20  ;;  %2245 = vmatpush3.msra.mxu1 %v1106_v33 }
  0xac   : > { %2196 = vmatprep.subr.mxu0 %v867_v21  ;;  %2246 = vmatprep.subr.mxu1 %v1105_v34 }
  0xad   : > { %2197 = vmatpush3.msra.mxu0 %v867_v21  ;;  %2247 = vmatpush3.msra.mxu1 %v1105_v34 }
  0xae   : > { %2198 = vmatprep.subr.mxu0 %v866_v22  ;;  %2248 = vmatprep.subr.mxu1 %v1104_v35 }
  0xaf   : > { %2199 = vmatpush3.msra.mxu0 %v866_v22  ;;  %2249 = vmatpush3.msra.mxu1 %v1104_v35  ;;  %v767_v22 = vrot.slane %v721_v12, %v746_v46 }
  0xb0   : > { %2200 = vmatprep.subr.mxu0 %v865_v23  ;;  %2250 = vmatprep.subr.mxu1 %v1103_v36 }
  0xb1   : > { %2201 = vmatpush3.msra.mxu0 %v865_v23  ;;  %2251 = vmatpush3.msra.mxu1 %v1103_v36 }
  0xb2   : > { %2202 = vmatprep.subr.mxu0 %v864_v24 }
  0xb3   : > { %2203 = vmatpush3.msra.mxu0 %v864_v24  ;;  %v723_v24 = vcombine.high %v721_v12, %v721_v12 }
  0xb5   : > { %v775_v35 = vrot.slane %v723_v24, %v746_v46  ;;  %v1298_v24 = vld [vmem:[#allocation7 + $0x78] sm:$0xff] }
  0xb6   : > { %2284 = vmatprep.subr.mxu0 %v1298_v24 }
 0x110   : > { %v727_v44 = vpop.permute.xlu0 %726  ;;  %v737_v9 = vpop.permute.xlu1 %736 }
 0x111   : > { %v786_v56 = vsub.f32 %v727_v44, %v751_v52  ;;  %v788_v61 = vsub.f32 %v727_v44, %v755_v55  ;;  %v784_v0 = vsub.f32 %v727_v44, %v747_v50  ;;  %v790_v4 = vsub.f32 %v727_v44, %v759_v58 }
 0x112   : > { %v792_v14 = vsub.f32 %v737_v9, %v763_v3  ;;  %v794_v34 = vsub.f32 %v737_v9, %v767_v22  ;;  %v796_v42 = vsub.f32 %v737_v9, %v771_v25 }
 0x113   : > { %v802_v62 = vand.u32 2147483647, %v786_v56  ;;  %v804_v7 = vand.u32 2147483647, %v788_v61  ;;  %v800_v10 = vand.u32 2147483647, %v784_v0 }
 0x114   : > { %v732_v49 = vpop.permute.xlu0 %731  ;;  %v806_v16 = vand.u32 2147483647, %v790_v4  ;;  %v808_v26 = vand.u32 2147483647, %v792_v14  ;;  %v742_v27 = vpop.permute.xlu1 %741  ;;  %v810_v43 = vand.u32 2147483647, %v794_v34 }
 0x115   : > { %v785_v53 = vsub.f32 %v732_v49, %v747_v50  ;;  %v787_v60 = vsub.f32 %v732_v49, %v751_v52  ;;  %v789_v5 = vsub.f32 %v732_v49, %v755_v55  ;;  %v818_v8 = vsub.f32 0.0, %v802_v62  ;;  %v1288_v34 = vld [vmem:[#allocation7 + $0x28] sm:$0xff] }
 0x116   : > { %v816_v15 = vsub.f32 0.0, %v800_v10  ;;  %v791_v17 = vsub.f32 %v732_v49, %v759_v58  ;;  %v820_v20 = vsub.f32 0.0, %v804_v7  ;;  %v793_v31 = vsub.f32 %v742_v27, %v763_v3 }
 0x117   : > { %v801_v57 = vand.u32 2147483647, %v785_v53  ;;  %v803_v6 = vand.u32 2147483647, %v787_v60  ;;  %v805_v18 = vand.u32 2147483647, %v789_v5  ;;  %v795_v37 = vsub.f32 %v742_v27, %v767_v22 }
 0x118   : > { %v836_v21 = vmul.f32 1.442695, %v818_v8  ;;  %v832_v23 = vmul.f32 1.442695, %v816_v15  ;;  %v807_v28 = vand.u32 2147483647, %v791_v17  ;;  %v797_v45 = vsub.f32 %v742_v27, %v771_v25 }
 0x119   : > { %v817_v1 = vsub.f32 0.0, %v801_v57  ;;  %v819_v19 = vsub.f32 0.0, %v803_v6  ;;  %v821_v29 = vsub.f32 0.0, %v805_v18  ;;  %v822_v32 = vsub.f32 0.0, %v806_v16  ;;  %v1100_v22 = vld [vmem:[#allocation5 + $0x8] sm:$0xff]  ;;  %v1297_v25 = vld [vmem:[#allocation7 + $0x70] sm:$0xff] }
 0x11a   : > { %v840_v33 = vmul.f32 1.442695, %v820_v20  ;;  %v824_v36 = vsub.f32 0.0, %v808_v26  ;;  %v823_v38 = vsub.f32 0.0, %v807_v28  ;;  %v809_v40 = vand.u32 2147483647, %v793_v31 }
 0x11b   : > { %v834_v11 = vmul.f32 1.442695, %v817_v1  ;;  %v838_v30 = vmul.f32 1.442695, %v819_v19  ;;  %v842_v39 = vmul.f32 1.442695, %v821_v29  ;;  %v798_v50 = vsub.f32 %v737_v9, %v775_v35 }
 0x11c   : > { %v844_v41 = vmul.f32 1.442695, %v822_v32  ;;  %v848_v44 = vmul.f32 1.442695, %v824_v36  ;;  %v846_v47 = vmul.f32 1.442695, %v823_v38  ;;  %v799_v53 = vsub.f32 %v742_v27, %v775_v35  ;;  %v1029_v38 = vpop.permute.xlu0 %1028 }
 0x11d   : > { %2552 = vpow2.f32 %v834_v11  ;;  %v811_v48 = vand.u32 2147483647, %v795_v37  ;;  %v825_v49 = vsub.f32 0.0, %v809_v40  ;;  %v812_v51 = vand.u32 2147483647, %v796_v42  ;;  %v1102_v20 = vld [vmem:[#allocation5 + $0x18] sm:$0xff] }
 0x11e   : > { %2554 = vpow2.f32 %v832_v23  ;;  %v826_v46 = vsub.f32 0.0, %v810_v43  ;;  %v813_v55 = vand.u32 2147483647, %v797_v45  ;;  %v814_v58 = vand.u32 2147483647, %v798_v50  ;;  %2252 = vmatprep.subr.mxu1 %v1102_v20  ;;  %v1099_v23 = vld [vmem:[#allocation5] sm:$0xff] }
 0x11f   : > { %2556 = vpow2.f32 %v836_v21  ;;  %v827_v56 = vsub.f32 0.0, %v811_v48  ;;  %v850_v57 = vmul.f32 1.442695, %v825_v49  ;;  %v828_v59 = vsub.f32 0.0, %v812_v51  ;;  %v1101_v21 = vld [vmem:[#allocation5 + $0x10] sm:$0xff]  ;;  %2253 = vmatpush3.msra.mxu1 %v1102_v20  ;;  %v1296_v26 = vld [vmem:[#allocation7 + $0x68] sm:$0xff] }
 0x120   : > { %2558 = vpow2.f32 %v838_v30  ;;  %v852_v60 = vmul.f32 1.442695, %v826_v46  ;;  %v815_v62 = vand.u32 2147483647, %v799_v53  ;;  %v829_v63 = vsub.f32 0.0, %v813_v55  ;;  %2254 = vmatprep.subr.mxu1 %v1101_v21  ;;  %v1295_v27 = vld [vmem:[#allocation7 + $0x60] sm:$0xff] }
 0x121   : > { %2560 = vpow2.f32 %v840_v33  ;;  %v854_v0 = vmul.f32 1.442695, %v827_v56  ;;  %v830_v2 = vsub.f32 0.0, %v814_v58  ;;  %v856_v3 = vmul.f32 1.442695, %v828_v59  ;;  %2255 = vmatpush3.msra.mxu1 %v1101_v21  ;;  %v1294_v28 = vld [vmem:[#allocation7 + $0x58] sm:$0xff]  ;;  %v1039_v58 = vpop.permute.xlu0 %1038 }
 0x122   : > { %2562 = vpow2.f32 %v842_v39  ;;  %v831_v5 = vsub.f32 0.0, %v815_v62  ;;  %v858_v6 = vmul.f32 1.442695, %v829_v63  ;;  %2256 = vmatprep.subr.mxu1 %v1100_v22  ;;  %v1293_v29 = vld [vmem:[#allocation7 + $0x50] sm:$0xff]  ;;  %v1292_v30 = vld [vmem:[#allocation7 + $0x48] sm:$0xff]  ;;  %v1291_v31 = vld [vmem:[#allocation7 + $0x40] sm:$0xff]  ;;  %v1034_v39 = vpop.permute.xlu1 %1033 }
 0x123   : > { %2564 = vpow2.f32 %v844_v41  ;;  %v860_v8 = vmul.f32 1.442695, %v830_v2  ;;  %2257 = vmatpush3.msra.mxu1 %v1100_v22  ;;  %v1290_v32 = vld [vmem:[#allocation7 + $0x38] sm:$0xff]  ;;  %v1289_v33 = vld [vmem:[#allocation7 + $0x30] sm:$0xff]  ;;  %v1287_v35 = vld [vmem:[#allocation7 + $0x20] sm:$0xff] }
 0x124   : > { %2566 = vpow2.f32 %v848_v44  ;;  %v862_v11 = vmul.f32 1.442695, %v831_v5  ;;  %2258 = vmatprep.subr.mxu1 %v1099_v23  ;;  %v1286_v36 = vld [vmem:[#allocation7 + $0x18] sm:$0xff]  ;;  %v2011_v37 = vld [vmem:[%s3318_s4] ss:$0 sm:$0xff] }
 0x125   : > { %2568 = vpow2.f32 %v846_v47  ;;  %2259 = vmatpush3.msra.mxu1 %v1099_v23  ;;  %v1053_v40 = vmul.f32 %v2011_v37, %v1034_v39  ;;  %v1052_v41 = vmul.f32 %v2011_v37, %v1029_v38  ;;  %v2012_v42 = vld [vmem:[%s3319_s5] ss:$0 sm:$0xff] }
 0x126   : > { %2570 = vpow2.f32 %v850_v57  ;;  %v1044_v56 = vpop.permute.xlu1 %1043  ;;  %v2013_v38 = vld [vmem:[%s3321_s7] ss:$0 sm:$0xff] }
 0x127   : > { %2572 = vpow2.f32 %v852_v60  ;;  %v1064_v43 = vadd.f32 %v2012_v42, %v1053_v40  ;;  %v1063_v45 = vadd.f32 %v2012_v42, %v1052_v41  ;;  %v1055_v63 = vmul.f32 %v2011_v37, %v1044_v56 }
 0x128   : > { %2574 = vpow2.f32 %v854_v0 }
 0x129   : > { %2576 = vpow2.f32 %v856_v3 }
 0x12a   : > { %v2553_v52 = vpop.eup %2552  ;;  %2578 = vpow2.f32 %v858_v6 }
 0x12b   : > { %v2555_v54 = vpop.eup %2554  ;;  %2580 = vpow2.f32 %v860_v8 }
 0x12c   : > { %2204 = vmatprep.mubr.f32.mxu0 %v2555_v54  ;;  %v2557_v61 = vpop.eup %2556  ;;  %2582 = vpow2.f32 %v862_v11 }
 0x12d   : > { %2205 = vmatmul.mubr.f32.vlgmr.msra.gmra.mxu0 %v2553_v52  ;;  %v2559_v1 = vpop.eup %2558 }
 0x12e   : > { %2207 = vmatprep.mubr.f32.mxu0 %v2557_v61  ;;  %v2561_v4 = vpop.eup %2560  ;;  %2285 = vmatpush3.msra.mxu0 %v1298_v24 }
 0x12f   : > { %v2563_v7 = vpop.eup %2562  ;;  %2286 = vmatprep.subr.mxu0 %v1297_v25 }
 0x130   : > { %v2565_v9 = vpop.eup %2564  ;;  %2287 = vmatpush3.msra.mxu0 %v1297_v25 }
 0x131   : > { %2208 = vmatmul.mubr.f32.gmra.mxu0 %v2559_v1  ;;  %v2567_v10 = vpop.eup %2566  ;;  %2288 = vmatprep.subr.mxu0 %v1296_v26  ;;  %v1054_v1 = vmul.f32 %v2011_v37, %v1039_v58  ;;  %v1283_v37 = vld [vmem:[#allocation7] sm:$0xff] }
 0x132   : > { %2210 = vmatprep.mubr.f32.mxu0 %v2561_v4  ;;  %v2569_v12 = vpop.eup %2568  ;;  %2289 = vmatpush3.msra.mxu0 %v1296_v26 }
 0x133   : > { %v2571_v13 = vpop.eup %2570  ;;  %2290 = vmatprep.subr.mxu0 %v1295_v27 }
 0x134   : > { %v2573_v14 = vpop.eup %2572  ;;  %2291 = vmatpush3.msra.mxu0 %v1295_v27 }
 0x135   : > { %2211 = vmatmul.mubr.f32.gmra.mxu0 %v2563_v7  ;;  %v2575_v15 = vpop.eup %2574  ;;  %2292 = vmatprep.subr.mxu0 %v1294_v28  ;;  %v1066_v7 = vadd.f32 %v2012_v42, %v1055_v63 }
 0x136   : > { %2213 = vmatprep.mubr.f32.mxu0 %v2565_v9  ;;  %v2577_v16 = vpop.eup %2576  ;;  %2293 = vmatpush3.msra.mxu0 %v1294_v28  ;;  %v1065_v9 = vadd.f32 %v2012_v42, %v1054_v1 }
 0x137   : > { %v2579_v17 = vpop.eup %2578  ;;  %2294 = vmatprep.subr.mxu0 %v1293_v29 }
 0x138   : > { %v2581_v18 = vpop.eup %2580  ;;  %2295 = vmatpush3.msra.mxu0 %v1293_v29 }
 0x139   : > { %2214 = vmatmul.mubr.f32.gmra.mxu0 %v2569_v12  ;;  %v2583_v19 = vpop.eup %2582  ;;  %2296 = vmatprep.subr.mxu0 %v1292_v30 }
 0x13a   : > { %2216 = vmatprep.mubr.f32.mxu0 %v2567_v10  ;;  %2297 = vmatpush3.msra.mxu0 %v1292_v30 }
 0x13b   : > { %2298 = vmatprep.subr.mxu0 %v1291_v31 }
 0x13c   : > { %2299 = vmatpush3.msra.mxu0 %v1291_v31 }
 0x13d   : > { %2217 = vmatmul.mubr.f32.gmra.mxu0 %v2571_v13  ;;  %2300 = vmatprep.subr.mxu0 %v1290_v32 }
 0x13e   : > { %2219 = vmatprep.mubr.f32.mxu0 %v2573_v14  ;;  %2301 = vmatpush3.msra.mxu0 %v1290_v32 }
 0x13f   : > { %2302 = vmatprep.subr.mxu0 %v1289_v33 }
 0x140   : > { %2303 = vmatpush3.msra.mxu0 %v1289_v33 }
 0x141   : > { %2220 = vmatmul.mubr.f32.gmra.mxu0 %v2575_v15  ;;  %2304 = vmatprep.subr.mxu0 %v1288_v34 }
 0x142   : > { %2222 = vmatprep.mubr.f32.mxu0 %v2577_v16  ;;  %2305 = vmatpush3.msra.mxu0 %v1288_v34 }
 0x143   : > { %2306 = vmatprep.subr.mxu0 %v1287_v35 }
 0x144   : > { %2307 = vmatpush3.msra.mxu0 %v1287_v35  ;;  %v1285_v35 = vld [vmem:[#allocation7 + $0x10] sm:$0xff] }
 0x145   : > { %2223 = vmatmul.mubr.f32.gmra.mxu0 %v2579_v17  ;;  %2308 = vmatprep.subr.mxu0 %v1286_v36 }
 0x146   : > { %2225 = vmatprep.mubr.f32.mxu0 %v2581_v18  ;;  %2309 = vmatpush3.msra.mxu0 %v1286_v36  ;;  %v1284_v36 = vld [vmem:[#allocation7 + $0x8] sm:$0xff] }
 0x147   : > { %2310 = vmatprep.subr.mxu0 %v1285_v35 }
 0x148   : > { %2311 = vmatpush3.msra.mxu0 %v1285_v35  ;;  %v1527_v35 = vld [vmem:[#allocation8 + $0x20] sm:$0xff] }
 0x149   : > { %2226 = vmatmul.mubr.f32.gmra.mxu0 %v2583_v19  ;;  %2312 = vmatprep.subr.mxu0 %v1284_v36 }
 0x14a   : > { %2313 = vmatpush3.msra.mxu0 %v1284_v36  ;;  %v1526_v36 = vld [vmem:[#allocation8 + $0x18] sm:$0xff] }
 0x14b   : > { %2314 = vmatprep.subr.mxu0 %v1283_v37 }
 0x14c   : > { %2315 = vmatpush3.msra.mxu0 %v1283_v37  ;;  %v1525_v37 = vld [vmem:[#allocation8 + $0x10] sm:$0xff] }
 0x1ed   : > { %v2206_v44 = vpop.f32.mrf.mxu0 }
 0x1ee   : > { %v1068_v47 = vadd.f32 %v2206_v44, %v1064_v43 }
 0x1ef   : > { %v946_v48 = vpop.f32.mrf.mxu0 }
 0x1f0   : > { %v1067_v49 = vadd.f32 %v1063_v45, %v946_v48  ;;  %v1084_v46 = vmax.f32 %v1068_v47, 0.0 }
 0x1f1   : > { %v2209_v50 = vpop.f32.mrf.mxu0 }
 0x1f2   : > { %v1083_v51 = vmax.f32 %v1067_v49, 0.0  ;;  %v1070_v52 = vadd.f32 %v2209_v50, %v1064_v43 }
 0x1f3   : > { %v956_v53 = vpop.f32.mrf.mxu0 }
 0x1f4   : > { %v1069_v54 = vadd.f32 %v1063_v45, %v956_v53  ;;  %2260 = vmatprep.mubr.f32.mxu1 %v1083_v51  ;;  %v1086_v59 = vmax.f32 %v1070_v52, 0.0 }
 0x1f5   : > { %v2212_v55 = vpop.f32.mrf.mxu0  ;;  %2261 = vmatmul.mubr.f32.vlgmr.msra.gmra.mxu1 %v1084_v46 }
 0x1f6   : > { %v1085_v57 = vmax.f32 %v1069_v54, 0.0  ;;  %v1072_v60 = vadd.f32 %v2212_v55, %v1064_v43 }
 0x1f7   : > { %v966_v61 = vpop.f32.mrf.mxu0 }
 0x1f8   : > { %v1071_v62 = vadd.f32 %v1063_v45, %v966_v61  ;;  %2263 = vmatprep.mubr.f32.mxu1 %v1085_v57  ;;  %v1088_v3 = vmax.f32 %v1072_v60, 0.0 }
 0x1f9   : > { %v2215_v0 = vpop.f32.mrf.mxu0  ;;  %2264 = vmatmul.mubr.f32.gmra.mxu1 %v1086_v59 }
 0x1fa   : > { %v1087_v2 = vmax.f32 %v1071_v62, 0.0  ;;  %v1074_v4 = vadd.f32 %v2215_v0, %v1064_v43 }
 0x1fb   : > { %v976_v5 = vpop.f32.mrf.mxu0 }
 0x1fc   : > { %v1073_v6 = vadd.f32 %v1063_v45, %v976_v5  ;;  %2266 = vmatprep.mubr.f32.mxu1 %v1087_v2  ;;  %v1090_v11 = vmax.f32 %v1074_v4, 0.0 }
 0x1fd   : > { %v2218_v8 = vpop.f32.mrf.mxu0  ;;  %2267 = vmatmul.mubr.f32.gmra.mxu1 %v1088_v3 }
 0x1fe   : > { %v1089_v10 = vmax.f32 %v1073_v6, 0.0  ;;  %v1076_v12 = vadd.f32 %v2218_v8, %v1066_v7 }
 0x1ff   : > { %v986_v13 = vpop.f32.mrf.mxu0 }
 0x200   : > { %v1075_v14 = vadd.f32 %v1065_v9, %v986_v13  ;;  %2269 = vmatprep.mubr.f32.mxu1 %v1089_v10  ;;  %v1092_v17 = vmax.f32 %v1076_v12, 0.0 }
 0x201   : > { %v2221_v15 = vpop.f32.mrf.mxu0  ;;  %2270 = vmatmul.mubr.f32.gmra.mxu1 %v1090_v11 }
 0x202   : > { %v1091_v16 = vmax.f32 %v1075_v14, 0.0  ;;  %v1078_v18 = vadd.f32 %v2221_v15, %v1066_v7 }
 0x203   : > { %v996_v19 = vpop.f32.mrf.mxu0 }
 0x204   : > { %v1077_v20 = vadd.f32 %v1065_v9, %v996_v19  ;;  %2272 = vmatprep.mubr.f32.mxu1 %v1091_v16  ;;  %v1094_v23 = vmax.f32 %v1078_v18, 0.0 }
 0x205   : > { %v2224_v21 = vpop.f32.mrf.mxu0  ;;  %2273 = vmatmul.mubr.f32.gmra.mxu1 %v1092_v17 }
 0x206   : > { %v1093_v22 = vmax.f32 %v1077_v20, 0.0  ;;  %v1080_v24 = vadd.f32 %v2224_v21, %v1066_v7 }
 0x207   : > { %v1006_v25 = vpop.f32.mrf.mxu0 }
 0x208   : > { %v1079_v26 = vadd.f32 %v1065_v9, %v1006_v25  ;;  %2275 = vmatprep.mubr.f32.mxu1 %v1093_v22  ;;  %v1096_v29 = vmax.f32 %v1080_v24, 0.0  ;;  %v1538_v24 = vld [vmem:[#allocation8 + $0x78] sm:$0xff]  ;;  %v1537_v25 = vld [vmem:[#allocation8 + $0x70] sm:$0xff] }
 0x209   : > { %v2227_v27 = vpop.f32.mrf.mxu0  ;;  %2276 = vmatmul.mubr.f32.gmra.mxu1 %v1094_v23  ;;  %v2832_v23 = vmov 0.0  }
 0x20a   : > { %v1095_v28 = vmax.f32 %v1079_v26, 0.0  ;;  %v1082_v30 = vadd.f32 %v2227_v27, %v1066_v7  ;;  %2340 = vmatprep.subr.mxu1 %v2832_v23  ;;  %2375 = vmatprep.subr.mxu0 %v2832_v23  ;;  %v1536_v26 = vld [vmem:[#allocation8 + $0x68] sm:$0xff]  ;;  %v1535_v27 = vld [vmem:[#allocation8 + $0x60] sm:$0xff] }
 0x20b   : > { %v1016_v31 = vpop.f32.mrf.mxu0  ;;  %2341 = vmatpush3.msra.mxu1 %v1538_v24 }
 0x20c   : > { %v1081_v32 = vadd.f32 %v1065_v9, %v1016_v31  ;;  %2278 = vmatprep.mubr.f32.mxu1 %v1095_v28  ;;  %v1098_v34 = vmax.f32 %v1082_v30, 0.0  ;;  %2342 = vmatprep.subr.mxu1 %v2832_v23  ;;  %v1534_v28 = vld [vmem:[#allocation8 + $0x58] sm:$0xff]  ;;  %v1532_v30 = vld [vmem:[#allocation8 + $0x48] sm:$0xff]  ;;  %v1531_v31 = vld [vmem:[#allocation8 + $0x40] sm:$0xff] }
 0x20d   : > { %2279 = vmatmul.mubr.f32.gmra.mxu1 %v1096_v29  ;;  %v1533_v29 = vld [vmem:[#allocation8 + $0x50] sm:$0xff] }
 0x20e   : > { %v1097_v33 = vmax.f32 %v1081_v32, 0.0  ;;  %2343 = vmatpush3.msra.mxu1 %v1537_v25  ;;  %v1530_v32 = vld [vmem:[#allocation8 + $0x38] sm:$0xff] }
 0x20f   : > { %2344 = vmatprep.subr.mxu1 %v2832_v23 }
 0x210   : > { %2281 = vmatprep.mubr.f32.mxu1 %v1097_v33  ;;  %2345 = vmatpush3.msra.mxu1 %v1536_v26  ;;  %v1529_v33 = vld [vmem:[#allocation8 + $0x30] sm:$0xff] }
 0x211   : > { %2282 = vmatmul.mubr.f32.gmra.mxu1 %v1098_v34  ;;  %2346 = vmatprep.subr.mxu1 %v2832_v23  ;;  %v1528_v34 = vld [vmem:[#allocation8 + $0x28] sm:$0xff] }
 0x212   : > { %2347 = vmatpush3.msra.mxu1 %v1535_v27  ;;  %2372 = vmatprep.mubr.msk.f32.mxu1 %vm2833_vm0, %v2832_v23 }
 0x213   : > { %2348 = vmatprep.subr.mxu1 %v2832_v23 }
 0x214   : > { %2349 = vmatpush3.msra.mxu1 %v1534_v28 }
 0x215   : > { %2350 = vmatprep.subr.mxu1 %v2832_v23 }
 0x216   : > { %2351 = vmatpush3.msra.mxu1 %v1533_v29 }
 0x217   : > { %2352 = vmatprep.subr.mxu1 %v2832_v23 }
 0x218   : > { %2353 = vmatpush3.msra.mxu1 %v1532_v30 }
 0x219   : > { %2354 = vmatprep.subr.mxu1 %v2832_v23 }
 0x21a   : > { %2355 = vmatpush3.msra.mxu1 %v1531_v31 }
 0x21b   : > { %2356 = vmatprep.subr.mxu1 %v2832_v23 }
 0x21c   : > { %2357 = vmatpush3.msra.mxu1 %v1530_v32 }
 0x21d   : > { %2358 = vmatprep.subr.mxu1 %v2832_v23 }
 0x21e   : > { %2359 = vmatpush3.msra.mxu1 %v1529_v33 }
 0x21f   : > { %2360 = vmatprep.subr.mxu1 %v2832_v23 }
 0x220   : > { %2361 = vmatpush3.msra.mxu1 %v1528_v34 }
 0x221   : > { %2362 = vmatprep.subr.mxu1 %v2832_v23 }
 0x222   : > { %2363 = vmatpush3.msra.mxu1 %v1527_v35 }
 0x223   : > { %2364 = vmatprep.subr.mxu1 %v2832_v23 }
 0x224   : > { %2365 = vmatpush3.msra.mxu1 %v1526_v36 }
 0x225   : > { %2366 = vmatprep.subr.mxu1 %v2832_v23 }
 0x226   : > { %2367 = vmatpush3.msra.mxu1 %v1525_v37 }
 0x227   : > { %2368 = vmatprep.subr.mxu1 %v2832_v23 }
 0x2b5   : > { %v2262_v39 = vpop.f32.mrf.mxu1 }
 0x2b6   : > { %v1194_v40 = vadd.f32 %v2262_v39, %v2013_v38  ;;  %v1523_v39 = vld [vmem:[#allocation8] sm:$0xff] }
 0x2b7   : > { %v1188_v41 = vpop.f32.mrf.mxu1 }
 0x2b8   : > { %v1189_v42 = vadd.f32 %v2013_v38, %v1188_v41  ;;  %v1268_v45 = vmax.f32 %v1194_v40, 0.0  ;;  %v1655_v40 = vld [vmem:[#allocation10 + $0x78] sm:$0xff]  ;;  %v1654_v41 = vld [vmem:[#allocation10 + $0x70] sm:$0xff] }
 0x2b9   : > { %v2265_v43 = vpop.f32.mrf.mxu1 }
 0x2ba   : > { %v1267_v44 = vmax.f32 %v1189_v42, 0.0  ;;  %v1204_v47 = vadd.f32 %v2265_v43, %v2013_v38  ;;  %v1653_v42 = vld [vmem:[#allocation10 + $0x68] sm:$0xff]  ;;  %v1652_v43 = vld [vmem:[#allocation10 + $0x60] sm:$0xff] }
 0x2bb   : > { %v1198_v48 = vpop.f32.mrf.mxu1 }
 0x2bc   : > { %v1199_v49 = vadd.f32 %v2013_v38, %v1198_v48  ;;  %2316 = vmatprep.mubr.f32.mxu0 %v1267_v44  ;;  %v1270_v46 = vmax.f32 %v1204_v47, 0.0  ;;  %v1651_v44 = vld [vmem:[#allocation10 + $0x58] sm:$0xff]  ;;  %v1649_v47 = vld [vmem:[#allocation10 + $0x48] sm:$0xff]  ;;  %v1648_v48 = vld [vmem:[#allocation10 + $0x40] sm:$0xff] }
 0x2bd   : > { %v2268_v50 = vpop.f32.mrf.mxu1  ;;  %2317 = vmatmul.mubr.f32.vlgmr.msra.gmra.mxu0 %v1268_v45  ;;  %v1650_v45 = vld [vmem:[#allocation10 + $0x50] sm:$0xff] }
 0x2be   : > { %v1269_v51 = vmax.f32 %v1199_v49, 0.0  ;;  %v1214_v52 = vadd.f32 %v2268_v50, %v2013_v38  ;;  %2376 = vmatpush3.msra.mxu0 %v1655_v40  ;;  %v1647_v49 = vld [vmem:[#allocation10 + $0x38] sm:$0xff]  ;;  %v1646_v50 = vld [vmem:[#allocation10 + $0x30] sm:$0xff] }
 0x2bf   : > { %v1208_v53 = vpop.f32.mrf.mxu1  ;;  %2377 = vmatprep.subr.mxu0 %v2832_v23 }
 0x2c0   : > { %v1209_v54 = vadd.f32 %v2013_v38, %v1208_v53  ;;  %2319 = vmatprep.mubr.f32.mxu0 %v1269_v51  ;;  %v1272_v57 = vmax.f32 %v1214_v52, 0.0  ;;  %2378 = vmatpush3.msra.mxu0 %v1654_v41  ;;  %v1645_v51 = vld [vmem:[#allocation10 + $0x28] sm:$0xff]  ;;  %v1643_v52 = vld [vmem:[#allocation10 + $0x18] sm:$0xff]  ;;  %v1642_v53 = vld [vmem:[#allocation10 + $0x10] sm:$0xff] }
 0x2c1   : > { %v2271_v55 = vpop.f32.mrf.mxu1  ;;  %2320 = vmatmul.mubr.f32.gmra.mxu0 %v1270_v46  ;;  %2379 = vmatprep.subr.mxu0 %v2832_v23  ;;  %v1644_v46 = vld [vmem:[#allocation10 + $0x20] sm:$0xff] }
 0x2c2   : > { %v1271_v56 = vmax.f32 %v1209_v54, 0.0  ;;  %v1224_v58 = vadd.f32 %v2271_v55, %v2013_v38  ;;  %2380 = vmatpush3.msra.mxu0 %v1653_v42 }
 0x2c3   : > { %v1218_v59 = vpop.f32.mrf.mxu1  ;;  %2381 = vmatprep.subr.mxu0 %v2832_v23 }
 0x2c4   : > { %v1219_v60 = vadd.f32 %v2013_v38, %v1218_v59  ;;  %2322 = vmatprep.mubr.f32.mxu0 %v1271_v56  ;;  %v1274_v63 = vmax.f32 %v1224_v58, 0.0  ;;  %2382 = vmatpush3.msra.mxu0 %v1652_v43 }
 0x2c5   : > { %v2274_v61 = vpop.f32.mrf.mxu1  ;;  %2323 = vmatmul.mubr.f32.gmra.mxu0 %v1272_v57  ;;  %2383 = vmatprep.subr.mxu0 %v2832_v23  ;;  %v3226_v57 = vld [vmem:[%s3323_s9] ss:$0 sm:$0xff] }
 0x2c6   : > { %v1273_v62 = vmax.f32 %v1219_v60, 0.0  ;;  %v1234_v0 = vadd.f32 %v2274_v61, %v2013_v38  ;;  %2384 = vmatpush3.msra.mxu0 %v1651_v44 }
 0x2c7   : > { %v1228_v1 = vpop.f32.mrf.mxu1  ;;  %2385 = vmatprep.subr.mxu0 %v2832_v23 }
 0x2c8   : > { %v1229_v2 = vadd.f32 %v2013_v38, %v1228_v1  ;;  %2325 = vmatprep.mubr.f32.mxu0 %v1273_v62  ;;  %v1276_v5 = vmax.f32 %v1234_v0, 0.0  ;;  %2386 = vmatpush3.msra.mxu0 %v1650_v45 }
 0x2c9   : > { %v2277_v3 = vpop.f32.mrf.mxu1  ;;  %2326 = vmatmul.mubr.f32.gmra.mxu0 %v1274_v63  ;;  %2387 = vmatprep.subr.mxu0 %v2832_v23 }
 0x2ca   : > { %v1275_v4 = vmax.f32 %v1229_v2, 0.0  ;;  %v1244_v6 = vadd.f32 %v2277_v3, %v2013_v38  ;;  %2388 = vmatpush3.msra.mxu0 %v1649_v47 }
 0x2cb   : > { %v1238_v7 = vpop.f32.mrf.mxu1  ;;  %2389 = vmatprep.subr.mxu0 %v2832_v23 }
 0x2cc   : > { %v1239_v8 = vadd.f32 %v2013_v38, %v1238_v7  ;;  %2328 = vmatprep.mubr.f32.mxu0 %v1275_v4  ;;  %v1278_v11 = vmax.f32 %v1244_v6, 0.0  ;;  %2390 = vmatpush3.msra.mxu0 %v1648_v48 }
 0x2cd   : > { %v2280_v9 = vpop.f32.mrf.mxu1  ;;  %2329 = vmatmul.mubr.f32.gmra.mxu0 %v1276_v5  ;;  %2391 = vmatprep.subr.mxu0 %v2832_v23 }
 0x2ce   : > { %v1277_v10 = vmax.f32 %v1239_v8, 0.0  ;;  %v1254_v12 = vadd.f32 %v2280_v9, %v2013_v38  ;;  %2392 = vmatpush3.msra.mxu0 %v1647_v49 }
 0x2cf   : > { %v1248_v13 = vpop.f32.mrf.mxu1  ;;  %2393 = vmatprep.subr.mxu0 %v2832_v23 }
 0x2d0   : > { %v1249_v14 = vadd.f32 %v2013_v38, %v1248_v13  ;;  %2331 = vmatprep.mubr.f32.mxu0 %v1277_v10  ;;  %v1280_v17 = vmax.f32 %v1254_v12, 0.0  ;;  %2394 = vmatpush3.msra.mxu0 %v1646_v50 }
 0x2d1   : > { %v2283_v15 = vpop.f32.mrf.mxu1  ;;  %2332 = vmatmul.mubr.f32.gmra.mxu0 %v1278_v11  ;;  %2395 = vmatprep.subr.mxu0 %v2832_v23 }
 0x2d2   : > { %v1279_v16 = vmax.f32 %v1249_v14, 0.0  ;;  %v1264_v18 = vadd.f32 %v2283_v15, %v2013_v38  ;;  %2396 = vmatpush3.msra.mxu0 %v1645_v51 }
 0x2d3   : > { %v1258_v19 = vpop.f32.mrf.mxu1  ;;  %2397 = vmatprep.subr.mxu0 %v2832_v23 }
 0x2d4   : > { %v1259_v20 = vadd.f32 %v2013_v38, %v1258_v19  ;;  %2334 = vmatprep.mubr.f32.mxu0 %v1279_v16  ;;  %v1282_v22 = vmax.f32 %v1264_v18, 0.0  ;;  %v1524_v38 = vld [vmem:[#allocation8 + $0x8] sm:$0xff]  ;;  %2398 = vmatpush3.msra.mxu0 %v1644_v46 }
 0x2d5   : > { %2335 = vmatmul.mubr.f32.gmra.mxu0 %v1280_v17  ;;  %2369 = vmatpush3.msra.mxu1 %v1524_v38 }
 0x2d6   : > { %v1281_v21 = vmax.f32 %v1259_v20, 0.0  ;;  %2370 = vmatprep.subr.mxu1 %v2832_v23  ;;  %2399 = vmatprep.subr.mxu0 %v2832_v23 }
 0x2d7   : > { %2371 = vmatpush3.msra.mxu1 %v1523_v39  ;;  %2400 = vmatpush3.msra.mxu0 %v1643_v52 }
 0x2d8   : > { %2337 = vmatprep.mubr.f32.mxu0 %v1281_v21  ;;  %2410 = vmatprep.subr.mxu1 %v2832_v23 }
 0x2d9   : > { %2338 = vmatmul.mubr.f32.gmra.mxu0 %v1282_v22  ;;  %2401 = vmatprep.subr.mxu0 %v2832_v23 }
 0x2da   : > { %2407 = vmatprep.mubr.msk.f32.mxu0 %vm2833_vm0, %v2832_v23  ;;  %2402 = vmatpush3.msra.mxu0 %v1642_v53 }
 0x2db   : > { %2403 = vmatprep.subr.mxu0 %v2832_v23 }
 0x37d   : > { %v2318_v54 = vpop.f32.mrf.mxu0 }
 0x37e   : > { %v1378_v63 = vadd.f32 %v2318_v54, %v3226_v57 }
 0x37f   : > { %v1372_v55 = vpop.f32.mrf.mxu0 }
 0x380   : > { %v1373_v60 = vadd.f32 %v3226_v57, %v1372_v55  ;;  %v1452_v8 = vmax.f32 %v1378_v63, 0.0 }
 0x381   : > { %v2321_v56 = vpop.f32.mrf.mxu0 }
 0x382   : > { %v1388_v62 = vadd.f32 %v2321_v56, %v3226_v57  ;;  %v1451_v4 = vmax.f32 %v1373_v60, 0.0 }
 0x383   : > { %v1382_v58 = vpop.f32.mrf.mxu0 }
 0x384   : > { %v1383_v59 = vadd.f32 %v3226_v57, %v1382_v58  ;;  %v1454_v6 = vmax.f32 %v1388_v62, 0.0  ;;  %v1467_v13 = vmax.f32 %v1451_v4, %v1452_v8 }
 0x385   : > { %v2324_v61 = vpop.f32.mrf.mxu0 }
 0x386   : > { %v1398_v0 = vadd.f32 %v2324_v61, %v3226_v57  ;;  %v1453_v2 = vmax.f32 %v1383_v59, 0.0  ;;  %v1468_v22 = vrot.slane %v1467_v13, 4 }
 0x387   : > { %v1392_v1 = vpop.f32.mrf.mxu0 }
 0x388   : > { %v1393_v3 = vadd.f32 %v3226_v57, %v1392_v1  ;;  %v1456_v9 = vmax.f32 %v1398_v0, 0.0  ;;  %v1474_v12 = vmax.f32 %v1453_v2, %v1454_v6  ;;  %v1469_v35 = vmax.f32 %v1467_v13, %v1468_v22 }
 0x389   : > { %v2327_v5 = vpop.f32.mrf.mxu0 }
 0x38a   : > { %v1455_v7 = vmax.f32 %v1393_v3, 0.0  ;;  %v1408_v10 = vadd.f32 %v2327_v5, %v3226_v57  ;;  %v1475_v21 = vrot.slane %v1474_v12, 4  ;;  %v1470_v49 = vrot.slane %v1469_v35, 2 }
 0x38b   : > { %v1402_v11 = vpop.f32.mrf.mxu0 }
 0x38c   : > { %v1481_v14 = vmax.f32 %v1455_v7, %v1456_v9  ;;  %v1403_v15 = vadd.f32 %v3226_v57, %v1402_v11  ;;  %v1458_v17 = vmax.f32 %v1408_v10, 0.0  ;;  %v1476_v33 = vmax.f32 %v1474_v12, %v1475_v21 }
 0x38d   : > { %v2330_v16 = vpop.f32.mrf.mxu0  ;;  %v1471_v0 = vmax.f32 %v1469_v35, %v1470_v49  ;;  %v1743_v49 = vld [vmem:[#allocation11 + $0x48] sm:$0xff] }
 0x38e   : > { %v1457_v18 = vmax.f32 %v1403_v15, 0.0  ;;  %v1418_v19 = vadd.f32 %v2330_v16, %v3226_v57  ;;  %v1482_v24 = vrot.slane %v1481_v14, 4  ;;  %v1477_v45 = vrot.slane %v1476_v33, 2 }
 0x38f   : > { %v1412_v20 = vpop.f32.mrf.mxu0  ;;  %v1472_v13 = vrot.slane %v1471_v0, 1 }
 0x390   : > { %v1488_v25 = vmax.f32 %v1457_v18, %v1458_v17  ;;  %v1413_v26 = vadd.f32 %v3226_v57, %v1412_v20  ;;  %v1460_v30 = vmax.f32 %v1418_v19, 0.0  ;;  %v1483_v36 = vmax.f32 %v1481_v14, %v1482_v24 }
 0x391   : > { %v2333_v27 = vpop.f32.mrf.mxu0  ;;  %v1478_v60 = vmax.f32 %v1476_v33, %v1477_v45  ;;  %v1473_v22 = vmax.f32 %v1471_v0, %v1472_v13  ;;  %v1746_v45 = vld [vmem:[#allocation11 + $0x60] sm:$0xff]  ;;  %v2016_v0 = vld [vmem:[%s3327_s13] ss:$0 sm:$0xff] }
 0x392   : > { %v1428_v28 = vadd.f32 %v2333_v27, %v3226_v57  ;;  %v1489_v29 = vrot.slane %v1488_v25, 4  ;;  %v1459_v31 = vmax.f32 %v1413_v26, 0.0  ;;  %v1484_v50 = vrot.slane %v1483_v36, 2 }
 0x393   : > { %v1422_v32 = vpop.f32.mrf.mxu0  ;;  %v1479_v8 = vrot.slane %v1478_v60, 1 }
 0x394   : > { %v1423_v34 = vadd.f32 %v3226_v57, %v1422_v32  ;;  %v1490_v37 = vmax.f32 %v1488_v25, %v1489_v29  ;;  %v1495_v38 = vmax.f32 %v1459_v31, %v1460_v30  ;;  %v1462_v40 = vmax.f32 %v1428_v28, 0.0 }
 0x395   : > { %v2336_v39 = vpop.f32.mrf.mxu0  ;;  %v1485_v1 = vmax.f32 %v1483_v36, %v1484_v50  ;;  %v1480_v18 = vmax.f32 %v1478_v60, %v1479_v8  ;;  %v1742_v50 = vld [vmem:[#allocation11 + $0x40] sm:$0xff] }
 0x396   : > { %v1461_v41 = vmax.f32 %v1423_v34, 0.0  ;;  %v1438_v42 = vadd.f32 %v2336_v39, %v3226_v57  ;;  %v1496_v43 = vrot.slane %v1495_v38, 4  ;;  %v1491_v51 = vrot.slane %v1490_v37, 2 }
 0x397   : > { %v1432_v44 = vpop.f32.mrf.mxu0  ;;  %v1486_v12 = vrot.slane %v1485_v1, 1  ;;  %v1555_v28 = vsel %vm1554_vm1, %v1480_v18, %v1473_v22 }
 0x398   : > { %v1502_v47 = vmax.f32 %v1461_v41, %v1462_v40  ;;  %v1433_v48 = vadd.f32 %v3226_v57, %v1432_v44  ;;  %v1497_v46 = vmax.f32 %v1495_v38, %v1496_v43  ;;  %v1464_v54 = vmax.f32 %v1438_v42, 0.0  ;;  %v1641_v40 = vld [vmem:[#allocation10 + $0x8] sm:$0xff]  ;;  %v1640_v41 = vld [vmem:[#allocation10] sm:$0xff]  ;;  %v1749_v42 = vld [vmem:[#allocation11 + $0x78] sm:$0xff] }
 0x399   : > { %v2339_v52 = vpop.f32.mrf.mxu0  ;;  %v1492_v2 = vmax.f32 %v1490_v37, %v1491_v51  ;;  %v1487_v21 = vmax.f32 %v1485_v1, %v1486_v12  ;;  %2404 = vmatpush3.msra.mxu0 %v1641_v40  ;;  %v1748_v43 = vld [vmem:[#allocation11 + $0x70] sm:$0xff]  ;;  %v1747_v44 = vld [vmem:[#allocation11 + $0x68] sm:$0xff]  ;;  %v1741_v51 = vld [vmem:[#allocation11 + $0x38] sm:$0xff] }
 0x39a   : > { %v1503_v53 = vrot.slane %v1502_v47, 4  ;;  %v1463_v55 = vmax.f32 %v1433_v48, 0.0  ;;  %v1448_v56 = vadd.f32 %v2339_v52, %v3226_v57  ;;  %v1498_v58 = vrot.slane %v1497_v46, 2  ;;  %2405 = vmatprep.subr.mxu0 %v2832_v23  ;;  %v1744_v48 = vld [vmem:[#allocation11 + $0x50] sm:$0xff]  ;;  %v1739_v52 = vld [vmem:[#allocation11 + $0x28] sm:$0xff] }
 0x39b   : > { %v1442_v59 = vpop.f32.mrf.mxu0  ;;  %v1493_v14 = vrot.slane %v1492_v2, 1  ;;  %v1557_v31 = vsel %vm1556_vm2, %v1487_v21, %v1555_v28  ;;  %2406 = vmatpush3.msra.mxu0 %v1640_v41 }
 0x39c   : > { %v1504_v61 = vmax.f32 %v1502_v47, %v1503_v53  ;;  %v1509_v62 = vmax.f32 %v1463_v55, %v1464_v54  ;;  %v1443_v63 = vadd.f32 %v3226_v57, %v1442_v59  ;;  %v1466_v5 = vmax.f32 %v1448_v56, 0.0  ;;  %v1745_v47 = vld [vmem:[#allocation11 + $0x58] sm:$0xff]  ;;  %v1738_v53 = vld [vmem:[#allocation11 + $0x20] sm:$0xff]  ;;  %v2015_v55 = vld [vmem:[%s3325_s11] ss:$0 sm:$0xff] }
 0x39d   : > { %v1499_v7 = vmax.f32 %v1497_v46, %v1498_v58  ;;  %v1494_v24 = vmax.f32 %v1492_v2, %v1493_v14  ;;  %v1740_v46 = vld [vmem:[#allocation11 + $0x30] sm:$0xff]  ;;  %v1737_v54 = vld [vmem:[#allocation11 + $0x18] sm:$0xff] }
 0x39e   : > { %v1505_v3 = vrot.slane %v1504_v61, 2  ;;  %v1510_v4 = vrot.slane %v1509_v62, 4  ;;  %v1465_v6 = vmax.f32 %v1443_v63, 0.0  ;;  %v1734_v63 = vld [vmem:[#allocation11] sm:$0xff] }
 0x39f   : > { %v1500_v17 = vrot.slane %v1499_v7, 1  ;;  %v1559_v33 = vsel %vm1558_vm3, %v1494_v24, %v1557_v31 }
 0x3a0   : > { %v1506_v9 = vmax.f32 %v1504_v61, %v1505_v3  ;;  %v1511_v10 = vmax.f32 %v1509_v62, %v1510_v4  ;;  %v1516_v11 = vmax.f32 %v1465_v6, %v1466_v5  ;;  %v1736_v61 = vld [vmem:[#allocation11 + $0x10] sm:$0xff]  ;;  %v1735_v62 = vld [vmem:[#allocation11 + $0x8] sm:$0xff] }
 0x3a1   : > { %v1501_v27 = vmax.f32 %v1499_v7, %v1500_v17  ;;  %v2017_v5 = vld [vmem:[%s3372_s12] ss:$0 sm:$0xff] }
 0x3a2   : > { %v1512_v15 = vrot.slane %v1511_v10, 2  ;;  %v1517_v16 = vrot.slane %v1516_v11, 4  ;;  %v1507_v57 = vrot.slane %v1506_v9, 1 }
 0x3a3   : > { %v1561_v35 = vsel %vm1560_vm4, %v1501_v27, %v1559_v33 }
 0x3a4   : > { %v1513_v19 = vmax.f32 %v1511_v10, %v1512_v15  ;;  %v1518_v20 = vmax.f32 %v1516_v11, %v1517_v16  ;;  %v1508_v29 = vmax.f32 %v1506_v9, %v1507_v57 }
 0x3a6   : > { %v1514_v25 = vrot.slane %v1513_v19, 1  ;;  %v1519_v26 = vrot.slane %v1518_v20, 2  ;;  %v1563_v37 = vsel %vm1562_vm5, %v1508_v29, %v1561_v35 }
 0x3a8   : > { %v1520_v30 = vmax.f32 %v1518_v20, %v1519_v26  ;;  %v1515_v32 = vmax.f32 %v1513_v19, %v1514_v25 }
 0x3aa   : > { %v1521_v34 = vrot.slane %v1520_v30, 1  ;;  %v1565_v38 = vsel %vm1564_vm6, %v1515_v32, %v1563_v37 }
 0x3ac   : > { %v1522_v36 = vmax.f32 %v1520_v30, %v1521_v34 }
 0x3ae   : > { %v1567_v39 = vsel %vm1566_vm7, %v1522_v36, %v1565_v38 }
 0x3af   : > { %2373 = vmatmul.mubr.f32.vlgmr.msra.gmra.mxu1 %v1567_v39 }
 0x3b0   : > { %2442 = vmatprep.mubr.msk.f32.mxu1 %vm2833_vm0, %v2832_v23  ;;  %2411 = vmatpush3.msra.mxu1 %v1749_v42 }
 0x3b1   : > { %2412 = vmatprep.subr.mxu1 %v2832_v23 }
 0x3b2   : > { %2413 = vmatpush3.msra.mxu1 %v1748_v43 }
 0x3b3   : > { %2414 = vmatprep.subr.mxu1 %v2832_v23 }
 0x3b4   : > { %2415 = vmatpush3.msra.mxu1 %v1747_v44 }
 0x3b5   : > { %2416 = vmatprep.subr.mxu1 %v2832_v23 }
 0x3b6   : > { %2417 = vmatpush3.msra.mxu1 %v1746_v45 }
 0x3b7   : > { %2418 = vmatprep.subr.mxu1 %v2832_v23 }
 0x3b8   : > { %2419 = vmatpush3.msra.mxu1 %v1745_v47 }
 0x3b9   : > { %2420 = vmatprep.subr.mxu1 %v2832_v23 }
 0x3ba   : > { %2421 = vmatpush3.msra.mxu1 %v1744_v48 }
 0x3bb   : > { %2422 = vmatprep.subr.mxu1 %v2832_v23 }
 0x3bc   : > { %2423 = vmatpush3.msra.mxu1 %v1743_v49 }
 0x3bd   : > { %2424 = vmatprep.subr.mxu1 %v2832_v23 }
 0x3be   : > { %2425 = vmatpush3.msra.mxu1 %v1742_v50 }
 0x3bf   : > { %2426 = vmatprep.subr.mxu1 %v2832_v23 }
 0x3c0   : > { %2427 = vmatpush3.msra.mxu1 %v1741_v51 }
 0x3c1   : > { %2428 = vmatprep.subr.mxu1 %v2832_v23 }
 0x3c2   : > { %2429 = vmatpush3.msra.mxu1 %v1740_v46 }
 0x3c3   : > { %2430 = vmatprep.subr.mxu1 %v2832_v23 }
 0x3c4   : > { %2431 = vmatpush3.msra.mxu1 %v1739_v52 }
 0x3c5   : > { %2432 = vmatprep.subr.mxu1 %v2832_v23 }
 0x3c6   : > { %2433 = vmatpush3.msra.mxu1 %v1738_v53 }
 0x3c7   : > { %2434 = vmatprep.subr.mxu1 %v2832_v23 }
 0x3c8   : > { %2435 = vmatpush3.msra.mxu1 %v1737_v54 }
 0x3c9   : > { %2436 = vmatprep.subr.mxu1 %v2832_v23 }
 0x3ca   : > { %2437 = vmatpush3.msra.mxu1 %v1736_v61 }
 0x3cb   : > { %2438 = vmatprep.subr.mxu1 %v2832_v23 }
 0x3cc   : > { %2439 = vmatpush3.msra.mxu1 %v1735_v62 }
 0x3cd   : > { %2440 = vmatprep.subr.mxu1 %v2832_v23 }
 0x3ce   : > { %2441 = vmatpush3.msra.mxu1 %v1734_v63 }
 0x46f   : > { %v1635_v56 = vpop.f32.mrf.mxu1 }
 0x470   : > { %v1636_v58 = vadd.f32 %v2015_v55, %v1635_v56 }
 0x471   : > { %v2374_v59 = vpop.f32.mrf.mxu1 }
 0x472   : > { %v1639_v60 = vmax.f32 %v1636_v58, 0.0 }
 0x474   : > { %2408 = vmatmul.mubr.f32.vlgmr.msra.gmra.mxu0 %v1639_v60 }
 0x534   : > { %v1729_v1 = vpop.f32.mrf.mxu0 }
 0x535   : > { %v1730_v2 = vadd.f32 %v2016_v0, %v1729_v1 }
 0x536   : > { %v2409_v3 = vpop.f32.mrf.mxu0 }
 0x537   : > { %v1733_v4 = vmax.f32 %v1730_v2, 0.0 }
 0x539   : > { %2443 = vmatmul.mubr.f32.vlgmr.msra.gmra.mxu1 %v1733_v4 }
 0x5f9   : > { %v1823_v23 = vpop.f32.mrf.mxu1 }
 0x5fa   : > { %v1824_v6 = vadd.f32 %v2017_v5, %v1823_v23 }
 0x5fb   : > { %v2444_v7 = vpop.f32.mrf.mxu1 }
 0x5fc   : > { %1827 = vst [vmem:[%s648_s20] sm:$0xff] %v1824_v6 }
 0x5fd   : > { %2755 = shalt.err (!%p2752_p4)
}
 0x5fe   : > { %s2756_s15 = scalar_lea.hbm %s3277_s17, 128  ;;  %s2760_s12 = scalar_lea.hbm %s3373_s18, 256 }
 0x5ff   : > { %p2757_p12 = scmp.ne.s32.totalorder %s3277_s17, %s2756_s15  ;;  %p2761_p7 = scmp.lt.s32.totalorder %s3277_s17, %s3373_s18 }
 0x600   : > { %p2762_p8 = scmp.lt.s32.totalorder %s2760_s12, %s2756_s15 }
 0x601   : > { %p2758_p6 = pnand %p2757_p12, %p3374_p0 }
 0x602   : > { %p2763_p10 = por %p2762_p8, %p2761_p7 }
 0x603   : > { %p2759_p2 = pneg %p2758_p6 }
 0x605   : > { %p2764_p11 = pnand %p2763_p10, %p2759_p2 }
 0x607   : > { %2767 = shalt.err (!%p2764_p11)
}
 0x608   : > { %2467 = dma.vmem_to_hbm [thread:$0]  (%p3374_p0), %s1843_s25, 128, %s3277_s17, %s1829_s8  }
 0x609 PF: > { %s1854_s30 = sand.u32 1, %s2806_s21   ;;  %p3375_p13 = scmp.ne.s32.totalorder %s3361_s29, 0 }
 0x60a   : > { %p3376_p5 = scmp.ge.s32.totalorder %s2818_s24, 2  ;;  %s1855_s16 = scalar_lea.sflag [#allocation4], %s1854_s30 }
 0x60c   : > { %p2490_p9 = pnand %p3376_p5, %p3375_p13 }
 0x60e   : > { %p2491_p1 = pneg %p2490_p9 }
 0x610   : > { %2801 = dma.done.wait (%p2491_p1), %s1855_s16, 128  }
 0x611   : > { %2803 = vsyncadd (%p2491_p1), %s1855_s16, 4294967168  ;;  %s3377_s24 = sld [smem:[#allocation20_spill]]  ;;  %s3380_s21 = smov %s2810_s22 }
 0x612   : > { %s3378_s14 = sld [smem:[#allocation19_spill]] }
 0x613   : > { %s3379_s23 = sld [smem:[#allocation21_spill]] }
 0x617   : > { %p32_p3 = scmp.ge.s32.totalorder %s3377_s24, 4  }
 0x618   : > { %s3381_s22 = smov %s3378_s14 }
 0x619   :  { %34 = sbr.rel (!%p32_p3) target bundleno = 17 (0x11), region = 155 }
 0x61e   :  { %1860 = vsyncpa [#allocation3], 1 }
 0x61f   :  { %1862 = vsyncpa [#allocation3 + $0x1], 1 }
 0x620   :  { %1863 = vsyncpa [#allocation6], 1 }
 0x621   :  { %1864 = vsyncpa [#allocation9], 1 }
 0x622   :  { %1865 = vsyncpa [#allocation12], 1 }
 0x623   :  { %1866 = vsyncpa [#allocation4], 1 }
 0x624   :  { %1868 = vsyncpa [#allocation4 + $0x1], 1 }

// kernel: tpu_custom_call.1
= control target key start
LH: loop header
LB: loop body
LE: loop exit
PB: predicated region body
PF: predicated region fallthrough
CT: control target
= control target key end

     0   :  { %s3314_s0 = inlined_call_operand.hbm [shape: f32[4,4,128], index: 0, kind: input, shape index: {}]   ;;  %s3315_s1 = inlined_call_operand.vmem [shape: f32[4,16,1], index: 1, kind: input, shape index: {}]   ;;  %s3316_s2 = inlined_call_operand.vmem [shape: f32[4,16,1], index: 2, kind: input, shape index: {}]   ;;  %s3317_s3 = inlined_call_operand.vmem [shape: f32[128,128], index: 3, kind: input, shape index: {}]   ;;  %s3318_s4 = inlined_call_operand.vmem [shape: f32[1,128], index: 4, kind: input, shape index: {}]   ;;  %s3319_s5 = inlined_call_operand.vmem [shape: f32[1,128], index: 5, kind: input, shape index: {}]   ;;  %s3320_s6 = inlined_call_operand.hbm [shape: f32[128,128], index: 6, kind: input, shape index: {}]   ;;  %s3321_s7 = inlined_call_operand.vmem [shape: f32[1,128], index: 7, kind: input, shape index: {}]   ;;  %s3322_s8 = inlined_call_operand.hbm [shape: f32[128,128], index: 8, kind: input, shape index: {}]   ;;  %s3323_s9 = inlined_call_operand.vmem [shape: f32[1,128], index: 9, kind: input, shape index: {}]   ;;  %s3324_s10 = inlined_call_operand.hbm [shape: f32[128,128], index: 10, kind: input, shape index: {}]   ;;  %s3325_s11 = inlined_call_operand.vmem [shape: f32[1,128], index: 11, kind: input, shape index: {}]   ;;  %s3326_s12 = inlined_call_operand.hbm [shape: f32[128,128], index: 12, kind: input, shape index: {}]   ;;  %s3327_s13 = inlined_call_operand.vmem [shape: f32[1,128], index: 13, kind: input, shape index: {}]   ;;  %s3328_s14 = inlined_call_operand.hbm [shape: f32[128,128], index: 14, kind: input, shape index: {}]   ;;  %s3329_s15 = inlined_call_operand.vmem [shape: f32[1,128], index: 15, kind: input, shape index: {}]   ;;  %s3330_s16 = inlined_call_operand.hbm [shape: f32[16,128], index: 16, kind: output, shape index: {}]  }
   0x1   :  { %3340 = sst [smem:[#allocation22_spill]] %s3314_s0 }
   0x2   :  { %3341 = sst [smem:[#allocation23_spill]] %s3320_s6 }
   0x3   :  { %3342 = sst [smem:[#allocation24_spill]] %s3322_s8 }
   0x4   :  { %3343 = sst [smem:[#allocation25_spill]] %s3324_s10 }
   0x5   :  { %3344 = sst [smem:[#allocation26_spill]] %s3326_s12 }
   0x6   :  { %3345 = sst [smem:[#allocation27_spill]] %s3328_s14 }
   0x7   :  { %3346 = sst [smem:[#allocation28_spill]] %s3329_s15 }
   0x8   :  { %3347 = sst [smem:[#allocation29_spill]] %s3330_s16 }
   0x9   :  { %21 = vsyncpa [#allocation3], 0 }
   0xa   :  { %23 = vsyncpa [#allocation3 + $0x1], 0 }
   0xb   :  { %24 = vsyncpa [#allocation6], 0 }
   0xc   :  { %25 = vsyncpa [#allocation9], 0 }
   0xd   :  { %26 = vsyncpa [#allocation12], 0 }
   0xe   :  { %27 = vsyncpa [#allocation4], 0 }
   0xf   :  { %29 = vsyncpa [#allocation4 + $0x1], 0  ;;  %s2920_s21 = smov 0   ;;  %s2922_s22 = smov 0  }
  0x10   :  { %s2924_s23 = smov 0   ;;  %s2926_s24 = smov 0  }
  0x11 LB: > { %3348 = sst [smem:[#allocation19_spill]] %s2814_s23  ;;  %s2820_s25 = smov [#allocation5]   ;;  %s2818_s24 = sphi %s2926_s24, %s3377_s24   ;;  %s2814_s23 = sphi %s2924_s23, %s3379_s23   ;;  %s2810_s22 = sphi %s2922_s22, %s3381_s22   ;;  %s2806_s21 = sphi %s2920_s21, %s3380_s21  }
  0x12   : > { %s438_s26 = sshll.u32 %s2820_s25, 4  ;;  %s2941_s27 = sadd.s32 4294967295, %s2818_s24   ;;  %s439_s26 = int_to_ptr.vmem [resolvable:$true] %s438_s26 }
  0x13   : > { %p1985_p0 = scmp.ge.s32.totalorder %s2818_s24, 1  ;;  %p3333_p1 = scmp.eq.s32.totalorder %s2941_s27, 0 }
  0x14   : > { %p417_p2 = scmp.lt.s32.totalorder %s2818_s24, 3  ;;  %s2821_s29 = smov [#allocation8]  }
  0x15   : > { %s470_s30 = sshll.u32 %s2821_s29, 4  ;;  %s2822_s17 = smov [#allocation7]   ;;  %s2959_s30 = int_to_ptr.vmem [resolvable:$true] %s470_s30 }
  0x16   : > { %p2946_p3 = pnand %p1985_p0, %p417_p2  ;;  %s454_s18 = sshll.u32 %s2822_s17, 4  ;;  %s2961_s18 = int_to_ptr.vmem [resolvable:$true] %s454_s18 }
  0x17   : > { %s2595_s20 = scalar_lea.vmem %s439_s26, 2048  ;;  %p2603_p11 = scmp.lt.s32.totalorder %s439_s26, %s439_s26 }
  0x18   : > { %s3349_s28 = scalar_select %p2946_p3, 1, 0 }
  0x19   : > { %p2469_p5 = pneg %p2946_p3  ;;  %p2596_p8 = scmp.ne.s32.totalorder %s439_s26, %s2595_s20 }
  0x1a   : > { %p2604_p12 = scmp.lt.s32.totalorder %s2595_s20, %s2595_s20 }
  0x1b   : > { %p2955_p6 = pnand %p2469_p5, %p3333_p1 }
  0x1c   : > { %p2605_p13 = por %p2604_p12, %p2603_p11 }
  0x1d   : > { %p2965_p7 = pneg %p2955_p6 }
  0x1f   : > { %p2598_p9 = pnand %p2596_p8, %p2965_p7 }
  0x21   : > { %p2599_p10 = pneg %p2598_p9 }
  0x23   : > { %p2606_p0 = pnand %p2605_p13, %p2599_p10 }
  0x25   : > { %2609 = shalt.err (!%p2606_p0)
}
  0x26   : > { %s2823_s25 = smov 128   ;;  %s2824_s29 = smov 8  }
  0x27   : > { %s3352_s6 = sld [smem:[#allocation23_spill]]  ;;  %s2621_s15 = scalar_lea.vmem %s2959_s30, 2048 }
  0x28   : > { %p2622_p2 = scmp.ne.s32.totalorder %s2959_s30, %s2621_s15  ;;  %p2629_p9 = scmp.lt.s32.totalorder %s2959_s30, %s2959_s30 }
  0x29   : > { %p2630_p10 = scmp.lt.s32.totalorder %s2621_s15, %s2621_s15 }
  0x2a   : > { %p2624_p5 = pnand %p2622_p2, %p2965_p7 }
  0x2b   : > { %p2631_p11 = por %p2630_p10, %p2629_p9 }
  0x2c   : > { %p2625_p8 = pneg %p2624_p5 }
  0x2d   : > { %2472 = dma.hbm_to_vmem [thread:$0]  (!%p2955_p6), %s3352_s6, 2048, %s439_s26, [#allocation6], %s2823_s25, %s2823_s25, %s2824_s29  }
  0x2e   : > { %p2632_p12 = pnand %p2631_p11, %p2625_p8 }
  0x30   : > { %2635 = shalt.err (!%p2632_p12)
}
  0x31   : > { %s3353_s10 = sld [smem:[#allocation25_spill]]  ;;  %s2647_s26 = scalar_lea.vmem %s2961_s18, 2048 }
  0x32   : > { %p2648_p13 = scmp.ne.s32.totalorder %s2961_s18, %s2647_s26  ;;  %p2655_p5 = scmp.lt.s32.totalorder %s2961_s18, %s2961_s18 }
  0x33   : > { %p2656_p8 = scmp.lt.s32.totalorder %s2647_s26, %s2647_s26 }
  0x34   : > { %p2650_p0 = pnand %p2648_p13, %p2965_p7 }
  0x35   : > { %p2657_p9 = por %p2656_p8, %p2655_p5 }
  0x36   : > { %p2651_p2 = pneg %p2650_p0 }
  0x37   : > { %2478 = dma.hbm_to_vmem [thread:$0]  (!%p2955_p6), %s3353_s10, 2048, %s2959_s30, [#allocation9], %s2823_s25, %s2823_s25, %s2824_s29  }
  0x38   : > { %p2658_p10 = pnand %p2657_p9, %p2651_p2 }
  0x3a   : > { %2661 = shalt.err (!%p2658_p10)
}
  0x3b   : > { %s3354_s8 = sld [smem:[#allocation24_spill]]  ;;  %s2825_s30 = smov [#allocation10]  }
  0x3c   : > { %s486_s20 = sshll.u32 %s2825_s30, 4  ;;  %s2826_s16 = smov [#allocation11]   ;;  %s487_s20 = int_to_ptr.vmem [resolvable:$true] %s486_s20 }
  0x3d   : > { %s502_s6 = sshll.u32 %s2826_s16, 4  ;;  %s2673_s26 = scalar_lea.vmem %s487_s20, 2048  ;;  %s503_s6 = int_to_ptr.vmem [resolvable:$true] %s502_s6 }
  0x3e   : > { %p2674_p11 = scmp.ne.s32.totalorder %s487_s20, %s2673_s26  ;;  %p2681_p0 = scmp.lt.s32.totalorder %s487_s20, %s487_s20 }
  0x3f   : > { %p2682_p2 = scmp.lt.s32.totalorder %s2673_s26, %s2673_s26 }
  0x40   : > { %p2676_p12 = pnand %p2674_p11, %p2965_p7 }
  0x41   : > { %2475 = dma.hbm_to_vmem [thread:$0]  (!%p2955_p6), %s3354_s8, 2048, %s2961_s18, [#allocation6], %s2823_s25, %s2823_s25, %s2824_s29  }
  0x42   : > { %p2677_p13 = pneg %p2676_p12  ;;  %p2683_p5 = por %p2682_p2, %p2681_p0 }
  0x44   : > { %p2684_p8 = pnand %p2683_p5, %p2677_p13 }
  0x46   : > { %2687 = shalt.err (!%p2684_p8)
}
  0x47   : > { %s3355_s12 = sld [smem:[#allocation26_spill]]  ;;  %s2699_s17 = scalar_lea.vmem %s503_s6, 2048 }
  0x48   : > { %p2700_p9 = scmp.ne.s32.totalorder %s503_s6, %s2699_s17  ;;  %p2707_p12 = scmp.lt.s32.totalorder %s503_s6, %s503_s6 }
  0x49   : > { %p2708_p0 = scmp.lt.s32.totalorder %s2699_s17, %s2699_s17 }
  0x4a   : > { %p2702_p10 = pnand %p2700_p9, %p2965_p7 }
  0x4b   : > { %p2709_p13 = por %p2708_p0, %p2707_p12 }
  0x4c   : > { %p2703_p11 = pneg %p2702_p10 }
  0x4d   : > { %2481 = dma.hbm_to_vmem [thread:$0]  (!%p2955_p6), %s3355_s12, 2048, %s487_s20, [#allocation9], %s2823_s25, %s2823_s25, %s2824_s29  }
  0x4e   : > { %p2710_p2 = pnand %p2709_p13, %p2703_p11 }
  0x50   : > { %2713 = shalt.err (!%p2710_p2)
}
  0x51   : > { %s3356_s14 = sld [smem:[#allocation27_spill]]  ;;  %s1984_s0 = sadd.s32 4294967294, %s2818_s24  }
  0x52   : > { %s3031_s19 = sadd.s32 1, %s2818_s24   ;;  %s42_s20 = sadd.s32 1, %s2814_s23 }
  0x53   : > { %3357 = sst [smem:[#allocation20_spill]] %s3031_s19  ;;  %s39_s26 = ssub.s32 %s2818_s24, %s3031_s19 }
  0x54   : > { %p49_p7 = scmp.ne.s32.totalorder %s2814_s23, %s2810_s22  ;;  %p40_p5 = scmp.eq.s32.totalorder %s39_s26, 0 }
  0x55   : > { %p50_p8 = scmp.eq.s32.totalorder %s2818_s24, 0  ;;  %p55_p9 = scmp.ne.s32.totalorder %s2810_s22, %s2806_s21 }
  0x56   : > { %p404_p10 = scmp.eq.s32.totalorder %s2941_s27, 1  ;;  %p410_p0 = scmp.eq.s32.totalorder %s1984_s0, 1 }
  0x57   : > { %2484 = dma.hbm_to_vmem [thread:$0]  (!%p2955_p6), %s3356_s14, 2048, %s503_s6, [#allocation12], %s2823_s25, %s2823_s25, %s2824_s29  }
  0x58   : > { %s3043_s18 = scalar_select %p40_p5, %s2814_s23, %s42_s20  }
  0x59   : > { %p51_p11 = por %p50_p8, %p49_p7  ;;  %p3047_p12 = por %p3333_p1, %p55_p9 }
  0x5a   : > { %3358 = sst [smem:[#allocation21_spill]] %s3043_s18  ;;  %p3051_p6 = por %p404_p10, %p49_p7 }
  0x5b   : > { %s3359_s15 = scalar_select %p3047_p12, 1, 0 }
  0x5c   : > { %s3360_s6 = scalar_select %p3051_p6, 1, 0 }
  0x5d   : > { %p2498_p13 = scmp.lt.s32.totalorder %s2818_s24, 2  ;;  %s519_s25 = sand.u32 1, %s2814_s23  }
  0x5e   : > { %p3057_p2 = por %p410_p0, %p55_p9  ;;  %s1992_s17 = sshll.u32 %s519_s25, 3 }
  0x5f   : > { %s2022_s30 = sshll.u32 %s2818_s24, 7  ;;  %s3362_s26 = sld [smem:[#allocation22_spill]] }
  0x60   : > { %s3361_s29 = scalar_select %p3057_p2, 1, 0 }
  0x61   : > { %s523_s10 = scalar_lea.vmem [#allocation2], %s1992_s17  ;;  %p3067_p7 = pnand %p2498_p13, %p51_p11 }
  0x62   : > { %s530_s12 = sshll.u32 %s523_s10, 4  ;;  %s3073_s14 = scalar_lea.sflag [#allocation3], %s519_s25  ;;  %s3071_s12 = int_to_ptr.vmem [resolvable:$true] %s530_s12 }
  0x63   : > { %p2716_p8 = pneg %p3067_p7 }
  0x65   : > { %s3065_s8 = scalar_lea.hbm %s3362_s26, %s2022_s30  ;;  %s2719_s17 = scalar_lea.hbm %s3362_s26, 256 }
  0x66   : > { %s2714_s18 = scalar_lea.hbm %s3065_s8, 128  ;;  %p2720_p11 = scmp.lt.s32.totalorder %s3065_s8, %s3362_s26 }
  0x67   : > { %p2715_p5 = scmp.ne.s32.totalorder %s3065_s8, %s2714_s18  ;;  %p2721_p0 = scmp.lt.s32.totalorder %s2719_s17, %s2714_s18 }
  0x69   : > { %p2717_p9 = pnand %p2716_p8, %p2715_p5  ;;  %p2722_p13 = por %p2721_p0, %p2720_p11 }
  0x6b   : > { %p2718_p10 = pneg %p2717_p9 }
  0x6d   : > { %p2723_p4 = pnand %p2722_p13, %p2718_p10 }
  0x6f   : > { %2726 = shalt.err (!%p2723_p4)
}
  0x70   : > { %s2727_s25 = scalar_lea.vmem %s3071_s12, 128  ;;  %s2827_s23 = smov [#allocation2]  }
  0x71   : > { %p2728_p1 = scmp.ne.s32.totalorder %s3071_s12, %s2727_s25  ;;  %s2732_s19 = sshll.u32 %s2827_s23, 4  ;;  %s2733_s19 = int_to_ptr.vmem [resolvable:$false] %s2732_s19 }
  0x72   : > { %s2734_s30 = scalar_lea.vmem %s2733_s19, 256  ;;  %p2735_p9 = scmp.lt.s32.totalorder %s3071_s12, %s2733_s19 }
  0x73   : > { %p2730_p2 = pnand %p2728_p1, %p2716_p8  ;;  %p2736_p6 = scmp.lt.s32.totalorder %s2734_s30, %s2727_s25 }
  0x75   : > { %p2731_p5 = pneg %p2730_p2  ;;  %p2737_p12 = por %p2736_p6, %p2735_p9 }
  0x77   : > { %p2738_p3 = pnand %p2737_p12, %p2731_p5 }
  0x79   : > { %2741 = shalt.err (!%p2738_p3)
}
  0x7a   : > { %s2828_s18 = smov 64   ;;  %s2829_s16 = smov 4  }
  0x7b   : > { %2488 = dma.hbm_to_vmem [thread:$0]  (!%p3067_p7), %s3065_s8, 128, %s3071_s12, %s3073_s14, %s2828_s18, %s2828_s18, %s2829_s16  }
  0x7c   : > { %p3364_p1 = scmp.ne.s32.totalorder %s3349_s28, 0 }
  0x7d   : > { %s3097_s23 = sand.u32 (!%p3364_p1), 1, %s2810_s22   ;;  %p3365_p3 = scmp.ne.s32.totalorder (!%p3364_p1), %s3359_s15, 0 }
  0x7e   : > { %562 = sbr.rel (%p3364_p1) target bundleno = 1545 (0x609), region = 84  ;;  %s1996_s19 = sshll.u32 (!%p3364_p1), %s3097_s23, 3 }
  0x7f   : > { %s565_s17 = scalar_lea.sflag (!%p3364_p1), [#allocation3], %s3097_s23  ;;  %s3103_s10 = scalar_lea.vmem (!%p3364_p1), [#allocation2], %s1996_s19 }
  0x83   : > { %2785 = dma.done.wait (%p3365_p3), %s565_s17, 128  }
  0x84   : > { %2787 = vsyncadd (%p3365_p3), %s565_s17, 4294967168  ;;  %p3366_p4 = scmp.eq.s32.totalorder %s2941_s27, 0 }
  0x86   : > { %2789 = dma.done.wait (%p3366_p4), [#allocation6], 4096   ;;  %p3367_p12 = pmov %p3366_p4 }
  0x87   : > { %p3368_p6 = pmov %p3366_p4 }
  0x88   : > { %2791 = vsyncadd (%p3367_p12), [#allocation6], 4294963200 }
  0x89   : > { %2793 = dma.done.wait (%p3368_p6), [#allocation9], 4096   ;;  %p3369_p2 = pmov %p3366_p4 }
  0x8b   : > { %2795 = vsyncadd (%p3369_p2), [#allocation9], 4294963200  ;;  %p3370_p7 = pmov %p3369_p2 }
  0x8c   : > { %p3371_p8 = pmov %p3369_p2 }
  0x8d   : > { %2797 = dma.done.wait (%p3370_p7), [#allocation12], 2048  }
  0x8e   : > { %2799 = vsyncadd (%p3371_p8), [#allocation12], 4294965248  ;;  %s2003_s8 = sshll.u32 %s2941_s27, 1  ;;  %v2830_v0 = vmov 0   ;;  %v879_v5 = vld [vmem:[%s3317_s3 + $0x78] sm:$0xff]  ;;  %v878_v6 = vld [vmem:[%s3317_s3 + $0x70] sm:$0xff]  ;;  %v687_v39 = vlaneseq }
  0x8f   : > { %2550 = vset.pattern.permute.xlu0 %v2830_v0  ;;  %p651_p10 = scmp.lt.s32.totalorder %s2003_s8, 3  ;;  %2551 = vset.pattern.permute.xlu1 %v2830_v0  ;;  %v877_v7 = vld [vmem:[%s3317_s3 + $0x68] sm:$0xff]  ;;  %v876_v10 = vld [vmem:[%s3317_s3 + $0x60] sm:$0xff]  ;;  %v875_v13 = vld [vmem:[%s3317_s3 + $0x58] sm:$0xff]  ;;  %v2831_v37 = vmov 1966171168  }
  0x90   : > { %2172 = vmatprep.subr.mxu0 %v879_v5  ;;  %v874_v14 = vld [vmem:[%s3317_s3 + $0x50] sm:$0xff]  ;;  %v873_v15 = vld [vmem:[%s3317_s3 + $0x48] sm:$0xff]  ;;  %v872_v16 = vld [vmem:[%s3317_s3 + $0x40] sm:$0xff]  ;;  %v685_v38 = vunpack.c.l.s4 %v2831_v37  ;;  %v688_v41 = vshrl.u32 %v687_v39, 7  ;;  %vm2833_vm0 = vmmov 0   ;;  %vm1554_vm1 = vcmask 1041409  }
  0x91   : > { %s3383_s8 = smov (!%p651_p10, %s2003_s8), 3  ;;  %2173 = vmatpush3.msra.mxu0 %v879_v5  ;;  %v871_v17 = vld [vmem:[%s3317_s3 + $0x38] sm:$0xff]  ;;  %v870_v18 = vld [vmem:[%s3317_s3 + $0x30] sm:$0xff]  ;;  %v869_v19 = vld [vmem:[%s3317_s3 + $0x28] sm:$0xff]  ;;  %vm1556_vm2 = vcmask 1042434   ;;  %vm1558_vm3 = vcmask 1043459  }
  0x92   : > { %s2023_s12 = sshll.u32 %s3383_s8, 4  ;;  %2174 = vmatprep.subr.mxu0 %v878_v6  ;;  %v868_v20 = vld [vmem:[%s3317_s3 + $0x20] sm:$0xff]  ;;  %v867_v21 = vld [vmem:[%s3317_s3 + $0x18] sm:$0xff]  ;;  %v866_v22 = vld [vmem:[%s3317_s3 + $0x10] sm:$0xff]  ;;  %v686_v40 = vunpack.c.0.s8 %v685_v38  ;;  %v746_v46 = vsub.s32 0, %v688_v41  ;;  %vm1560_vm4 = vcmask 1044484  }
  0x93   : > { %s655_s15 = scalar_lea.vmem %s3315_s1, %s2023_s12  ;;  %s662_s18 = scalar_lea.vmem %s3316_s2, %s2023_s12  ;;  %2175 = vmatpush3.msra.mxu0 %v878_v6  ;;  %v865_v23 = vld [vmem:[%s3317_s3 + $0x8] sm:$0xff]  ;;  %v864_v24 = vld [vmem:[%s3317_s3] sm:$0xff]  ;;  %v1112_v27 = vld [vmem:[#allocation5 + $0x68] sm:$0xff]  ;;  %vm1562_vm5 = vcmask 1045509   ;;  %vm1564_vm6 = vcmask 1046534   ;;  %vm1566_vm7 = vcmask 1047559  }
  0x94   : > { %v666_v1 = vld [vmem:[%s655_s15] sm:$0xff]  ;;  %v668_v2 = vld [vmem:[%s655_s15 + $0x10] sm:$0xff]  ;;  %v667_v3 = vld [vmem:[%s655_s15 + $0x8] sm:$0xff]  ;;  %2176 = vmatprep.subr.mxu0 %v877_v7  ;;  %v689_v43 = vsub.s32 %v686_v40, %v688_v41  ;;  %s3372_s12 = sld [smem:[#allocation28_spill]]  ;;  %s2019_s0 = sshll.u32 %s2941_s27, 7 }
  0x95   : > { %726 = vperm.xlu0 %2550, %v666_v1   ;;  %736 = vperm.xlu1 %2551, %v668_v2   ;;  %v669_v4 = vld [vmem:[%s655_s15 + $0x18] sm:$0xff]  ;;  %v670_v8 = vld [vmem:[%s662_s18] sm:$0xff]  ;;  %v671_v9 = vld [vmem:[%s662_s18 + $0x8] sm:$0xff]  ;;  %s648_s20 = scalar_lea.vmem [#allocation13], %s1996_s19  ;;  %s1829_s8 = scalar_lea.sflag [#allocation4], %s3097_s23 }
  0x96   : > { %v672_v11 = vld [vmem:[%s662_s18 + $0x10] sm:$0xff]  ;;  %v673_v12 = vld [vmem:[%s662_s18 + $0x18] sm:$0xff]  ;;  %2177 = vmatpush3.msra.mxu0 %v877_v7  ;;  %v1114_v25 = vld [vmem:[#allocation5 + $0x78] sm:$0xff]  ;;  %s1842_s25 = sshll.u32 %s648_s20, 4  ;;  %s3373_s18 = sld [smem:[#allocation29_spill]]  ;;  %s1843_s25 = int_to_ptr.vmem [resolvable:$true] %s1842_s25 }
  0x97   : > { %2178 = vmatprep.subr.mxu0 %v876_v10  ;;  %v1113_v26 = vld [vmem:[#allocation5 + $0x70] sm:$0xff]  ;;  %2228 = vmatprep.subr.mxu1 %v1114_v25  ;;  %v1111_v28 = vld [vmem:[#allocation5 + $0x60] sm:$0xff]  ;;  %v1110_v29 = vld [vmem:[#allocation5 + $0x58] sm:$0xff]  ;;  %s2742_s14 = scalar_lea.vmem %s1843_s25, 128  ;;  %p3374_p0 = scmp.ne.s32.totalorder %s3360_s6, 0 }
  0x98   : > { %2179 = vmatpush3.msra.mxu0 %v876_v10  ;;  %2229 = vmatpush3.msra.mxu1 %v1114_v25  ;;  %v1109_v30 = vld [vmem:[#allocation5 + $0x50] sm:$0xff]  ;;  %v1108_v31 = vld [vmem:[#allocation5 + $0x48] sm:$0xff]  ;;  %v1107_v32 = vld [vmem:[#allocation5 + $0x40] sm:$0xff]  ;;  %p2743_p11 = scmp.ne.s32.totalorder %s1843_s25, %s2742_s14  ;;  %s2834_s27 = smov [#allocation13]  }
  0x99   : > { %731 = vperm.xlu0 %2550, %v667_v3   ;;  %741 = vperm.xlu1 %2551, %v669_v4   ;;  %v1106_v33 = vld [vmem:[#allocation5 + $0x38] sm:$0xff]  ;;  %v1105_v34 = vld [vmem:[#allocation5 + $0x30] sm:$0xff]  ;;  %v1104_v35 = vld [vmem:[#allocation5 + $0x28] sm:$0xff]  ;;  %s2746_s28 = sshll.u32 %s2834_s27, 4  ;;  %s2747_s28 = int_to_ptr.vmem [resolvable:$false] %s2746_s28 }
  0x9a   : > { %2180 = vmatprep.subr.mxu0 %v875_v13  ;;  %2230 = vmatprep.subr.mxu1 %v1113_v26  ;;  %v1103_v36 = vld [vmem:[#allocation5 + $0x20] sm:$0xff]  ;;  %v2009_v42 = vld.sshfl [vmem:[%s3103_s10] sm:$0x33 pattern:$0x75316420]  ;;  %p2744_p13 = pnand %p2743_p11, %p3374_p0  ;;  %s2748_s19 = scalar_lea.vmem %s2747_s28, 256 }
  0x9b   : > { %2181 = vmatpush3.msra.mxu0 %v875_v13  ;;  %2231 = vmatpush3.msra.mxu1 %v1113_v26  ;;  %v683_v45 = vcombine.high %v2009_v42, %v2009_v42  ;;  %v690_v47 = vrot.slane %v2009_v42, %v689_v43  ;;  %v2010_v59 = vld.sshfl [vmem:[%s3103_s10 + $0x4] sm:$0x33 pattern:$0x75316420]  ;;  %p2749_p9 = scmp.lt.s32.totalorder %s1843_s25, %s2747_s28  ;;  %p2750_p1 = scmp.lt.s32.totalorder %s2748_s19, %s2742_s14 }
  0x9c   : > { %2182 = vmatprep.subr.mxu0 %v874_v14  ;;  %2232 = vmatprep.subr.mxu1 %v1112_v27  ;;  %v714_v63 = vrot.slane %v2010_v59, %v689_v43  ;;  %v707_v2 = vcombine.high %v2010_v59, %v2010_v59  ;;  %s3277_s17 = scalar_lea.hbm %s3373_s18, %s2019_s0  ;;  %p2745_p5 = pneg %p2744_p13 }
  0x9d   : > { %1028 = vperm.xlu0 %2550, %v670_v8   ;;  %1033 = vperm.xlu1 %2551, %v671_v9   ;;  %v697_v48 = vrot.slane %v683_v45, %v689_v43  ;;  %v747_v50 = vrot.slane %v690_v47, %v746_v46  ;;  %v698_v51 = vcombine.high %v690_v47, %v690_v47  ;;  %p2751_p3 = por %p2750_p1, %p2749_p9 }
  0x9e   : > { %2183 = vmatpush3.msra.mxu0 %v874_v14  ;;  %2233 = vmatpush3.msra.mxu1 %v1112_v27  ;;  %v763_v3 = vrot.slane %v714_v63, %v746_v46  ;;  %v722_v13 = vcombine.high %v714_v63, %v714_v63 }
  0x9f   : > { %2184 = vmatprep.subr.mxu0 %v873_v15  ;;  %2234 = vmatprep.subr.mxu1 %v1111_v28  ;;  %v751_v52 = vrot.slane %v697_v48, %v746_v46  ;;  %v699_v54 = vcombine.high %v697_v48, %v697_v48  ;;  %v755_v55 = vrot.slane %v698_v51, %v746_v46  ;;  %p2752_p4 = pnand %p2751_p3, %p2745_p5 }
  0xa0   : > { %2185 = vmatpush3.msra.mxu0 %v873_v15  ;;  %2235 = vmatpush3.msra.mxu1 %v1111_v28  ;;  %v771_v25 = vrot.slane %v722_v13, %v746_v46 }
  0xa1   : > { %1038 = vperm.xlu0 %2550, %v672_v11   ;;  %1043 = vperm.xlu1 %2551, %v673_v12   ;;  %v759_v58 = vrot.slane %v699_v54, %v746_v46  ;;  %v721_v12 = vrot.slane %v707_v2, %v689_v43 }
  0xa2   : > { %2186 = vmatprep.subr.mxu0 %v872_v16  ;;  %2236 = vmatprep.subr.mxu1 %v1110_v29 }
  0xa3   : > { %2187 = vmatpush3.msra.mxu0 %v872_v16  ;;  %2237 = vmatpush3.msra.mxu1 %v1110_v29 }
  0xa4   : > { %2188 = vmatprep.subr.mxu0 %v871_v17  ;;  %2238 = vmatprep.subr.mxu1 %v1109_v30 }
  0xa5   : > { %2189 = vmatpush3.msra.mxu0 %v871_v17  ;;  %2239 = vmatpush3.msra.mxu1 %v1109_v30 }
  0xa6   : > { %2190 = vmatprep.subr.mxu0 %v870_v18  ;;  %2240 = vmatprep.subr.mxu1 %v1108_v31 }
  0xa7   : > { %2191 = vmatpush3.msra.mxu0 %v870_v18  ;;  %2241 = vmatpush3.msra.mxu1 %v1108_v31 }
  0xa8   : > { %2192 = vmatprep.subr.mxu0 %v869_v19  ;;  %2242 = vmatprep.subr.mxu1 %v1107_v32 }
  0xa9   : > { %2193 = vmatpush3.msra.mxu0 %v869_v19  ;;  %2243 = vmatpush3.msra.mxu1 %v1107_v32 }
  0xaa   : > { %2194 = vmatprep.subr.mxu0 %v868_v20  ;;  %2244 = vmatprep.subr.mxu1 %v1106_v33 }
  0xab   : > { %2195 = vmatpush3.msra.mxu0 %v868_v20  ;;  %2245 = vmatpush3.msra.mxu1 %v1106_v33 }
  0xac   : > { %2196 = vmatprep.subr.mxu0 %v867_v21  ;;  %2246 = vmatprep.subr.mxu1 %v1105_v34 }
  0xad   : > { %2197 = vmatpush3.msra.mxu0 %v867_v21  ;;  %2247 = vmatpush3.msra.mxu1 %v1105_v34 }
  0xae   : > { %2198 = vmatprep.subr.mxu0 %v866_v22  ;;  %2248 = vmatprep.subr.mxu1 %v1104_v35 }
  0xaf   : > { %2199 = vmatpush3.msra.mxu0 %v866_v22  ;;  %2249 = vmatpush3.msra.mxu1 %v1104_v35  ;;  %v767_v22 = vrot.slane %v721_v12, %v746_v46 }
  0xb0   : > { %2200 = vmatprep.subr.mxu0 %v865_v23  ;;  %2250 = vmatprep.subr.mxu1 %v1103_v36 }
  0xb1   : > { %2201 = vmatpush3.msra.mxu0 %v865_v23  ;;  %2251 = vmatpush3.msra.mxu1 %v1103_v36 }
  0xb2   : > { %2202 = vmatprep.subr.mxu0 %v864_v24 }
  0xb3   : > { %2203 = vmatpush3.msra.mxu0 %v864_v24  ;;  %v723_v24 = vcombine.high %v721_v12, %v721_v12 }
  0xb5   : > { %v775_v35 = vrot.slane %v723_v24, %v746_v46  ;;  %v1298_v24 = vld [vmem:[#allocation7 + $0x78] sm:$0xff] }
  0xb6   : > { %2284 = vmatprep.subr.mxu0 %v1298_v24 }
 0x110   : > { %v727_v44 = vpop.permute.xlu0 %726  ;;  %v737_v9 = vpop.permute.xlu1 %736 }
 0x111   : > { %v786_v56 = vsub.f32 %v727_v44, %v751_v52  ;;  %v788_v61 = vsub.f32 %v727_v44, %v755_v55  ;;  %v784_v0 = vsub.f32 %v727_v44, %v747_v50  ;;  %v790_v4 = vsub.f32 %v727_v44, %v759_v58 }
 0x112   : > { %v792_v14 = vsub.f32 %v737_v9, %v763_v3  ;;  %v794_v34 = vsub.f32 %v737_v9, %v767_v22  ;;  %v796_v42 = vsub.f32 %v737_v9, %v771_v25 }
 0x113   : > { %v802_v62 = vand.u32 2147483647, %v786_v56  ;;  %v804_v7 = vand.u32 2147483647, %v788_v61  ;;  %v800_v10 = vand.u32 2147483647, %v784_v0 }
 0x114   : > { %v732_v49 = vpop.permute.xlu0 %731  ;;  %v806_v16 = vand.u32 2147483647, %v790_v4  ;;  %v808_v26 = vand.u32 2147483647, %v792_v14  ;;  %v742_v27 = vpop.permute.xlu1 %741  ;;  %v810_v43 = vand.u32 2147483647, %v794_v34 }
 0x115   : > { %v785_v53 = vsub.f32 %v732_v49, %v747_v50  ;;  %v787_v60 = vsub.f32 %v732_v49, %v751_v52  ;;  %v789_v5 = vsub.f32 %v732_v49, %v755_v55  ;;  %v818_v8 = vsub.f32 0.0, %v802_v62  ;;  %v1288_v34 = vld [vmem:[#allocation7 + $0x28] sm:$0xff] }
 0x116   : > { %v816_v15 = vsub.f32 0.0, %v800_v10  ;;  %v791_v17 = vsub.f32 %v732_v49, %v759_v58  ;;  %v820_v20 = vsub.f32 0.0, %v804_v7  ;;  %v793_v31 = vsub.f32 %v742_v27, %v763_v3 }
 0x117   : > { %v801_v57 = vand.u32 2147483647, %v785_v53  ;;  %v803_v6 = vand.u32 2147483647, %v787_v60  ;;  %v805_v18 = vand.u32 2147483647, %v789_v5  ;;  %v795_v37 = vsub.f32 %v742_v27, %v767_v22 }
 0x118   : > { %v836_v21 = vmul.f32 1.442695, %v818_v8  ;;  %v832_v23 = vmul.f32 1.442695, %v816_v15  ;;  %v807_v28 = vand.u32 2147483647, %v791_v17  ;;  %v797_v45 = vsub.f32 %v742_v27, %v771_v25 }
 0x119   : > { %v817_v1 = vsub.f32 0.0, %v801_v57  ;;  %v819_v19 = vsub.f32 0.0, %v803_v6  ;;  %v821_v29 = vsub.f32 0.0, %v805_v18  ;;  %v822_v32 = vsub.f32 0.0, %v806_v16  ;;  %v1100_v22 = vld [vmem:[#allocation5 + $0x8] sm:$0xff]  ;;  %v1297_v25 = vld [vmem:[#allocation7 + $0x70] sm:$0xff] }
 0x11a   : > { %v840_v33 = vmul.f32 1.442695, %v820_v20  ;;  %v824_v36 = vsub.f32 0.0, %v808_v26  ;;  %v823_v38 = vsub.f32 0.0, %v807_v28  ;;  %v809_v40 = vand.u32 2147483647, %v793_v31 }
 0x11b   : > { %v834_v11 = vmul.f32 1.442695, %v817_v1  ;;  %v838_v30 = vmul.f32 1.442695, %v819_v19  ;;  %v842_v39 = vmul.f32 1.442695, %v821_v29  ;;  %v798_v50 = vsub.f32 %v737_v9, %v775_v35 }
 0x11c   : > { %v844_v41 = vmul.f32 1.442695, %v822_v32  ;;  %v848_v44 = vmul.f32 1.442695, %v824_v36  ;;  %v846_v47 = vmul.f32 1.442695, %v823_v38  ;;  %v799_v53 = vsub.f32 %v742_v27, %v775_v35  ;;  %v1029_v38 = vpop.permute.xlu0 %1028 }
 0x11d   : > { %2552 = vpow2.f32 %v834_v11  ;;  %v811_v48 = vand.u32 2147483647, %v795_v37  ;;  %v825_v49 = vsub.f32 0.0, %v809_v40  ;;  %v812_v51 = vand.u32 2147483647, %v796_v42  ;;  %v1102_v20 = vld [vmem:[#allocation5 + $0x18] sm:$0xff] }
 0x11e   : > { %2554 = vpow2.f32 %v832_v23  ;;  %v826_v46 = vsub.f32 0.0, %v810_v43  ;;  %v813_v55 = vand.u32 2147483647, %v797_v45  ;;  %v814_v58 = vand.u32 2147483647, %v798_v50  ;;  %2252 = vmatprep.subr.mxu1 %v1102_v20  ;;  %v1099_v23 = vld [vmem:[#allocation5] sm:$0xff] }
 0x11f   : > { %2556 = vpow2.f32 %v836_v21  ;;  %v827_v56 = vsub.f32 0.0, %v811_v48  ;;  %v850_v57 = vmul.f32 1.442695, %v825_v49  ;;  %v828_v59 = vsub.f32 0.0, %v812_v51  ;;  %v1101_v21 = vld [vmem:[#allocation5 + $0x10] sm:$0xff]  ;;  %2253 = vmatpush3.msra.mxu1 %v1102_v20  ;;  %v1296_v26 = vld [vmem:[#allocation7 + $0x68] sm:$0xff] }
 0x120   : > { %2558 = vpow2.f32 %v838_v30  ;;  %v852_v60 = vmul.f32 1.442695, %v826_v46  ;;  %v815_v62 = vand.u32 2147483647, %v799_v53  ;;  %v829_v63 = vsub.f32 0.0, %v813_v55  ;;  %2254 = vmatprep.subr.mxu1 %v1101_v21  ;;  %v1295_v27 = vld [vmem:[#allocation7 + $0x60] sm:$0xff] }
 0x121   : > { %2560 = vpow2.f32 %v840_v33  ;;  %v854_v0 = vmul.f32 1.442695, %v827_v56  ;;  %v830_v2 = vsub.f32 0.0, %v814_v58  ;;  %v856_v3 = vmul.f32 1.442695, %v828_v59  ;;  %2255 = vmatpush3.msra.mxu1 %v1101_v21  ;;  %v1294_v28 = vld [vmem:[#allocation7 + $0x58] sm:$0xff]  ;;  %v1039_v58 = vpop.permute.xlu0 %1038 }
 0x122   : > { %2562 = vpow2.f32 %v842_v39  ;;  %v831_v5 = vsub.f32 0.0, %v815_v62  ;;  %v858_v6 = vmul.f32 1.442695, %v829_v63  ;;  %2256 = vmatprep.subr.mxu1 %v1100_v22  ;;  %v1293_v29 = vld [vmem:[#allocation7 + $0x50] sm:$0xff]  ;;  %v1292_v30 = vld [vmem:[#allocation7 + $0x48] sm:$0xff]  ;;  %v1291_v31 = vld [vmem:[#allocation7 + $0x40] sm:$0xff]  ;;  %v1034_v39 = vpop.permute.xlu1 %1033 }
 0x123   : > { %2564 = vpow2.f32 %v844_v41  ;;  %v860_v8 = vmul.f32 1.442695, %v830_v2  ;;  %2257 = vmatpush3.msra.mxu1 %v1100_v22  ;;  %v1290_v32 = vld [vmem:[#allocation7 + $0x38] sm:$0xff]  ;;  %v1289_v33 = vld [vmem:[#allocation7 + $0x30] sm:$0xff]  ;;  %v1287_v35 = vld [vmem:[#allocation7 + $0x20] sm:$0xff] }
 0x124   : > { %2566 = vpow2.f32 %v848_v44  ;;  %v862_v11 = vmul.f32 1.442695, %v831_v5  ;;  %2258 = vmatprep.subr.mxu1 %v1099_v23  ;;  %v1286_v36 = vld [vmem:[#allocation7 + $0x18] sm:$0xff]  ;;  %v2011_v37 = vld [vmem:[%s3318_s4] ss:$0 sm:$0xff] }
 0x125   : > { %2568 = vpow2.f32 %v846_v47  ;;  %2259 = vmatpush3.msra.mxu1 %v1099_v23  ;;  %v1053_v40 = vmul.f32 %v2011_v37, %v1034_v39  ;;  %v1052_v41 = vmul.f32 %v2011_v37, %v1029_v38  ;;  %v2012_v42 = vld [vmem:[%s3319_s5] ss:$0 sm:$0xff] }
 0x126   : > { %2570 = vpow2.f32 %v850_v57  ;;  %v1044_v56 = vpop.permute.xlu1 %1043  ;;  %v2013_v38 = vld [vmem:[%s3321_s7] ss:$0 sm:$0xff] }
 0x127   : > { %2572 = vpow2.f32 %v852_v60  ;;  %v1064_v43 = vadd.f32 %v2012_v42, %v1053_v40  ;;  %v1063_v45 = vadd.f32 %v2012_v42, %v1052_v41  ;;  %v1055_v63 = vmul.f32 %v2011_v37, %v1044_v56 }
 0x128   : > { %2574 = vpow2.f32 %v854_v0 }
 0x129   : > { %2576 = vpow2.f32 %v856_v3 }
 0x12a   : > { %v2553_v52 = vpop.eup %2552  ;;  %2578 = vpow2.f32 %v858_v6 }
 0x12b   : > { %v2555_v54 = vpop.eup %2554  ;;  %2580 = vpow2.f32 %v860_v8 }
 0x12c   : > { %2204 = vmatprep.mubr.f32.mxu0 %v2555_v54  ;;  %v2557_v61 = vpop.eup %2556  ;;  %2582 = vpow2.f32 %v862_v11 }
 0x12d   : > { %2205 = vmatmul.mubr.f32.vlgmr.msra.gmra.mxu0 %v2553_v52  ;;  %v2559_v1 = vpop.eup %2558 }
 0x12e   : > { %2207 = vmatprep.mubr.f32.mxu0 %v2557_v61  ;;  %v2561_v4 = vpop.eup %2560  ;;  %2285 = vmatpush3.msra.mxu0 %v1298_v24 }
 0x12f   : > { %v2563_v7 = vpop.eup %2562  ;;  %2286 = vmatprep.subr.mxu0 %v1297_v25 }
 0x130   : > { %v2565_v9 = vpop.eup %2564  ;;  %2287 = vmatpush3.msra.mxu0 %v1297_v25 }
 0x131   : > { %2208 = vmatmul.mubr.f32.gmra.mxu0 %v2559_v1  ;;  %v2567_v10 = vpop.eup %2566  ;;  %2288 = vmatprep.subr.mxu0 %v1296_v26  ;;  %v1054_v1 = vmul.f32 %v2011_v37, %v1039_v58  ;;  %v1283_v37 = vld [vmem:[#allocation7] sm:$0xff] }
 0x132   : > { %2210 = vmatprep.mubr.f32.mxu0 %v2561_v4  ;;  %v2569_v12 = vpop.eup %2568  ;;  %2289 = vmatpush3.msra.mxu0 %v1296_v26 }
 0x133   : > { %v2571_v13 = vpop.eup %2570  ;;  %2290 = vmatprep.subr.mxu0 %v1295_v27 }
 0x134   : > { %v2573_v14 = vpop.eup %2572  ;;  %2291 = vmatpush3.msra.mxu0 %v1295_v27 }
 0x135   : > { %2211 = vmatmul.mubr.f32.gmra.mxu0 %v2563_v7  ;;  %v2575_v15 = vpop.eup %2574  ;;  %2292 = vmatprep.subr.mxu0 %v1294_v28  ;;  %v1066_v7 = vadd.f32 %v2012_v42, %v1055_v63 }
 0x136   : > { %2213 = vmatprep.mubr.f32.mxu0 %v2565_v9  ;;  %v2577_v16 = vpop.eup %2576  ;;  %2293 = vmatpush3.msra.mxu0 %v1294_v28  ;;  %v1065_v9 = vadd.f32 %v2012_v42, %v1054_v1 }
 0x137   : > { %v2579_v17 = vpop.eup %2578  ;;  %2294 = vmatprep.subr.mxu0 %v1293_v29 }
 0x138   : > { %v2581_v18 = vpop.eup %2580  ;;  %2295 = vmatpush3.msra.mxu0 %v1293_v29 }
 0x139   : > { %2214 = vmatmul.mubr.f32.gmra.mxu0 %v2569_v12  ;;  %v2583_v19 = vpop.eup %2582  ;;  %2296 = vmatprep.subr.mxu0 %v1292_v30 }
 0x13a   : > { %2216 = vmatprep.mubr.f32.mxu0 %v2567_v10  ;;  %2297 = vmatpush3.msra.mxu0 %v1292_v30 }
 0x13b   : > { %2298 = vmatprep.subr.mxu0 %v1291_v31 }
 0x13c   : > { %2299 = vmatpush3.msra.mxu0 %v1291_v31 }
 0x13d   : > { %2217 = vmatmul.mubr.f32.gmra.mxu0 %v2571_v13  ;;  %2300 = vmatprep.subr.mxu0 %v1290_v32 }
 0x13e   : > { %2219 = vmatprep.mubr.f32.mxu0 %v2573_v14  ;;  %2301 = vmatpush3.msra.mxu0 %v1290_v32 }
 0x13f   : > { %2302 = vmatprep.subr.mxu0 %v1289_v33 }
 0x140   : > { %2303 = vmatpush3.msra.mxu0 %v1289_v33 }
 0x141   : > { %2220 = vmatmul.mubr.f32.gmra.mxu0 %v2575_v15  ;;  %2304 = vmatprep.subr.mxu0 %v1288_v34 }
 0x142   : > { %2222 = vmatprep.mubr.f32.mxu0 %v2577_v16  ;;  %2305 = vmatpush3.msra.mxu0 %v1288_v34 }
 0x143   : > { %2306 = vmatprep.subr.mxu0 %v1287_v35 }
 0x144   : > { %2307 = vmatpush3.msra.mxu0 %v1287_v35  ;;  %v1285_v35 = vld [vmem:[#allocation7 + $0x10] sm:$0xff] }
 0x145   : > { %2223 = vmatmul.mubr.f32.gmra.mxu0 %v2579_v17  ;;  %2308 = vmatprep.subr.mxu0 %v1286_v36 }
 0x146   : > { %2225 = vmatprep.mubr.f32.mxu0 %v2581_v18  ;;  %2309 = vmatpush3.msra.mxu0 %v1286_v36  ;;  %v1284_v36 = vld [vmem:[#allocation7 + $0x8] sm:$0xff] }
 0x147   : > { %2310 = vmatprep.subr.mxu0 %v1285_v35 }
 0x148   : > { %2311 = vmatpush3.msra.mxu0 %v1285_v35  ;;  %v1527_v35 = vld [vmem:[#allocation8 + $0x20] sm:$0xff] }
 0x149   : > { %2226 = vmatmul.mubr.f32.gmra.mxu0 %v2583_v19  ;;  %2312 = vmatprep.subr.mxu0 %v1284_v36 }
 0x14a   : > { %2313 = vmatpush3.msra.mxu0 %v1284_v36  ;;  %v1526_v36 = vld [vmem:[#allocation8 + $0x18] sm:$0xff] }
 0x14b   : > { %2314 = vmatprep.subr.mxu0 %v1283_v37 }
 0x14c   : > { %2315 = vmatpush3.msra.mxu0 %v1283_v37  ;;  %v1525_v37 = vld [vmem:[#allocation8 + $0x10] sm:$0xff] }
 0x1ed   : > { %v2206_v44 = vpop.f32.mrf.mxu0 }
 0x1ee   : > { %v1068_v47 = vadd.f32 %v2206_v44, %v1064_v43 }
 0x1ef   : > { %v946_v48 = vpop.f32.mrf.mxu0 }
 0x1f0   : > { %v1067_v49 = vadd.f32 %v1063_v45, %v946_v48  ;;  %v1084_v46 = vmax.f32 %v1068_v47, 0.0 }
 0x1f1   : > { %v2209_v50 = vpop.f32.mrf.mxu0 }
 0x1f2   : > { %v1083_v51 = vmax.f32 %v1067_v49, 0.0  ;;  %v1070_v52 = vadd.f32 %v2209_v50, %v1064_v43 }
 0x1f3   : > { %v956_v53 = vpop.f32.mrf.mxu0 }
 0x1f4   : > { %v1069_v54 = vadd.f32 %v1063_v45, %v956_v53  ;;  %2260 = vmatprep.mubr.f32.mxu1 %v1083_v51  ;;  %v1086_v59 = vmax.f32 %v1070_v52, 0.0 }
 0x1f5   : > { %v2212_v55 = vpop.f32.mrf.mxu0  ;;  %2261 = vmatmul.mubr.f32.vlgmr.msra.gmra.mxu1 %v1084_v46 }
 0x1f6   : > { %v1085_v57 = vmax.f32 %v1069_v54, 0.0  ;;  %v1072_v60 = vadd.f32 %v2212_v55, %v1064_v43 }
 0x1f7   : > { %v966_v61 = vpop.f32.mrf.mxu0 }
 0x1f8   : > { %v1071_v62 = vadd.f32 %v1063_v45, %v966_v61  ;;  %2263 = vmatprep.mubr.f32.mxu1 %v1085_v57  ;;  %v1088_v3 = vmax.f32 %v1072_v60, 0.0 }
 0x1f9   : > { %v2215_v0 = vpop.f32.mrf.mxu0  ;;  %2264 = vmatmul.mubr.f32.gmra.mxu1 %v1086_v59 }
 0x1fa   : > { %v1087_v2 = vmax.f32 %v1071_v62, 0.0  ;;  %v1074_v4 = vadd.f32 %v2215_v0, %v1064_v43 }
 0x1fb   : > { %v976_v5 = vpop.f32.mrf.mxu0 }
 0x1fc   : > { %v1073_v6 = vadd.f32 %v1063_v45, %v976_v5  ;;  %2266 = vmatprep.mubr.f32.mxu1 %v1087_v2  ;;  %v1090_v11 = vmax.f32 %v1074_v4, 0.0 }
 0x1fd   : > { %v2218_v8 = vpop.f32.mrf.mxu0  ;;  %2267 = vmatmul.mubr.f32.gmra.mxu1 %v1088_v3 }
 0x1fe   : > { %v1089_v10 = vmax.f32 %v1073_v6, 0.0  ;;  %v1076_v12 = vadd.f32 %v2218_v8, %v1066_v7 }
 0x1ff   : > { %v986_v13 = vpop.f32.mrf.mxu0 }
 0x200   : > { %v1075_v14 = vadd.f32 %v1065_v9, %v986_v13  ;;  %2269 = vmatprep.mubr.f32.mxu1 %v1089_v10  ;;  %v1092_v17 = vmax.f32 %v1076_v12, 0.0 }
 0x201   : > { %v2221_v15 = vpop.f32.mrf.mxu0  ;;  %2270 = vmatmul.mubr.f32.gmra.mxu1 %v1090_v11 }
 0x202   : > { %v1091_v16 = vmax.f32 %v1075_v14, 0.0  ;;  %v1078_v18 = vadd.f32 %v2221_v15, %v1066_v7 }
 0x203   : > { %v996_v19 = vpop.f32.mrf.mxu0 }
 0x204   : > { %v1077_v20 = vadd.f32 %v1065_v9, %v996_v19  ;;  %2272 = vmatprep.mubr.f32.mxu1 %v1091_v16  ;;  %v1094_v23 = vmax.f32 %v1078_v18, 0.0 }
 0x205   : > { %v2224_v21 = vpop.f32.mrf.mxu0  ;;  %2273 = vmatmul.mubr.f32.gmra.mxu1 %v1092_v17 }
 0x206   : > { %v1093_v22 = vmax.f32 %v1077_v20, 0.0  ;;  %v1080_v24 = vadd.f32 %v2224_v21, %v1066_v7 }
 0x207   : > { %v1006_v25 = vpop.f32.mrf.mxu0 }
 0x208   : > { %v1079_v26 = vadd.f32 %v1065_v9, %v1006_v25  ;;  %2275 = vmatprep.mubr.f32.mxu1 %v1093_v22  ;;  %v1096_v29 = vmax.f32 %v1080_v24, 0.0  ;;  %v1538_v24 = vld [vmem:[#allocation8 + $0x78] sm:$0xff]  ;;  %v1537_v25 = vld [vmem:[#allocation8 + $0x70] sm:$0xff] }
 0x209   : > { %v2227_v27 = vpop.f32.mrf.mxu0  ;;  %2276 = vmatmul.mubr.f32.gmra.mxu1 %v1094_v23  ;;  %v2832_v23 = vmov 0.0  }
 0x20a   : > { %v1095_v28 = vmax.f32 %v1079_v26, 0.0  ;;  %v1082_v30 = vadd.f32 %v2227_v27, %v1066_v7  ;;  %2340 = vmatprep.subr.mxu1 %v2832_v23  ;;  %2375 = vmatprep.subr.mxu0 %v2832_v23  ;;  %v1536_v26 = vld [vmem:[#allocation8 + $0x68] sm:$0xff]  ;;  %v1535_v27 = vld [vmem:[#allocation8 + $0x60] sm:$0xff] }
 0x20b   : > { %v1016_v31 = vpop.f32.mrf.mxu0  ;;  %2341 = vmatpush3.msra.mxu1 %v1538_v24 }
 0x20c   : > { %v1081_v32 = vadd.f32 %v1065_v9, %v1016_v31  ;;  %2278 = vmatprep.mubr.f32.mxu1 %v1095_v28  ;;  %v1098_v34 = vmax.f32 %v1082_v30, 0.0  ;;  %2342 = vmatprep.subr.mxu1 %v2832_v23  ;;  %v1534_v28 = vld [vmem:[#allocation8 + $0x58] sm:$0xff]  ;;  %v1532_v30 = vld [vmem:[#allocation8 + $0x48] sm:$0xff]  ;;  %v1531_v31 = vld [vmem:[#allocation8 + $0x40] sm:$0xff] }
 0x20d   : > { %2279 = vmatmul.mubr.f32.gmra.mxu1 %v1096_v29  ;;  %v1533_v29 = vld [vmem:[#allocation8 + $0x50] sm:$0xff] }
 0x20e   : > { %v1097_v33 = vmax.f32 %v1081_v32, 0.0  ;;  %2343 = vmatpush3.msra.mxu1 %v1537_v25  ;;  %v1530_v32 = vld [vmem:[#allocation8 + $0x38] sm:$0xff] }
 0x20f   : > { %2344 = vmatprep.subr.mxu1 %v2832_v23 }
 0x210   : > { %2281 = vmatprep.mubr.f32.mxu1 %v1097_v33  ;;  %2345 = vmatpush3.msra.mxu1 %v1536_v26  ;;  %v1529_v33 = vld [vmem:[#allocation8 + $0x30] sm:$0xff] }
 0x211   : > { %2282 = vmatmul.mubr.f32.gmra.mxu1 %v1098_v34  ;;  %2346 = vmatprep.subr.mxu1 %v2832_v23  ;;  %v1528_v34 = vld [vmem:[#allocation8 + $0x28] sm:$0xff] }
 0x212   : > { %2347 = vmatpush3.msra.mxu1 %v1535_v27  ;;  %2372 = vmatprep.mubr.msk.f32.mxu1 %vm2833_vm0, %v2832_v23 }
 0x213   : > { %2348 = vmatprep.subr.mxu1 %v2832_v23 }
 0x214   : > { %2349 = vmatpush3.msra.mxu1 %v1534_v28 }
 0x215   : > { %2350 = vmatprep.subr.mxu1 %v2832_v23 }
 0x216   : > { %2351 = vmatpush3.msra.mxu1 %v1533_v29 }
 0x217   : > { %2352 = vmatprep.subr.mxu1 %v2832_v23 }
 0x218   : > { %2353 = vmatpush3.msra.mxu1 %v1532_v30 }
 0x219   : > { %2354 = vmatprep.subr.mxu1 %v2832_v23 }
 0x21a   : > { %2355 = vmatpush3.msra.mxu1 %v1531_v31 }
 0x21b   : > { %2356 = vmatprep.subr.mxu1 %v2832_v23 }
 0x21c   : > { %2357 = vmatpush3.msra.mxu1 %v1530_v32 }
 0x21d   : > { %2358 = vmatprep.subr.mxu1 %v2832_v23 }
 0x21e   : > { %2359 = vmatpush3.msra.mxu1 %v1529_v33 }
 0x21f   : > { %2360 = vmatprep.subr.mxu1 %v2832_v23 }
 0x220   : > { %2361 = vmatpush3.msra.mxu1 %v1528_v34 }
 0x221   : > { %2362 = vmatprep.subr.mxu1 %v2832_v23 }
 0x222   : > { %2363 = vmatpush3.msra.mxu1 %v1527_v35 }
 0x223   : > { %2364 = vmatprep.subr.mxu1 %v2832_v23 }
 0x224   : > { %2365 = vmatpush3.msra.mxu1 %v1526_v36 }
 0x225   : > { %2366 = vmatprep.subr.mxu1 %v2832_v23 }
 0x226   : > { %2367 = vmatpush3.msra.mxu1 %v1525_v37 }
 0x227   : > { %2368 = vmatprep.subr.mxu1 %v2832_v23 }
 0x2b5   : > { %v2262_v39 = vpop.f32.mrf.mxu1 }
 0x2b6   : > { %v1194_v40 = vadd.f32 %v2262_v39, %v2013_v38  ;;  %v1523_v39 = vld [vmem:[#allocation8] sm:$0xff] }
 0x2b7   : > { %v1188_v41 = vpop.f32.mrf.mxu1 }
 0x2b8   : > { %v1189_v42 = vadd.f32 %v2013_v38, %v1188_v41  ;;  %v1268_v45 = vmax.f32 %v1194_v40, 0.0  ;;  %v1655_v40 = vld [vmem:[#allocation10 + $0x78] sm:$0xff]  ;;  %v1654_v41 = vld [vmem:[#allocation10 + $0x70] sm:$0xff] }
 0x2b9   : > { %v2265_v43 = vpop.f32.mrf.mxu1 }
 0x2ba   : > { %v1267_v44 = vmax.f32 %v1189_v42, 0.0  ;;  %v1204_v47 = vadd.f32 %v2265_v43, %v2013_v38  ;;  %v1653_v42 = vld [vmem:[#allocation10 + $0x68] sm:$0xff]  ;;  %v1652_v43 = vld [vmem:[#allocation10 + $0x60] sm:$0xff] }
 0x2bb   : > { %v1198_v48 = vpop.f32.mrf.mxu1 }
 0x2bc   : > { %v1199_v49 = vadd.f32 %v2013_v38, %v1198_v48  ;;  %2316 = vmatprep.mubr.f32.mxu0 %v1267_v44  ;;  %v1270_v46 = vmax.f32 %v1204_v47, 0.0  ;;  %v1651_v44 = vld [vmem:[#allocation10 + $0x58] sm:$0xff]  ;;  %v1649_v47 = vld [vmem:[#allocation10 + $0x48] sm:$0xff]  ;;  %v1648_v48 = vld [vmem:[#allocation10 + $0x40] sm:$0xff] }
 0x2bd   : > { %v2268_v50 = vpop.f32.mrf.mxu1  ;;  %2317 = vmatmul.mubr.f32.vlgmr.msra.gmra.mxu0 %v1268_v45  ;;  %v1650_v45 = vld [vmem:[#allocation10 + $0x50] sm:$0xff] }
 0x2be   : > { %v1269_v51 = vmax.f32 %v1199_v49, 0.0  ;;  %v1214_v52 = vadd.f32 %v2268_v50, %v2013_v38  ;;  %2376 = vmatpush3.msra.mxu0 %v1655_v40  ;;  %v1647_v49 = vld [vmem:[#allocation10 + $0x38] sm:$0xff]  ;;  %v1646_v50 = vld [vmem:[#allocation10 + $0x30] sm:$0xff] }
 0x2bf   : > { %v1208_v53 = vpop.f32.mrf.mxu1  ;;  %2377 = vmatprep.subr.mxu0 %v2832_v23 }
 0x2c0   : > { %v1209_v54 = vadd.f32 %v2013_v38, %v1208_v53  ;;  %2319 = vmatprep.mubr.f32.mxu0 %v1269_v51  ;;  %v1272_v57 = vmax.f32 %v1214_v52, 0.0  ;;  %2378 = vmatpush3.msra.mxu0 %v1654_v41  ;;  %v1645_v51 = vld [vmem:[#allocation10 + $0x28] sm:$0xff]  ;;  %v1643_v52 = vld [vmem:[#allocation10 + $0x18] sm:$0xff]  ;;  %v1642_v53 = vld [vmem:[#allocation10 + $0x10] sm:$0xff] }
 0x2c1   : > { %v2271_v55 = vpop.f32.mrf.mxu1  ;;  %2320 = vmatmul.mubr.f32.gmra.mxu0 %v1270_v46  ;;  %2379 = vmatprep.subr.mxu0 %v2832_v23  ;;  %v1644_v46 = vld [vmem:[#allocation10 + $0x20] sm:$0xff] }
 0x2c2   : > { %v1271_v56 = vmax.f32 %v1209_v54, 0.0  ;;  %v1224_v58 = vadd.f32 %v2271_v55, %v2013_v38  ;;  %2380 = vmatpush3.msra.mxu0 %v1653_v42 }
 0x2c3   : > { %v1218_v59 = vpop.f32.mrf.mxu1  ;;  %2381 = vmatprep.subr.mxu0 %v2832_v23 }
 0x2c4   : > { %v1219_v60 = vadd.f32 %v2013_v38, %v1218_v59  ;;  %2322 = vmatprep.mubr.f32.mxu0 %v1271_v56  ;;  %v1274_v63 = vmax.f32 %v1224_v58, 0.0  ;;  %2382 = vmatpush3.msra.mxu0 %v1652_v43 }
 0x2c5   : > { %v2274_v61 = vpop.f32.mrf.mxu1  ;;  %2323 = vmatmul.mubr.f32.gmra.mxu0 %v1272_v57  ;;  %2383 = vmatprep.subr.mxu0 %v2832_v23  ;;  %v3226_v57 = vld [vmem:[%s3323_s9] ss:$0 sm:$0xff] }
 0x2c6   : > { %v1273_v62 = vmax.f32 %v1219_v60, 0.0  ;;  %v1234_v0 = vadd.f32 %v2274_v61, %v2013_v38  ;;  %2384 = vmatpush3.msra.mxu0 %v1651_v44 }
 0x2c7   : > { %v1228_v1 = vpop.f32.mrf.mxu1  ;;  %2385 = vmatprep.subr.mxu0 %v2832_v23 }
 0x2c8   : > { %v1229_v2 = vadd.f32 %v2013_v38, %v1228_v1  ;;  %2325 = vmatprep.mubr.f32.mxu0 %v1273_v62  ;;  %v1276_v5 = vmax.f32 %v1234_v0, 0.0  ;;  %2386 = vmatpush3.msra.mxu0 %v1650_v45 }
 0x2c9   : > { %v2277_v3 = vpop.f32.mrf.mxu1  ;;  %2326 = vmatmul.mubr.f32.gmra.mxu0 %v1274_v63  ;;  %2387 = vmatprep.subr.mxu0 %v2832_v23 }
 0x2ca   : > { %v1275_v4 = vmax.f32 %v1229_v2, 0.0  ;;  %v1244_v6 = vadd.f32 %v2277_v3, %v2013_v38  ;;  %2388 = vmatpush3.msra.mxu0 %v1649_v47 }
 0x2cb   : > { %v1238_v7 = vpop.f32.mrf.mxu1  ;;  %2389 = vmatprep.subr.mxu0 %v2832_v23 }
 0x2cc   : > { %v1239_v8 = vadd.f32 %v2013_v38, %v1238_v7  ;;  %2328 = vmatprep.mubr.f32.mxu0 %v1275_v4  ;;  %v1278_v11 = vmax.f32 %v1244_v6, 0.0  ;;  %2390 = vmatpush3.msra.mxu0 %v1648_v48 }
 0x2cd   : > { %v2280_v9 = vpop.f32.mrf.mxu1  ;;  %2329 = vmatmul.mubr.f32.gmra.mxu0 %v1276_v5  ;;  %2391 = vmatprep.subr.mxu0 %v2832_v23 }
 0x2ce   : > { %v1277_v10 = vmax.f32 %v1239_v8, 0.0  ;;  %v1254_v12 = vadd.f32 %v2280_v9, %v2013_v38  ;;  %2392 = vmatpush3.msra.mxu0 %v1647_v49 }
 0x2cf   : > { %v1248_v13 = vpop.f32.mrf.mxu1  ;;  %2393 = vmatprep.subr.mxu0 %v2832_v23 }
 0x2d0   : > { %v1249_v14 = vadd.f32 %v2013_v38, %v1248_v13  ;;  %2331 = vmatprep.mubr.f32.mxu0 %v1277_v10  ;;  %v1280_v17 = vmax.f32 %v1254_v12, 0.0  ;;  %2394 = vmatpush3.msra.mxu0 %v1646_v50 }
 0x2d1   : > { %v2283_v15 = vpop.f32.mrf.mxu1  ;;  %2332 = vmatmul.mubr.f32.gmra.mxu0 %v1278_v11  ;;  %2395 = vmatprep.subr.mxu0 %v2832_v23 }
 0x2d2   : > { %v1279_v16 = vmax.f32 %v1249_v14, 0.0  ;;  %v1264_v18 = vadd.f32 %v2283_v15, %v2013_v38  ;;  %2396 = vmatpush3.msra.mxu0 %v1645_v51 }
 0x2d3   : > { %v1258_v19 = vpop.f32.mrf.mxu1  ;;  %2397 = vmatprep.subr.mxu0 %v2832_v23 }
 0x2d4   : > { %v1259_v20 = vadd.f32 %v2013_v38, %v1258_v19  ;;  %2334 = vmatprep.mubr.f32.mxu0 %v1279_v16  ;;  %v1282_v22 = vmax.f32 %v1264_v18, 0.0  ;;  %v1524_v38 = vld [vmem:[#allocation8 + $0x8] sm:$0xff]  ;;  %2398 = vmatpush3.msra.mxu0 %v1644_v46 }
 0x2d5   : > { %2335 = vmatmul.mubr.f32.gmra.mxu0 %v1280_v17  ;;  %2369 = vmatpush3.msra.mxu1 %v1524_v38 }
 0x2d6   : > { %v1281_v21 = vmax.f32 %v1259_v20, 0.0  ;;  %2370 = vmatprep.subr.mxu1 %v2832_v23  ;;  %2399 = vmatprep.subr.mxu0 %v2832_v23 }
 0x2d7   : > { %2371 = vmatpush3.msra.mxu1 %v1523_v39  ;;  %2400 = vmatpush3.msra.mxu0 %v1643_v52 }
 0x2d8   : > { %2337 = vmatprep.mubr.f32.mxu0 %v1281_v21  ;;  %2410 = vmatprep.subr.mxu1 %v2832_v23 }
 0x2d9   : > { %2338 = vmatmul.mubr.f32.gmra.mxu0 %v1282_v22  ;;  %2401 = vmatprep.subr.mxu0 %v2832_v23 }
 0x2da   : > { %2407 = vmatprep.mubr.msk.f32.mxu0 %vm2833_vm0, %v2832_v23  ;;  %2402 = vmatpush3.msra.mxu0 %v1642_v53 }
 0x2db   : > { %2403 = vmatprep.subr.mxu0 %v2832_v23 }
 0x37d   : > { %v2318_v54 = vpop.f32.mrf.mxu0 }
 0x37e   : > { %v1378_v63 = vadd.f32 %v2318_v54, %v3226_v57 }
 0x37f   : > { %v1372_v55 = vpop.f32.mrf.mxu0 }
 0x380   : > { %v1373_v60 = vadd.f32 %v3226_v57, %v1372_v55  ;;  %v1452_v8 = vmax.f32 %v1378_v63, 0.0 }
 0x381   : > { %v2321_v56 = vpop.f32.mrf.mxu0 }
 0x382   : > { %v1388_v62 = vadd.f32 %v2321_v56, %v3226_v57  ;;  %v1451_v4 = vmax.f32 %v1373_v60, 0.0 }
 0x383   : > { %v1382_v58 = vpop.f32.mrf.mxu0 }
 0x384   : > { %v1383_v59 = vadd.f32 %v3226_v57, %v1382_v58  ;;  %v1454_v6 = vmax.f32 %v1388_v62, 0.0  ;;  %v1467_v13 = vmax.f32 %v1451_v4, %v1452_v8 }
 0x385   : > { %v2324_v61 = vpop.f32.mrf.mxu0 }
 0x386   : > { %v1398_v0 = vadd.f32 %v2324_v61, %v3226_v57  ;;  %v1453_v2 = vmax.f32 %v1383_v59, 0.0  ;;  %v1468_v22 = vrot.slane %v1467_v13, 4 }
 0x387   : > { %v1392_v1 = vpop.f32.mrf.mxu0 }
 0x388   : > { %v1393_v3 = vadd.f32 %v3226_v57, %v1392_v1  ;;  %v1456_v9 = vmax.f32 %v1398_v0, 0.0  ;;  %v1474_v12 = vmax.f32 %v1453_v2, %v1454_v6  ;;  %v1469_v35 = vmax.f32 %v1467_v13, %v1468_v22 }
 0x389   : > { %v2327_v5 = vpop.f32.mrf.mxu0 }
 0x38a   : > { %v1455_v7 = vmax.f32 %v1393_v3, 0.0  ;;  %v1408_v10 = vadd.f32 %v2327_v5, %v3226_v57  ;;  %v1475_v21 = vrot.slane %v1474_v12, 4  ;;  %v1470_v49 = vrot.slane %v1469_v35, 2 }
 0x38b   : > { %v1402_v11 = vpop.f32.mrf.mxu0 }
 0x38c   : > { %v1481_v14 = vmax.f32 %v1455_v7, %v1456_v9  ;;  %v1403_v15 = vadd.f32 %v3226_v57, %v1402_v11  ;;  %v1458_v17 = vmax.f32 %v1408_v10, 0.0  ;;  %v1476_v33 = vmax.f32 %v1474_v12, %v1475_v21 }
 0x38d   : > { %v2330_v16 = vpop.f32.mrf.mxu0  ;;  %v1471_v0 = vmax.f32 %v1469_v35, %v1470_v49  ;;  %v1743_v49 = vld [vmem:[#allocation11 + $0x48] sm:$0xff] }
 0x38e   : > { %v1457_v18 = vmax.f32 %v1403_v15, 0.0  ;;  %v1418_v19 = vadd.f32 %v2330_v16, %v3226_v57  ;;  %v1482_v24 = vrot.slane %v1481_v14, 4  ;;  %v1477_v45 = vrot.slane %v1476_v33, 2 }
 0x38f   : > { %v1412_v20 = vpop.f32.mrf.mxu0  ;;  %v1472_v13 = vrot.slane %v1471_v0, 1 }
 0x390   : > { %v1488_v25 = vmax.f32 %v1457_v18, %v1458_v17  ;;  %v1413_v26 = vadd.f32 %v3226_v57, %v1412_v20  ;;  %v1460_v30 = vmax.f32 %v1418_v19, 0.0  ;;  %v1483_v36 = vmax.f32 %v1481_v14, %v1482_v24 }
 0x391   : > { %v2333_v27 = vpop.f32.mrf.mxu0  ;;  %v1478_v60 = vmax.f32 %v1476_v33, %v1477_v45  ;;  %v1473_v22 = vmax.f32 %v1471_v0, %v1472_v13  ;;  %v1746_v45 = vld [vmem:[#allocation11 + $0x60] sm:$0xff]  ;;  %v2016_v0 = vld [vmem:[%s3327_s13] ss:$0 sm:$0xff] }
 0x392   : > { %v1428_v28 = vadd.f32 %v2333_v27, %v3226_v57  ;;  %v1489_v29 = vrot.slane %v1488_v25, 4  ;;  %v1459_v31 = vmax.f32 %v1413_v26, 0.0  ;;  %v1484_v50 = vrot.slane %v1483_v36, 2 }
 0x393   : > { %v1422_v32 = vpop.f32.mrf.mxu0  ;;  %v1479_v8 = vrot.slane %v1478_v60, 1 }
 0x394   : > { %v1423_v34 = vadd.f32 %v3226_v57, %v1422_v32  ;;  %v1490_v37 = vmax.f32 %v1488_v25, %v1489_v29  ;;  %v1495_v38 = vmax.f32 %v1459_v31, %v1460_v30  ;;  %v1462_v40 = vmax.f32 %v1428_v28, 0.0 }
 0x395   : > { %v2336_v39 = vpop.f32.mrf.mxu0  ;;  %v1485_v1 = vmax.f32 %v1483_v36, %v1484_v50  ;;  %v1480_v18 = vmax.f32 %v1478_v60, %v1479_v8  ;;  %v1742_v50 = vld [vmem:[#allocation11 + $0x40] sm:$0xff] }
 0x396   : > { %v1461_v41 = vmax.f32 %v1423_v34, 0.0  ;;  %v1438_v42 = vadd.f32 %v2336_v39, %v3226_v57  ;;  %v1496_v43 = vrot.slane %v1495_v38, 4  ;;  %v1491_v51 = vrot.slane %v1490_v37, 2 }
 0x397   : > { %v1432_v44 = vpop.f32.mrf.mxu0  ;;  %v1486_v12 = vrot.slane %v1485_v1, 1  ;;  %v1555_v28 = vsel %vm1554_vm1, %v1480_v18, %v1473_v22 }
 0x398   : > { %v1502_v47 = vmax.f32 %v1461_v41, %v1462_v40  ;;  %v1433_v48 = vadd.f32 %v3226_v57, %v1432_v44  ;;  %v1497_v46 = vmax.f32 %v1495_v38, %v1496_v43  ;;  %v1464_v54 = vmax.f32 %v1438_v42, 0.0  ;;  %v1641_v40 = vld [vmem:[#allocation10 + $0x8] sm:$0xff]  ;;  %v1640_v41 = vld [vmem:[#allocation10] sm:$0xff]  ;;  %v1749_v42 = vld [vmem:[#allocation11 + $0x78] sm:$0xff] }
 0x399   : > { %v2339_v52 = vpop.f32.mrf.mxu0  ;;  %v1492_v2 = vmax.f32 %v1490_v37, %v1491_v51  ;;  %v1487_v21 = vmax.f32 %v1485_v1, %v1486_v12  ;;  %2404 = vmatpush3.msra.mxu0 %v1641_v40  ;;  %v1748_v43 = vld [vmem:[#allocation11 + $0x70] sm:$0xff]  ;;  %v1747_v44 = vld [vmem:[#allocation11 + $0x68] sm:$0xff]  ;;  %v1741_v51 = vld [vmem:[#allocation11 + $0x38] sm:$0xff] }
 0x39a   : > { %v1503_v53 = vrot.slane %v1502_v47, 4  ;;  %v1463_v55 = vmax.f32 %v1433_v48, 0.0  ;;  %v1448_v56 = vadd.f32 %v2339_v52, %v3226_v57  ;;  %v1498_v58 = vrot.slane %v1497_v46, 2  ;;  %2405 = vmatprep.subr.mxu0 %v2832_v23  ;;  %v1744_v48 = vld [vmem:[#allocation11 + $0x50] sm:$0xff]  ;;  %v1739_v52 = vld [vmem:[#allocation11 + $0x28] sm:$0xff] }
 0x39b   : > { %v1442_v59 = vpop.f32.mrf.mxu0  ;;  %v1493_v14 = vrot.slane %v1492_v2, 1  ;;  %v1557_v31 = vsel %vm1556_vm2, %v1487_v21, %v1555_v28  ;;  %2406 = vmatpush3.msra.mxu0 %v1640_v41 }
 0x39c   : > { %v1504_v61 = vmax.f32 %v1502_v47, %v1503_v53  ;;  %v1509_v62 = vmax.f32 %v1463_v55, %v1464_v54  ;;  %v1443_v63 = vadd.f32 %v3226_v57, %v1442_v59  ;;  %v1466_v5 = vmax.f32 %v1448_v56, 0.0  ;;  %v1745_v47 = vld [vmem:[#allocation11 + $0x58] sm:$0xff]  ;;  %v1738_v53 = vld [vmem:[#allocation11 + $0x20] sm:$0xff]  ;;  %v2015_v55 = vld [vmem:[%s3325_s11] ss:$0 sm:$0xff] }
 0x39d   : > { %v1499_v7 = vmax.f32 %v1497_v46, %v1498_v58  ;;  %v1494_v24 = vmax.f32 %v1492_v2, %v1493_v14  ;;  %v1740_v46 = vld [vmem:[#allocation11 + $0x30] sm:$0xff]  ;;  %v1737_v54 = vld [vmem:[#allocation11 + $0x18] sm:$0xff] }
 0x39e   : > { %v1505_v3 = vrot.slane %v1504_v61, 2  ;;  %v1510_v4 = vrot.slane %v1509_v62, 4  ;;  %v1465_v6 = vmax.f32 %v1443_v63, 0.0  ;;  %v1734_v63 = vld [vmem:[#allocation11] sm:$0xff] }
 0x39f   : > { %v1500_v17 = vrot.slane %v1499_v7, 1  ;;  %v1559_v33 = vsel %vm1558_vm3, %v1494_v24, %v1557_v31 }
 0x3a0   : > { %v1506_v9 = vmax.f32 %v1504_v61, %v1505_v3  ;;  %v1511_v10 = vmax.f32 %v1509_v62, %v1510_v4  ;;  %v1516_v11 = vmax.f32 %v1465_v6, %v1466_v5  ;;  %v1736_v61 = vld [vmem:[#allocation11 + $0x10] sm:$0xff]  ;;  %v1735_v62 = vld [vmem:[#allocation11 + $0x8] sm:$0xff] }
 0x3a1   : > { %v1501_v27 = vmax.f32 %v1499_v7, %v1500_v17  ;;  %v2017_v5 = vld [vmem:[%s3372_s12] ss:$0 sm:$0xff] }
 0x3a2   : > { %v1512_v15 = vrot.slane %v1511_v10, 2  ;;  %v1517_v16 = vrot.slane %v1516_v11, 4  ;;  %v1507_v57 = vrot.slane %v1506_v9, 1 }
 0x3a3   : > { %v1561_v35 = vsel %vm1560_vm4, %v1501_v27, %v1559_v33 }
 0x3a4   : > { %v1513_v19 = vmax.f32 %v1511_v10, %v1512_v15  ;;  %v1518_v20 = vmax.f32 %v1516_v11, %v1517_v16  ;;  %v1508_v29 = vmax.f32 %v1506_v9, %v1507_v57 }
 0x3a6   : > { %v1514_v25 = vrot.slane %v1513_v19, 1  ;;  %v1519_v26 = vrot.slane %v1518_v20, 2  ;;  %v1563_v37 = vsel %vm1562_vm5, %v1508_v29, %v1561_v35 }
 0x3a8   : > { %v1520_v30 = vmax.f32 %v1518_v20, %v1519_v26  ;;  %v1515_v32 = vmax.f32 %v1513_v19, %v1514_v25 }
 0x3aa   : > { %v1521_v34 = vrot.slane %v1520_v30, 1  ;;  %v1565_v38 = vsel %vm1564_vm6, %v1515_v32, %v1563_v37 }
 0x3ac   : > { %v1522_v36 = vmax.f32 %v1520_v30, %v1521_v34 }
 0x3ae   : > { %v1567_v39 = vsel %vm1566_vm7, %v1522_v36, %v1565_v38 }
 0x3af   : > { %2373 = vmatmul.mubr.f32.vlgmr.msra.gmra.mxu1 %v1567_v39 }
 0x3b0   : > { %2442 = vmatprep.mubr.msk.f32.mxu1 %vm2833_vm0, %v2832_v23  ;;  %2411 = vmatpush3.msra.mxu1 %v1749_v42 }
 0x3b1   : > { %2412 = vmatprep.subr.mxu1 %v2832_v23 }
 0x3b2   : > { %2413 = vmatpush3.msra.mxu1 %v1748_v43 }
 0x3b3   : > { %2414 = vmatprep.subr.mxu1 %v2832_v23 }
 0x3b4   : > { %2415 = vmatpush3.msra.mxu1 %v1747_v44 }
 0x3b5   : > { %2416 = vmatprep.subr.mxu1 %v2832_v23 }
 0x3b6   : > { %2417 = vmatpush3.msra.mxu1 %v1746_v45 }
 0x3b7   : > { %2418 = vmatprep.subr.mxu1 %v2832_v23 }
 0x3b8   : > { %2419 = vmatpush3.msra.mxu1 %v1745_v47 }
 0x3b9   : > { %2420 = vmatprep.subr.mxu1 %v2832_v23 }
 0x3ba   : > { %2421 = vmatpush3.msra.mxu1 %v1744_v48 }
 0x3bb   : > { %2422 = vmatprep.subr.mxu1 %v2832_v23 }
 0x3bc   : > { %2423 = vmatpush3.msra.mxu1 %v1743_v49 }
 0x3bd   : > { %2424 = vmatprep.subr.mxu1 %v2832_v23 }
 0x3be   : > { %2425 = vmatpush3.msra.mxu1 %v1742_v50 }
 0x3bf   : > { %2426 = vmatprep.subr.mxu1 %v2832_v23 }
 0x3c0   : > { %2427 = vmatpush3.msra.mxu1 %v1741_v51 }
 0x3c1   : > { %2428 = vmatprep.subr.mxu1 %v2832_v23 }
 0x3c2   : > { %2429 = vmatpush3.msra.mxu1 %v1740_v46 }
 0x3c3   : > { %2430 = vmatprep.subr.mxu1 %v2832_v23 }
 0x3c4   : > { %2431 = vmatpush3.msra.mxu1 %v1739_v52 }
 0x3c5   : > { %2432 = vmatprep.subr.mxu1 %v2832_v23 }
 0x3c6   : > { %2433 = vmatpush3.msra.mxu1 %v1738_v53 }
 0x3c7   : > { %2434 = vmatprep.subr.mxu1 %v2832_v23 }
 0x3c8   : > { %2435 = vmatpush3.msra.mxu1 %v1737_v54 }
 0x3c9   : > { %2436 = vmatprep.subr.mxu1 %v2832_v23 }
 0x3ca   : > { %2437 = vmatpush3.msra.mxu1 %v1736_v61 }
 0x3cb   : > { %2438 = vmatprep.subr.mxu1 %v2832_v23 }
 0x3cc   : > { %2439 = vmatpush3.msra.mxu1 %v1735_v62 }
 0x3cd   : > { %2440 = vmatprep.subr.mxu1 %v2832_v23 }
 0x3ce   : > { %2441 = vmatpush3.msra.mxu1 %v1734_v63 }
 0x46f   : > { %v1635_v56 = vpop.f32.mrf.mxu1 }
 0x470   : > { %v1636_v58 = vadd.f32 %v2015_v55, %v1635_v56 }
 0x471   : > { %v2374_v59 = vpop.f32.mrf.mxu1 }
 0x472   : > { %v1639_v60 = vmax.f32 %v1636_v58, 0.0 }
 0x474   : > { %2408 = vmatmul.mubr.f32.vlgmr.msra.gmra.mxu0 %v1639_v60 }
 0x534   : > { %v1729_v1 = vpop.f32.mrf.mxu0 }
 0x535   : > { %v1730_v2 = vadd.f32 %v2016_v0, %v1729_v1 }
 0x536   : > { %v2409_v3 = vpop.f32.mrf.mxu0 }
 0x537   : > { %v1733_v4 = vmax.f32 %v1730_v2, 0.0 }
 0x539   : > { %2443 = vmatmul.mubr.f32.vlgmr.msra.gmra.mxu1 %v1733_v4 }
 0x5f9   : > { %v1823_v23 = vpop.f32.mrf.mxu1 }
 0x5fa   : > { %v1824_v6 = vadd.f32 %v2017_v5, %v1823_v23 }
 0x5fb   : > { %v2444_v7 = vpop.f32.mrf.mxu1 }
 0x5fc   : > { %1827 = vst [vmem:[%s648_s20] sm:$0xff] %v1824_v6 }
 0x5fd   : > { %2755 = shalt.err (!%p2752_p4)
}
 0x5fe   : > { %s2756_s15 = scalar_lea.hbm %s3277_s17, 128  ;;  %s2760_s12 = scalar_lea.hbm %s3373_s18, 256 }
 0x5ff   : > { %p2757_p12 = scmp.ne.s32.totalorder %s3277_s17, %s2756_s15  ;;  %p2761_p7 = scmp.lt.s32.totalorder %s3277_s17, %s3373_s18 }
 0x600   : > { %p2762_p8 = scmp.lt.s32.totalorder %s2760_s12, %s2756_s15 }
 0x601   : > { %p2758_p6 = pnand %p2757_p12, %p3374_p0 }
 0x602   : > { %p2763_p10 = por %p2762_p8, %p2761_p7 }
 0x603   : > { %p2759_p2 = pneg %p2758_p6 }
 0x605   : > { %p2764_p11 = pnand %p2763_p10, %p2759_p2 }
 0x607   : > { %2767 = shalt.err (!%p2764_p11)
}
 0x608   : > { %2467 = dma.vmem_to_hbm [thread:$0]  (%p3374_p0), %s1843_s25, 128, %s3277_s17, %s1829_s8  }
 0x609 PF: > { %s1854_s30 = sand.u32 1, %s2806_s21   ;;  %p3375_p13 = scmp.ne.s32.totalorder %s3361_s29, 0 }
 0x60a   : > { %p3376_p5 = scmp.ge.s32.totalorder %s2818_s24, 2  ;;  %s1855_s16 = scalar_lea.sflag [#allocation4], %s1854_s30 }
 0x60c   : > { %p2490_p9 = pnand %p3376_p5, %p3375_p13 }
 0x60e   : > { %p2491_p1 = pneg %p2490_p9 }
 0x610   : > { %2801 = dma.done.wait (%p2491_p1), %s1855_s16, 128  }
 0x611   : > { %2803 = vsyncadd (%p2491_p1), %s1855_s16, 4294967168  ;;  %s3377_s24 = sld [smem:[#allocation20_spill]]  ;;  %s3380_s21 = smov %s2810_s22 }
 0x612   : > { %s3378_s14 = sld [smem:[#allocation19_spill]] }
 0x613   : > { %s3379_s23 = sld [smem:[#allocation21_spill]] }
 0x617   : > { %p32_p3 = scmp.ge.s32.totalorder %s3377_s24, 4  }
 0x618   : > { %s3381_s22 = smov %s3378_s14 }
 0x619   :  { %34 = sbr.rel (!%p32_p3) target bundleno = 17 (0x11), region = 155 }
 0x61e   :  { %1860 = vsyncpa [#allocation3], 1 }
 0x61f   :  { %1862 = vsyncpa [#allocation3 + $0x1], 1 }
 0x620   :  { %1863 = vsyncpa [#allocation6], 1 }
 0x621   :  { %1864 = vsyncpa [#allocation9], 1 }
 0x622   :  { %1865 = vsyncpa [#allocation12], 1 }
 0x623   :  { %1866 = vsyncpa [#allocation4], 1 }
 0x624   :  { %1868 = vsyncpa [#allocation4 + $0x1], 1 }

</bundles_post_ra>
